<compile_context>
chip_gen: v7x
topology: tpu7x:2x2x1
jax: 0.10.0
libtpu: 0.0.40
codegen_flags: <defaults>
</compile_context>

<pallas_src>
import functools

import jax
import jax.numpy as jnp
from jax import lax
from jax.experimental import pallas as pl
from jax.experimental.pallas import tpu as pltpu


def _round_up(x, m):
    return ((x + m - 1) // m) * m


def _sigmoid(x):
    # EUP-cheaper sigmoid: a single tanh instead of exp + reciprocal.
    return 0.5 * jnp.tanh(0.5 * x) + 0.5


def _lstm_stack_kernel(x_ref, wih0_ref, wihL_ref, whh_ref, b_ref,
                       out_ref, h_out_ref, c_out_ref,
                       act_sc, gx_sc,
                       *, seq_len, b_pad, h_pad, num_layers):
    """All LSTM layers in one grid step; inter-layer activations stay in VMEM.

    x_ref:     (T*B_pad, E)            time-major, batch padded to sublane multiple
    wih0_ref:  (E, 4*H_pad)            layer-0 input weights (pre-transposed, padded)
    wihL_ref:  (max(L-1,1), H_pad, 4*H_pad)  input weights for layers 1..L-1
    whh_ref:   (L, H_pad, 4*H_pad)     recurrent weights
    b_ref:     (L, 1, 4*H_pad)         b_ih + b_hh (zero-padded)
    out_ref:   (T*B_pad, H_pad)        last layer's hidden states
    h_out_ref: (L, B_pad, H_pad)       final hidden states
    c_out_ref: (L, B_pad, H_pad)       final cell states
    act_sc:    VMEM (T*B_pad, H_pad)   inter-layer activation buffer
    gx_sc:     VMEM (T*B_pad, 4*H_pad) hoisted input-projection buffer
    """

    def run_layer(layer, dst_ref):
        # (a) Hoisted input projection: one big MXU-friendly GEMM over all timesteps.
        if layer == 0:
            gx_sc[...] = (jnp.dot(x_ref[...], wih0_ref[...],
                                  preferred_element_type=jnp.float32)
                          + b_ref[0])
        else:
            # Reads the *whole* previous-layer activation before any write below,
            # so a single act buffer is safe.
            gx_sc[...] = (jnp.dot(act_sc[...], wihL_ref[layer - 1],
                                  preferred_element_type=jnp.float32)
                          + b_ref[layer])

        whh = whh_ref[layer]          # recurrent weights loaded once per layer

        def step(off, h_prev, c_prev):
            # gates: (B_pad, 4*H_pad); each gate block is a lane-aligned vreg view.
            gates = gx_sc[pl.ds(off, b_pad), :] + jnp.dot(
                h_prev, whh, preferred_element_type=jnp.float32)
            # PyTorch gate order: i, f, g, o
            i_g = _sigmoid(gates[:, 0 * h_pad:1 * h_pad])
            f_g = _sigmoid(gates[:, 1 * h_pad:2 * h_pad])
            g_g = jnp.tanh(gates[:, 2 * h_pad:3 * h_pad])
            o_g = _sigmoid(gates[:, 3 * h_pad:4 * h_pad])
            c_new = f_g * c_prev + i_g * g_g
            h_new = o_g * jnp.tanh(c_new)
            dst_ref[pl.ds(off, b_pad), :] = h_new          # lane-dense store
            return h_new, c_new

        h0 = jnp.zeros((b_pad, h_pad), jnp.float32)
        c0 = jnp.zeros((b_pad, h_pad), jnp.float32)

        if seq_len <= 16:
            # Short sequence: fully unroll (static offsets, LLO visibility).
            h_n, c_n = h0, c0
            for t in range(seq_len):
                h_n, c_n = step(t * b_pad, h_n, c_n)
        else:
            def body(t, carry):
                h_prev, c_prev = carry
                off = pl.multiple_of(t * b_pad, b_pad)     # sublane-aligned offset
                return step(off, h_prev, c_prev)
            h_n, c_n = lax.fori_loop(0, seq_len, body, (h0, c0))

        # Final state written once per layer (not per timestep).
        h_out_ref[layer] = h_n
        c_out_ref[layer] = c_n

    for layer in range(num_layers):
        dst = out_ref if layer == num_layers - 1 else act_sc
        run_layer(layer, dst)


def lstm_stack(x2d, wih0_p, wihL_p, whh_p, b_p, *, seq_len, b_pad, h_pad,
               num_layers):
    """x2d: (T*B_pad, E) f32; padded / pre-transposed weight stacks."""
    tb, e_in = x2d.shape
    assert tb == seq_len * b_pad
    lm1 = wihL_p.shape[0]

    kernel = functools.partial(_lstm_stack_kernel, seq_len=seq_len, b_pad=b_pad,
                               h_pad=h_pad, num_layers=num_layers)

    # Everything lives in VMEM at once (grid=(1,)); size the scoped limit to fit.
    est_bytes = 4 * (x2d.size + wih0_p.size + wihL_p.size + whh_p.size + b_p.size
                     + tb * h_pad + 2 * num_layers * b_pad * h_pad   # outputs
                     + tb * h_pad + tb * 4 * h_pad)                  # scratches
    vmem_limit = int(min(max(2 * est_bytes + (1 << 20), 32 << 20), 100 << 20))

    out2d, h_n, c_n = pl.pallas_call(
        kernel,
        out_shape=(
            jax.ShapeDtypeStruct((tb, h_pad), jnp.float32),
            jax.ShapeDtypeStruct((num_layers, b_pad, h_pad), jnp.float32),
            jax.ShapeDtypeStruct((num_layers, b_pad, h_pad), jnp.float32),
        ),
        grid_spec=pltpu.PrefetchScalarGridSpec(
            num_scalar_prefetch=0,
            grid=(1,),
            in_specs=[
                pl.BlockSpec((tb, e_in), lambda i: (0, 0)),
                pl.BlockSpec((e_in, 4 * h_pad), lambda i: (0, 0)),
                pl.BlockSpec((lm1, h_pad, 4 * h_pad), lambda i: (0, 0, 0)),
                pl.BlockSpec((num_layers, h_pad, 4 * h_pad), lambda i: (0, 0, 0)),
                pl.BlockSpec((num_layers, 1, 4 * h_pad), lambda i: (0, 0, 0)),
            ],
            out_specs=[
                pl.BlockSpec((tb, h_pad), lambda i: (0, 0)),
                pl.BlockSpec((num_layers, b_pad, h_pad), lambda i: (0, 0, 0)),
                pl.BlockSpec((num_layers, b_pad, h_pad), lambda i: (0, 0, 0)),
            ],
            scratch_shapes=[
                pltpu.VMEM((tb, h_pad), jnp.float32),       # inter-layer activations
                pltpu.VMEM((tb, 4 * h_pad), jnp.float32),   # hoisted input projection
            ],
        ),
        compiler_params=pltpu.CompilerParams(
            dimension_semantics=("arbitrary",),
            vmem_limit_bytes=vmem_limit),
    )(x2d, wih0_p, wihL_p, whh_p, b_p)
    return out2d, h_n, c_n


class Seq2SeqEncoderPallas:
    """JAX/Pallas port of the PyTorch Seq2SeqEncoder (Embedding + multi-layer LSTM)."""

    def __init__(self, vocab_size, embed_size, num_hiddens, num_layers,
                 dropout=0.0, key=jax.random.PRNGKey(0)):
        # TODO(synk): inference path only; PyTorch's inter-layer dropout (training
        #             mode) is not implemented.
        assert dropout == 0.0
        self.num_layers = num_layers
        self.num_hiddens = num_hiddens
        self.embed_size = embed_size
        self.h_pad = _round_up(num_hiddens, 128)     # lane-aligned hidden width
        Hp = self.h_pad

        keys = jax.random.split(key, 1 + 4 * num_layers)
        # nn.Embedding default init: N(0, 1)
        self.embedding = jax.random.normal(keys[0], (vocab_size, embed_size),
                                           dtype=jnp.float32)
        # nn.LSTM default init: U(-1/sqrt(H), 1/sqrt(H)) for all params
        bound = 1.0 / (num_hiddens ** 0.5)
        self.params = []          # raw PyTorch-layout params (used by the reference)
        wih0_p = None
        wihL_list, whh_list, b_list = [], [], []
        for layer in range(num_layers):
            in_dim = embed_size if layer == 0 else num_hiddens
            k = keys[1 + 4 * layer: 1 + 4 * (layer + 1)]
            w_ih = jax.random.uniform(k[0], (4 * num_hiddens, in_dim),
                                      minval=-bound, maxval=bound, dtype=jnp.float32)
            w_hh = jax.random.uniform(k[1], (4 * num_hiddens, num_hiddens),
                                      minval=-bound, maxval=bound, dtype=jnp.float32)
            b_ih = jax.random.uniform(k[2], (4 * num_hiddens,),
                                      minval=-bound, maxval=bound, dtype=jnp.float32)
            b_hh = jax.random.uniform(k[3], (4 * num_hiddens,),
                                      minval=-bound, maxval=bound, dtype=jnp.float32)
            self.params.append((w_ih, w_hh, b_ih, b_hh))
            in_width = embed_size if layer == 0 else Hp
            wih_p, whh_p, b_p = self._prep_layer(w_ih, w_hh, b_ih, b_hh, in_width)
            if layer == 0:
                wih0_p = wih_p
            else:
                wihL_list.append(wih_p)
            whh_list.append(whh_p)
            b_list.append(b_p)

        self.wih0_p = wih0_p                                   # (E, 4Hp)
        self.wihL_p = (jnp.stack(wihL_list, axis=0) if wihL_list
                       else jnp.zeros((1, Hp, 4 * Hp), jnp.float32))  # dummy, unread
        self.whh_p = jnp.stack(whh_list, axis=0)               # (L, Hp, 4Hp)
        self.b_p = jnp.stack(b_list, axis=0)                   # (L, 1, 4Hp)

    def _prep_layer(self, w_ih, w_hh, b_ih, b_hh, in_width):
        """Pre-transpose and pad weights so each gate block is lane-aligned."""
        H, Hp = self.num_hiddens, self.h_pad
        in_dim = w_ih.shape[1]
        wih_t, whh_t, b = w_ih.T, w_hh.T, b_ih + b_hh
        wih_p = jnp.zeros((in_width, 4 * Hp), jnp.float32)
        whh_p = jnp.zeros((Hp, 4 * Hp), jnp.float32)
        b_p = jnp.zeros((1, 4 * Hp), jnp.float32)
        for g in range(4):
            wih_p = wih_p.at[:in_dim, g * Hp:g * Hp + H].set(wih_t[:, g * H:(g + 1) * H])
            whh_p = whh_p.at[:H, g * Hp:g * Hp + H].set(whh_t[:, g * H:(g + 1) * H])
            b_p = b_p.at[:, g * Hp:g * Hp + H].set(b[None, g * H:(g + 1) * H])
        return wih_p, whh_p, b_p

    def __call__(self, X):
        # X: (batch, seq) int32
        B, T = X.shape
        H, Hp = self.num_hiddens, self.h_pad
        Bp = _round_up(max(B, 8), 8)                     # sublane-aligned batch
        emb = jnp.take(self.embedding, X, axis=0)        # (B, T, E)   -- XLA glue
        x = jnp.transpose(emb, (1, 0, 2))                # (T, B, E)   time-major
        x = jnp.pad(x, ((0, 0), (0, Bp - B), (0, 0)))    # (T, Bp, E)
        x2d = x.reshape(T * Bp, self.embed_size).astype(jnp.float32)

        out2d, h_n, c_n = lstm_stack(
            x2d, self.wih0_p, self.wihL_p, self.whh_p, self.b_p,
            seq_len=T, b_pad=Bp, h_pad=Hp, num_layers=self.num_layers)

        out = out2d.reshape(T, Bp, Hp)[:, :B, :H]        # (T, B, H)
        state = (h_n[:, :B, :H], c_n[:, :B, :H])         # (num_layers, B, H) each
        return out, state


def _reference_forward(enc, X):
    """Pure-JAX reference (no Pallas, no padding) matching PyTorch semantics."""
    emb = jnp.take(enc.embedding, X, axis=0)
    x = jnp.transpose(emb, (1, 0, 2))
    T, B, _ = x.shape
    H = enc.num_hiddens
    h_stack, c_stack = [], []
    for (w_ih, w_hh, b_ih, b_hh) in enc.params:
        h = jnp.zeros((B, H), jnp.float32)
        c = jnp.zeros((B, H), jnp.float32)
        outs = []
        for t in range(T):
            gates = x[t] @ w_ih.T + h @ w_hh.T + b_ih + b_hh
            i = jax.nn.sigmoid(gates[:, 0 * H:1 * H])
            f = jax.nn.sigmoid(gates[:, 1 * H:2 * H])
            g = jnp.tanh(gates[:, 2 * H:3 * H])
            o = jax.nn.sigmoid(gates[:, 3 * H:4 * H])
            c = f * c + i * g
            h = o * jnp.tanh(c)
            outs.append(h)
        x = jnp.stack(outs, axis=0)
        h_stack.append(h)
        c_stack.append(c)
    return x, (jnp.stack(h_stack, 0), jnp.stack(c_stack, 0))


if __name__ == "__main__":
    vocab_size, embed_size, num_hiddens, num_layers = 32, 16, 32, 2
    batch, seq = 4, 8

    key = jax.random.PRNGKey(0)
    k_tok, k_param = jax.random.split(key)
    X = jax.random.randint(k_tok, (batch, seq), 0, vocab_size, dtype=jnp.int32)

    enc = Seq2SeqEncoderPallas(vocab_size, embed_size, num_hiddens, num_layers,
                               dropout=0.0, key=k_param)

    out, (h_n, c_n) = enc(X)
    out = jax.block_until_ready(out)
    h_n = jax.block_until_ready(h_n)
    c_n = jax.block_until_ready(c_n)

    # sanity check against pure-JAX reference
    ref_out, (ref_h, ref_c) = _reference_forward(enc, X)
    assert out.shape == (seq, batch, num_hiddens)
    assert h_n.shape == (num_layers, batch, num_hiddens)
    assert c_n.shape == (num_layers, batch, num_hiddens)
    # tanh-based sigmoid + padded MXU accumulation differ from the reference at ~1e-6
    assert jnp.allclose(out, ref_out, atol=1e-4)
    assert jnp.allclose(h_n, ref_h, atol=1e-4)
    assert jnp.allclose(c_n, ref_c, atol=1e-4)

    print("KERNEL_OK")
</pallas_src>

<mosaic_0001>
module attributes {stable_mosaic.version = 11 : i64} {
  func.func @_lstm_stack_kernel(%arg0: i32, %arg1: memref<64x16xf32, #tpu.memory_space<vmem>>, %arg2: memref<16x512xf32, #tpu.memory_space<vmem>>, %arg3: memref<1x128x512xf32, #tpu.memory_space<vmem>>, %arg4: memref<2x128x512xf32, #tpu.memory_space<vmem>>, %arg5: memref<2x1x512xf32, #tpu.memory_space<vmem>>, %arg6: memref<64x128xf32, #tpu.memory_space<vmem>>, %arg7: memref<2x8x128xf32, #tpu.memory_space<vmem>>, %arg8: memref<2x8x128xf32, #tpu.memory_space<vmem>>, %arg9: memref<64x128xf32, #tpu.memory_space<vmem>>, %arg10: memref<64x512xf32, #tpu.memory_space<vmem>>) attributes {dimension_semantics = [#tpu.dimension_semantics<arbitrary>], iteration_bounds = array<i64: 1>, scalar_prefetch = 0 : i64, scratch_operands = 2 : i64, tpu.core_type = #tpu.core_type<tc>, window_params = [{pipeline_mode = #tpu.pipeline_mode<synchronous>, transform_indices = @transform_0, window_bounds = array<i64: 64, 16>}, {pipeline_mode = #tpu.pipeline_mode<synchronous>, transform_indices = @transform_1, window_bounds = array<i64: 16, 512>}, {pipeline_mode = #tpu.pipeline_mode<synchronous>, transform_indices = @transform_2, window_bounds = array<i64: 1, 128, 512>}, {pipeline_mode = #tpu.pipeline_mode<synchronous>, transform_indices = @transform_3, window_bounds = array<i64: 2, 128, 512>}, {pipeline_mode = #tpu.pipeline_mode<synchronous>, transform_indices = @transform_4, window_bounds = array<i64: 2, 1, 512>}, {pipeline_mode = #tpu.pipeline_mode<synchronous>, transform_indices = @transform_5, window_bounds = array<i64: 64, 128>}, {pipeline_mode = #tpu.pipeline_mode<synchronous>, transform_indices = @transform_6, window_bounds = array<i64: 2, 8, 128>}, {pipeline_mode = #tpu.pipeline_mode<synchronous>, transform_indices = @transform_7, window_bounds = array<i64: 2, 8, 128>}]} {
    %c0 = arith.constant 0 : index
    %c0_0 = arith.constant 0 : index
    %0 = vector.load %arg1[%c0, %c0_0] : memref<64x16xf32, #tpu.memory_space<vmem>>, vector<64x16xf32>
    %c0_1 = arith.constant 0 : index
    %c0_2 = arith.constant 0 : index
    %1 = vector.load %arg2[%c0_1, %c0_2] : memref<16x512xf32, #tpu.memory_space<vmem>>, vector<16x512xf32>
    %cst = arith.constant dense<0.000000e+00> : vector<64x512xf32>
    %2 = tpu.matmul %0, %1, %cst {dimension_numbers = #tpu.dot_dimension_numbers<[1], [0], [0], [1], [0, 0, 1, 1], [], []>} : vector<64x16xf32>, vector<16x512xf32>, vector<64x512xf32> -> vector<64x512xf32>
    %c0_3 = arith.constant 0 : index
    %c0_4 = arith.constant 0 : index
    %c0_5 = arith.constant 0 : index
    %3 = vector.load %arg5[%c0_3, %c0_4, %c0_5] : memref<2x1x512xf32, #tpu.memory_space<vmem>>, vector<1x1x512xf32>
    %4 = vector.shape_cast %3 : vector<1x1x512xf32> to vector<1x512xf32>
    %5 = vector.broadcast %4 : vector<1x512xf32> to vector<64x512xf32>
    %6 = arith.addf %2, %5 : vector<64x512xf32>
    %c0_6 = arith.constant 0 : index
    %c0_7 = arith.constant 0 : index
    %7 = vector.load %arg10[%c0_6, %c0_7] : memref<64x512xf32, #tpu.memory_space<vmem>>, vector<64x512xf32>
    tpu.vector_store %arg10[%c0_6, %c0_7], %6 {strides = array<i32>} : memref<64x512xf32, #tpu.memory_space<vmem>>, vector<64x512xf32>,
    %c0_8 = arith.constant 0 : index
    %c0_9 = arith.constant 0 : index
    %c0_10 = arith.constant 0 : index
    %8 = vector.load %arg4[%c0_8, %c0_9, %c0_10] : memref<2x128x512xf32, #tpu.memory_space<vmem>>, vector<1x128x512xf32>
    %9 = vector.shape_cast %8 : vector<1x128x512xf32> to vector<128x512xf32>
    %cst_11 = arith.constant 0.000000e+00 : f32
    %10 = vector.broadcast %cst_11 : f32 to vector<8x128xf32>
    %cst_12 = arith.constant 0.000000e+00 : f32
    %11 = vector.broadcast %cst_12 : f32 to vector<8x128xf32>
    %c0_13 = arith.constant 0 : index
    %c0_14 = arith.constant 0 : index
    %12 = vector.load %arg10[%c0_13, %c0_14] : memref<64x512xf32, #tpu.memory_space<vmem>>, vector<8x512xf32>
    %cst_15 = arith.constant dense<0.000000e+00> : vector<8x512xf32>
    %13 = tpu.matmul %10, %9, %cst_15 {dimension_numbers = #tpu.dot_dimension_numbers<[1], [0], [0], [1], [0, 0, 1, 1], [], []>} : vector<8x128xf32>, vector<128x512xf32>, vector<8x512xf32> -> vector<8x512xf32>
    %14 = arith.addf %12, %13 : vector<8x512xf32>
    %15 = vector.extract_strided_slice %14 {offsets = [0, 0], sizes = [8, 128], strides = [1, 1]} : vector<8x512xf32> to vector<8x128xf32>
    %cst_16 = arith.constant 5.000000e-01 : f32
    %16 = vector.broadcast %cst_16 : f32 to vector<8x128xf32>
    %17 = arith.mulf %16, %15 : vector<8x128xf32>
    %18 = math.tanh %17 : vector<8x128xf32>
    %cst_17 = arith.constant 5.000000e-01 : f32
    %19 = vector.broadcast %cst_17 : f32 to vector<8x128xf32>
    %20 = arith.mulf %19, %18 : vector<8x128xf32>
    %cst_18 = arith.constant 5.000000e-01 : f32
    %21 = vector.broadcast %cst_18 : f32 to vector<8x128xf32>
    %22 = arith.addf %20, %21 : vector<8x128xf32>
    %23 = vector.extract_strided_slice %14 {offsets = [0, 128], sizes = [8, 128], strides = [1, 1]} : vector<8x512xf32> to vector<8x128xf32>
    %cst_19 = arith.constant 5.000000e-01 : f32
    %24 = vector.broadcast %cst_19 : f32 to vector<8x128xf32>
    %25 = arith.mulf %24, %23 : vector<8x128xf32>
    %26 = math.tanh %25 : vector<8x128xf32>
    %cst_20 = arith.constant 5.000000e-01 : f32
    %27 = vector.broadcast %cst_20 : f32 to vector<8x128xf32>
    %28 = arith.mulf %27, %26 : vector<8x128xf32>
    %cst_21 = arith.constant 5.000000e-01 : f32
    %29 = vector.broadcast %cst_21 : f32 to vector<8x128xf32>
    %30 = arith.addf %28, %29 : vector<8x128xf32>
    %31 = vector.extract_strided_slice %14 {offsets = [0, 256], sizes = [8, 128], strides = [1, 1]} : vector<8x512xf32> to vector<8x128xf32>
    %32 = math.tanh %31 : vector<8x128xf32>
    %33 = vector.extract_strided_slice %14 {offsets = [0, 384], sizes = [8, 128], strides = [1, 1]} : vector<8x512xf32> to vector<8x128xf32>
    %cst_22 = arith.constant 5.000000e-01 : f32
    %34 = vector.broadcast %cst_22 : f32 to vector<8x128xf32>
    %35 = arith.mulf %34, %33 : vector<8x128xf32>
    %36 = math.tanh %35 : vector<8x128xf32>
    %cst_23 = arith.constant 5.000000e-01 : f32
    %37 = vector.broadcast %cst_23 : f32 to vector<8x128xf32>
    %38 = arith.mulf %37, %36 : vector<8x128xf32>
    %cst_24 = arith.constant 5.000000e-01 : f32
    %39 = vector.broadcast %cst_24 : f32 to vector<8x128xf32>
    %40 = arith.addf %38, %39 : vector<8x128xf32>
    %41 = arith.mulf %30, %11 : vector<8x128xf32>
    %42 = arith.mulf %22, %32 : vector<8x128xf32>
    %43 = arith.addf %41, %42 : vector<8x128xf32>
    %44 = math.tanh %43 : vector<8x128xf32>
    %45 = arith.mulf %40, %44 : vector<8x128xf32>
    %c0_25 = arith.constant 0 : index
    %c0_26 = arith.constant 0 : index
    %46 = vector.load %arg9[%c0_25, %c0_26] : memref<64x128xf32, #tpu.memory_space<vmem>>, vector<8x128xf32>
    tpu.vector_store %arg9[%c0_25, %c0_26], %45 {strides = array<i32>} : memref<64x128xf32, #tpu.memory_space<vmem>>, vector<8x128xf32>,
    %c8 = arith.constant 8 : index
    %c0_27 = arith.constant 0 : index
    %47 = vector.load %arg10[%c8, %c0_27] : memref<64x512xf32, #tpu.memory_space<vmem>>, vector<8x512xf32>
    %cst_28 = arith.constant dense<0.000000e+00> : vector<8x512xf32>
    %48 = tpu.matmul %45, %9, %cst_28 {dimension_numbers = #tpu.dot_dimension_numbers<[1], [0], [0], [1], [0, 0, 1, 1], [], []>} : vector<8x128xf32>, vector<128x512xf32>, vector<8x512xf32> -> vector<8x512xf32>
    %49 = arith.addf %47, %48 : vector<8x512xf32>
    %50 = vector.extract_strided_slice %49 {offsets = [0, 0], sizes = [8, 128], strides = [1, 1]} : vector<8x512xf32> to vector<8x128xf32>
    %cst_29 = arith.constant 5.000000e-01 : f32
    %51 = vector.broadcast %cst_29 : f32 to vector<8x128xf32>
    %52 = arith.mulf %51, %50 : vector<8x128xf32>
    %53 = math.tanh %52 : vector<8x128xf32>
    %cst_30 = arith.constant 5.000000e-01 : f32
    %54 = vector.broadcast %cst_30 : f32 to vector<8x128xf32>
    %55 = arith.mulf %54, %53 : vector<8x128xf32>
    %cst_31 = arith.constant 5.000000e-01 : f32
    %56 = vector.broadcast %cst_31 : f32 to vector<8x128xf32>
    %57 = arith.addf %55, %56 : vector<8x128xf32>
    %58 = vector.extract_strided_slice %49 {offsets = [0, 128], sizes = [8, 128], strides = [1, 1]} : vector<8x512xf32> to vector<8x128xf32>
    %cst_32 = arith.constant 5.000000e-01 : f32
    %59 = vector.broadcast %cst_32 : f32 to vector<8x128xf32>
    %60 = arith.mulf %59, %58 : vector<8x128xf32>
    %61 = math.tanh %60 : vector<8x128xf32>
    %cst_33 = arith.constant 5.000000e-01 : f32
    %62 = vector.broadcast %cst_33 : f32 to vector<8x128xf32>
    %63 = arith.mulf %62, %61 : vector<8x128xf32>
    %cst_34 = arith.constant 5.000000e-01 : f32
    %64 = vector.broadcast %cst_34 : f32 to vector<8x128xf32>
    %65 = arith.addf %63, %64 : vector<8x128xf32>
    %66 = vector.extract_strided_slice %49 {offsets = [0, 256], sizes = [8, 128], strides = [1, 1]} : vector<8x512xf32> to vector<8x128xf32>
    %67 = math.tanh %66 : vector<8x128xf32>
    %68 = vector.extract_strided_slice %49 {offsets = [0, 384], sizes = [8, 128], strides = [1, 1]} : vector<8x512xf32> to vector<8x128xf32>
    %cst_35 = arith.constant 5.000000e-01 : f32
    %69 = vector.broadcast %cst_35 : f32 to vector<8x128xf32>
    %70 = arith.mulf %69, %68 : vector<8x128xf32>
    %71 = math.tanh %70 : vector<8x128xf32>
    %cst_36 = arith.constant 5.000000e-01 : f32
    %72 = vector.broadcast %cst_36 : f32 to vector<8x128xf32>
    %73 = arith.mulf %72, %71 : vector<8x128xf32>
    %cst_37 = arith.constant 5.000000e-01 : f32
    %74 = vector.broadcast %cst_37 : f32 to vector<8x128xf32>
    %75 = arith.addf %73, %74 : vector<8x128xf32>
    %76 = arith.mulf %65, %43 : vector<8x128xf32>
    %77 = arith.mulf %57, %67 : vector<8x128xf32>
    %78 = arith.addf %76, %77 : vector<8x128xf32>
    %79 = math.tanh %78 : vector<8x128xf32>
    %80 = arith.mulf %75, %79 : vector<8x128xf32>
    %c8_38 = arith.constant 8 : index
    %c0_39 = arith.constant 0 : index
    %81 = vector.load %arg9[%c8_38, %c0_39] : memref<64x128xf32, #tpu.memory_space<vmem>>, vector<8x128xf32>
    tpu.vector_store %arg9[%c8_38, %c0_39], %80 {strides = array<i32>} : memref<64x128xf32, #tpu.memory_space<vmem>>, vector<8x128xf32>,
    %c16 = arith.constant 16 : index
    %c0_40 = arith.constant 0 : index
    %82 = vector.load %arg10[%c16, %c0_40] : memref<64x512xf32, #tpu.memory_space<vmem>>, vector<8x512xf32>
    %cst_41 = arith.constant dense<0.000000e+00> : vector<8x512xf32>
    %83 = tpu.matmul %80, %9, %cst_41 {dimension_numbers = #tpu.dot_dimension_numbers<[1], [0], [0], [1], [0, 0, 1, 1], [], []>} : vector<8x128xf32>, vector<128x512xf32>, vector<8x512xf32> -> vector<8x512xf32>
    %84 = arith.addf %82, %83 : vector<8x512xf32>
    %85 = vector.extract_strided_slice %84 {offsets = [0, 0], sizes = [8, 128], strides = [1, 1]} : vector<8x512xf32> to vector<8x128xf32>
    %cst_42 = arith.constant 5.000000e-01 : f32
    %86 = vector.broadcast %cst_42 : f32 to vector<8x128xf32>
    %87 = arith.mulf %86, %85 : vector<8x128xf32>
    %88 = math.tanh %87 : vector<8x128xf32>
    %cst_43 = arith.constant 5.000000e-01 : f32
    %89 = vector.broadcast %cst_43 : f32 to vector<8x128xf32>
    %90 = arith.mulf %89, %88 : vector<8x128xf32>
    %cst_44 = arith.constant 5.000000e-01 : f32
    %91 = vector.broadcast %cst_44 : f32 to vector<8x128xf32>
    %92 = arith.addf %90, %91 : vector<8x128xf32>
    %93 = vector.extract_strided_slice %84 {offsets = [0, 128], sizes = [8, 128], strides = [1, 1]} : vector<8x512xf32> to vector<8x128xf32>
    %cst_45 = arith.constant 5.000000e-01 : f32
    %94 = vector.broadcast %cst_45 : f32 to vector<8x128xf32>
    %95 = arith.mulf %94, %93 : vector<8x128xf32>
    %96 = math.tanh %95 : vector<8x128xf32>
    %cst_46 = arith.constant 5.000000e-01 : f32
    %97 = vector.broadcast %cst_46 : f32 to vector<8x128xf32>
    %98 = arith.mulf %97, %96 : vector<8x128xf32>
    %cst_47 = arith.constant 5.000000e-01 : f32
    %99 = vector.broadcast %cst_47 : f32 to vector<8x128xf32>
    %100 = arith.addf %98, %99 : vector<8x128xf32>
    %101 = vector.extract_strided_slice %84 {offsets = [0, 256], sizes = [8, 128], strides = [1, 1]} : vector<8x512xf32> to vector<8x128xf32>
    %102 = math.tanh %101 : vector<8x128xf32>
    %103 = vector.extract_strided_slice %84 {offsets = [0, 384], sizes = [8, 128], strides = [1, 1]} : vector<8x512xf32> to vector<8x128xf32>
    %cst_48 = arith.constant 5.000000e-01 : f32
    %104 = vector.broadcast %cst_48 : f32 to vector<8x128xf32>
    %105 = arith.mulf %104, %103 : vector<8x128xf32>
    %106 = math.tanh %105 : vector<8x128xf32>
    %cst_49 = arith.constant 5.000000e-01 : f32
    %107 = vector.broadcast %cst_49 : f32 to vector<8x128xf32>
    %108 = arith.mulf %107, %106 : vector<8x128xf32>
    %cst_50 = arith.constant 5.000000e-01 : f32
    %109 = vector.broadcast %cst_50 : f32 to vector<8x128xf32>
    %110 = arith.addf %108, %109 : vector<8x128xf32>
    %111 = arith.mulf %100, %78 : vector<8x128xf32>
    %112 = arith.mulf %92, %102 : vector<8x128xf32>
    %113 = arith.addf %111, %112 : vector<8x128xf32>
    %114 = math.tanh %113 : vector<8x128xf32>
    %115 = arith.mulf %110, %114 : vector<8x128xf32>
    %c16_51 = arith.constant 16 : index
    %c0_52 = arith.constant 0 : index
    %116 = vector.load %arg9[%c16_51, %c0_52] : memref<64x128xf32, #tpu.memory_space<vmem>>, vector<8x128xf32>
    tpu.vector_store %arg9[%c16_51, %c0_52], %115 {strides = array<i32>} : memref<64x128xf32, #tpu.memory_space<vmem>>, vector<8x128xf32>,
    %c24 = arith.constant 24 : index
    %c0_53 = arith.constant 0 : index
    %117 = vector.load %arg10[%c24, %c0_53] : memref<64x512xf32, #tpu.memory_space<vmem>>, vector<8x512xf32>
    %cst_54 = arith.constant dense<0.000000e+00> : vector<8x512xf32>
    %118 = tpu.matmul %115, %9, %cst_54 {dimension_numbers = #tpu.dot_dimension_numbers<[1], [0], [0], [1], [0, 0, 1, 1], [], []>} : vector<8x128xf32>, vector<128x512xf32>, vector<8x512xf32> -> vector<8x512xf32>
    %119 = arith.addf %117, %118 : vector<8x512xf32>
    %120 = vector.extract_strided_slice %119 {offsets = [0, 0], sizes = [8, 128], strides = [1, 1]} : vector<8x512xf32> to vector<8x128xf32>
    %cst_55 = arith.constant 5.000000e-01 : f32
    %121 = vector.broadcast %cst_55 : f32 to vector<8x128xf32>
    %122 = arith.mulf %121, %120 : vector<8x128xf32>
    %123 = math.tanh %122 : vector<8x128xf32>
    %cst_56 = arith.constant 5.000000e-01 : f32
    %124 = vector.broadcast %cst_56 : f32 to vector<8x128xf32>
    %125 = arith.mulf %124, %123 : vector<8x128xf32>
    %cst_57 = arith.constant 5.000000e-01 : f32
    %126 = vector.broadcast %cst_57 : f32 to vector<8x128xf32>
    %127 = arith.addf %125, %126 : vector<8x128xf32>
    %128 = vector.extract_strided_slice %119 {offsets = [0, 128], sizes = [8, 128], strides = [1, 1]} : vector<8x512xf32> to vector<8x128xf32>
    %cst_58 = arith.constant 5.000000e-01 : f32
    %129 = vector.broadcast %cst_58 : f32 to vector<8x128xf32>
    %130 = arith.mulf %129, %128 : vector<8x128xf32>
    %131 = math.tanh %130 : vector<8x128xf32>
    %cst_59 = arith.constant 5.000000e-01 : f32
    %132 = vector.broadcast %cst_59 : f32 to vector<8x128xf32>
    %133 = arith.mulf %132, %131 : vector<8x128xf32>
    %cst_60 = arith.constant 5.000000e-01 : f32
    %134 = vector.broadcast %cst_60 : f32 to vector<8x128xf32>
    %135 = arith.addf %133, %134 : vector<8x128xf32>
    %136 = vector.extract_strided_slice %119 {offsets = [0, 256], sizes = [8, 128], strides = [1, 1]} : vector<8x512xf32> to vector<8x128xf32>
    %137 = math.tanh %136 : vector<8x128xf32>
    %138 = vector.extract_strided_slice %119 {offsets = [0, 384], sizes = [8, 128], strides = [1, 1]} : vector<8x512xf32> to vector<8x128xf32>
    %cst_61 = arith.constant 5.000000e-01 : f32
    %139 = vector.broadcast %cst_61 : f32 to vector<8x128xf32>
    %140 = arith.mulf %139, %138 : vector<8x128xf32>
    %141 = math.tanh %140 : vector<8x128xf32>
    %cst_62 = arith.constant 5.000000e-01 : f32
    %142 = vector.broadcast %cst_62 : f32 to vector<8x128xf32>
    %143 = arith.mulf %142, %141 : vector<8x128xf32>
    %cst_63 = arith.constant 5.000000e-01 : f32
    %144 = vector.broadcast %cst_63 : f32 to vector<8x128xf32>
    %145 = arith.addf %143, %144 : vector<8x128xf32>
    %146 = arith.mulf %135, %113 : vector<8x128xf32>
    %147 = arith.mulf %127, %137 : vector<8x128xf32>
    %148 = arith.addf %146, %147 : vector<8x128xf32>
    %149 = math.tanh %148 : vector<8x128xf32>
    %150 = arith.mulf %145, %149 : vector<8x128xf32>
    %c24_64 = arith.constant 24 : index
    %c0_65 = arith.constant 0 : index
    %151 = vector.load %arg9[%c24_64, %c0_65] : memref<64x128xf32, #tpu.memory_space<vmem>>, vector<8x128xf32>
    tpu.vector_store %arg9[%c24_64, %c0_65], %150 {strides = array<i32>} : memref<64x128xf32, #tpu.memory_space<vmem>>, vector<8x128xf32>,
    %c32 = arith.constant 32 : index
    %c0_66 = arith.constant 0 : index
    %152 = vector.load %arg10[%c32, %c0_66] : memref<64x512xf32, #tpu.memory_space<vmem>>, vector<8x512xf32>
    %cst_67 = arith.constant dense<0.000000e+00> : vector<8x512xf32>
    %153 = tpu.matmul %150, %9, %cst_67 {dimension_numbers = #tpu.dot_dimension_numbers<[1], [0], [0], [1], [0, 0, 1, 1], [], []>} : vector<8x128xf32>, vector<128x512xf32>, vector<8x512xf32> -> vector<8x512xf32>
    %154 = arith.addf %152, %153 : vector<8x512xf32>
    %155 = vector.extract_strided_slice %154 {offsets = [0, 0], sizes = [8, 128], strides = [1, 1]} : vector<8x512xf32> to vector<8x128xf32>
    %cst_68 = arith.constant 5.000000e-01 : f32
    %156 = vector.broadcast %cst_68 : f32 to vector<8x128xf32>
    %157 = arith.mulf %156, %155 : vector<8x128xf32>
    %158 = math.tanh %157 : vector<8x128xf32>
    %cst_69 = arith.constant 5.000000e-01 : f32
    %159 = vector.broadcast %cst_69 : f32 to vector<8x128xf32>
    %160 = arith.mulf %159, %158 : vector<8x128xf32>
    %cst_70 = arith.constant 5.000000e-01 : f32
    %161 = vector.broadcast %cst_70 : f32 to vector<8x128xf32>
    %162 = arith.addf %160, %161 : vector<8x128xf32>
    %163 = vector.extract_strided_slice %154 {offsets = [0, 128], sizes = [8, 128], strides = [1, 1]} : vector<8x512xf32> to vector<8x128xf32>
    %cst_71 = arith.constant 5.000000e-01 : f32
    %164 = vector.broadcast %cst_71 : f32 to vector<8x128xf32>
    %165 = arith.mulf %164, %163 : vector<8x128xf32>
    %166 = math.tanh %165 : vector<8x128xf32>
    %cst_72 = arith.constant 5.000000e-01 : f32
    %167 = vector.broadcast %cst_72 : f32 to vector<8x128xf32>
    %168 = arith.mulf %167, %166 : vector<8x128xf32>
    %cst_73 = arith.constant 5.000000e-01 : f32
    %169 = vector.broadcast %cst_73 : f32 to vector<8x128xf32>
    %170 = arith.addf %168, %169 : vector<8x128xf32>
    %171 = vector.extract_strided_slice %154 {offsets = [0, 256], sizes = [8, 128], strides = [1, 1]} : vector<8x512xf32> to vector<8x128xf32>
    %172 = math.tanh %171 : vector<8x128xf32>
    %173 = vector.extract_strided_slice %154 {offsets = [0, 384], sizes = [8, 128], strides = [1, 1]} : vector<8x512xf32> to vector<8x128xf32>
    %cst_74 = arith.constant 5.000000e-01 : f32
    %174 = vector.broadcast %cst_74 : f32 to vector<8x128xf32>
    %175 = arith.mulf %174, %173 : vector<8x128xf32>
    %176 = math.tanh %175 : vector<8x128xf32>
    %cst_75 = arith.constant 5.000000e-01 : f32
    %177 = vector.broadcast %cst_75 : f32 to vector<8x128xf32>
    %178 = arith.mulf %177, %176 : vector<8x128xf32>
    %cst_76 = arith.constant 5.000000e-01 : f32
    %179 = vector.broadcast %cst_76 : f32 to vector<8x128xf32>
    %180 = arith.addf %178, %179 : vector<8x128xf32>
    %181 = arith.mulf %170, %148 : vector<8x128xf32>
    %182 = arith.mulf %162, %172 : vector<8x128xf32>
    %183 = arith.addf %181, %182 : vector<8x128xf32>
    %184 = math.tanh %183 : vector<8x128xf32>
    %185 = arith.mulf %180, %184 : vector<8x128xf32>
    %c32_77 = arith.constant 32 : index
    %c0_78 = arith.constant 0 : index
    %186 = vector.load %arg9[%c32_77, %c0_78] : memref<64x128xf32, #tpu.memory_space<vmem>>, vector<8x128xf32>
    tpu.vector_store %arg9[%c32_77, %c0_78], %185 {strides = array<i32>} : memref<64x128xf32, #tpu.memory_space<vmem>>, vector<8x128xf32>,
    %c40 = arith.constant 40 : index
    %c0_79 = arith.constant 0 : index
    %187 = vector.load %arg10[%c40, %c0_79] : memref<64x512xf32, #tpu.memory_space<vmem>>, vector<8x512xf32>
    %cst_80 = arith.constant dense<0.000000e+00> : vector<8x512xf32>
    %188 = tpu.matmul %185, %9, %cst_80 {dimension_numbers = #tpu.dot_dimension_numbers<[1], [0], [0], [1], [0, 0, 1, 1], [], []>} : vector<8x128xf32>, vector<128x512xf32>, vector<8x512xf32> -> vector<8x512xf32>
    %189 = arith.addf %187, %188 : vector<8x512xf32>
    %190 = vector.extract_strided_slice %189 {offsets = [0, 0], sizes = [8, 128], strides = [1, 1]} : vector<8x512xf32> to vector<8x128xf32>
    %cst_81 = arith.constant 5.000000e-01 : f32
    %191 = vector.broadcast %cst_81 : f32 to vector<8x128xf32>
    %192 = arith.mulf %191, %190 : vector<8x128xf32>
    %193 = math.tanh %192 : vector<8x128xf32>
    %cst_82 = arith.constant 5.000000e-01 : f32
    %194 = vector.broadcast %cst_82 : f32 to vector<8x128xf32>
    %195 = arith.mulf %194, %193 : vector<8x128xf32>
    %cst_83 = arith.constant 5.000000e-01 : f32
    %196 = vector.broadcast %cst_83 : f32 to vector<8x128xf32>
    %197 = arith.addf %195, %196 : vector<8x128xf32>
    %198 = vector.extract_strided_slice %189 {offsets = [0, 128], sizes = [8, 128], strides = [1, 1]} : vector<8x512xf32> to vector<8x128xf32>
    %cst_84 = arith.constant 5.000000e-01 : f32
    %199 = vector.broadcast %cst_84 : f32 to vector<8x128xf32>
    %200 = arith.mulf %199, %198 : vector<8x128xf32>
    %201 = math.tanh %200 : vector<8x128xf32>
    %cst_85 = arith.constant 5.000000e-01 : f32
    %202 = vector.broadcast %cst_85 : f32 to vector<8x128xf32>
    %203 = arith.mulf %202, %201 : vector<8x128xf32>
    %cst_86 = arith.constant 5.000000e-01 : f32
    %204 = vector.broadcast %cst_86 : f32 to vector<8x128xf32>
    %205 = arith.addf %203, %204 : vector<8x128xf32>
    %206 = vector.extract_strided_slice %189 {offsets = [0, 256], sizes = [8, 128], strides = [1, 1]} : vector<8x512xf32> to vector<8x128xf32>
    %207 = math.tanh %206 : vector<8x128xf32>
    %208 = vector.extract_strided_slice %189 {offsets = [0, 384], sizes = [8, 128], strides = [1, 1]} : vector<8x512xf32> to vector<8x128xf32>
    %cst_87 = arith.constant 5.000000e-01 : f32
    %209 = vector.broadcast %cst_87 : f32 to vector<8x128xf32>
    %210 = arith.mulf %209, %208 : vector<8x128xf32>
    %211 = math.tanh %210 : vector<8x128xf32>
    %cst_88 = arith.constant 5.000000e-01 : f32
    %212 = vector.broadcast %cst_88 : f32 to vector<8x128xf32>
    %213 = arith.mulf %212, %211 : vector<8x128xf32>
    %cst_89 = arith.constant 5.000000e-01 : f32
    %214 = vector.broadcast %cst_89 : f32 to vector<8x128xf32>
    %215 = arith.addf %213, %214 : vector<8x128xf32>
    %216 = arith.mulf %205, %183 : vector<8x128xf32>
    %217 = arith.mulf %197, %207 : vector<8x128xf32>
    %218 = arith.addf %216, %217 : vector<8x128xf32>
    %219 = math.tanh %218 : vector<8x128xf32>
    %220 = arith.mulf %215, %219 : vector<8x128xf32>
    %c40_90 = arith.constant 40 : index
    %c0_91 = arith.constant 0 : index
    %221 = vector.load %arg9[%c40_90, %c0_91] : memref<64x128xf32, #tpu.memory_space<vmem>>, vector<8x128xf32>
    tpu.vector_store %arg9[%c40_90, %c0_91], %220 {strides = array<i32>} : memref<64x128xf32, #tpu.memory_space<vmem>>, vector<8x128xf32>,
    %c48 = arith.constant 48 : index
    %c0_92 = arith.constant 0 : index
    %222 = vector.load %arg10[%c48, %c0_92] : memref<64x512xf32, #tpu.memory_space<vmem>>, vector<8x512xf32>
    %cst_93 = arith.constant dense<0.000000e+00> : vector<8x512xf32>
    %223 = tpu.matmul %220, %9, %cst_93 {dimension_numbers = #tpu.dot_dimension_numbers<[1], [0], [0], [1], [0, 0, 1, 1], [], []>} : vector<8x128xf32>, vector<128x512xf32>, vector<8x512xf32> -> vector<8x512xf32>
    %224 = arith.addf %222, %223 : vector<8x512xf32>
    %225 = vector.extract_strided_slice %224 {offsets = [0, 0], sizes = [8, 128], strides = [1, 1]} : vector<8x512xf32> to vector<8x128xf32>
    %cst_94 = arith.constant 5.000000e-01 : f32
    %226 = vector.broadcast %cst_94 : f32 to vector<8x128xf32>
    %227 = arith.mulf %226, %225 : vector<8x128xf32>
    %228 = math.tanh %227 : vector<8x128xf32>
    %cst_95 = arith.constant 5.000000e-01 : f32
    %229 = vector.broadcast %cst_95 : f32 to vector<8x128xf32>
    %230 = arith.mulf %229, %228 : vector<8x128xf32>
    %cst_96 = arith.constant 5.000000e-01 : f32
    %231 = vector.broadcast %cst_96 : f32 to vector<8x128xf32>
    %232 = arith.addf %230, %231 : vector<8x128xf32>
    %233 = vector.extract_strided_slice %224 {offsets = [0, 128], sizes = [8, 128], strides = [1, 1]} : vector<8x512xf32> to vector<8x128xf32>
    %cst_97 = arith.constant 5.000000e-01 : f32
    %234 = vector.broadcast %cst_97 : f32 to vector<8x128xf32>
    %235 = arith.mulf %234, %233 : vector<8x128xf32>
    %236 = math.tanh %235 : vector<8x128xf32>
    %cst_98 = arith.constant 5.000000e-01 : f32
    %237 = vector.broadcast %cst_98 : f32 to vector<8x128xf32>
    %238 = arith.mulf %237, %236 : vector<8x128xf32>
    %cst_99 = arith.constant 5.000000e-01 : f32
    %239 = vector.broadcast %cst_99 : f32 to vector<8x128xf32>
    %240 = arith.addf %238, %239 : vector<8x128xf32>
    %241 = vector.extract_strided_slice %224 {offsets = [0, 256], sizes = [8, 128], strides = [1, 1]} : vector<8x512xf32> to vector<8x128xf32>
    %242 = math.tanh %241 : vector<8x128xf32>
    %243 = vector.extract_strided_slice %224 {offsets = [0, 384], sizes = [8, 128], strides = [1, 1]} : vector<8x512xf32> to vector<8x128xf32>
    %cst_100 = arith.constant 5.000000e-01 : f32
    %244 = vector.broadcast %cst_100 : f32 to vector<8x128xf32>
    %245 = arith.mulf %244, %243 : vector<8x128xf32>
    %246 = math.tanh %245 : vector<8x128xf32>
    %cst_101 = arith.constant 5.000000e-01 : f32
    %247 = vector.broadcast %cst_101 : f32 to vector<8x128xf32>
    %248 = arith.mulf %247, %246 : vector<8x128xf32>
    %cst_102 = arith.constant 5.000000e-01 : f32
    %249 = vector.broadcast %cst_102 : f32 to vector<8x128xf32>
    %250 = arith.addf %248, %249 : vector<8x128xf32>
    %251 = arith.mulf %240, %218 : vector<8x128xf32>
    %252 = arith.mulf %232, %242 : vector<8x128xf32>
    %253 = arith.addf %251, %252 : vector<8x128xf32>
    %254 = math.tanh %253 : vector<8x128xf32>
    %255 = arith.mulf %250, %254 : vector<8x128xf32>
    %c48_103 = arith.constant 48 : index
    %c0_104 = arith.constant 0 : index
    %256 = vector.load %arg9[%c48_103, %c0_104] : memref<64x128xf32, #tpu.memory_space<vmem>>, vector<8x128xf32>
    tpu.vector_store %arg9[%c48_103, %c0_104], %255 {strides = array<i32>} : memref<64x128xf32, #tpu.memory_space<vmem>>, vector<8x128xf32>,
    %c56 = arith.constant 56 : index
    %c0_105 = arith.constant 0 : index
    %257 = vector.load %arg10[%c56, %c0_105] : memref<64x512xf32, #tpu.memory_space<vmem>>, vector<8x512xf32>
    %cst_106 = arith.constant dense<0.000000e+00> : vector<8x512xf32>
    %258 = tpu.matmul %255, %9, %cst_106 {dimension_numbers = #tpu.dot_dimension_numbers<[1], [0], [0], [1], [0, 0, 1, 1], [], []>} : vector<8x128xf32>, vector<128x512xf32>, vector<8x512xf32> -> vector<8x512xf32>
    %259 = arith.addf %257, %258 : vector<8x512xf32>
    %260 = vector.extract_strided_slice %259 {offsets = [0, 0], sizes = [8, 128], strides = [1, 1]} : vector<8x512xf32> to vector<8x128xf32>
    %cst_107 = arith.constant 5.000000e-01 : f32
    %261 = vector.broadcast %cst_107 : f32 to vector<8x128xf32>
    %262 = arith.mulf %261, %260 : vector<8x128xf32>
    %263 = math.tanh %262 : vector<8x128xf32>
    %cst_108 = arith.constant 5.000000e-01 : f32
    %264 = vector.broadcast %cst_108 : f32 to vector<8x128xf32>
    %265 = arith.mulf %264, %263 : vector<8x128xf32>
    %cst_109 = arith.constant 5.000000e-01 : f32
    %266 = vector.broadcast %cst_109 : f32 to vector<8x128xf32>
    %267 = arith.addf %265, %266 : vector<8x128xf32>
    %268 = vector.extract_strided_slice %259 {offsets = [0, 128], sizes = [8, 128], strides = [1, 1]} : vector<8x512xf32> to vector<8x128xf32>
    %cst_110 = arith.constant 5.000000e-01 : f32
    %269 = vector.broadcast %cst_110 : f32 to vector<8x128xf32>
    %270 = arith.mulf %269, %268 : vector<8x128xf32>
    %271 = math.tanh %270 : vector<8x128xf32>
    %cst_111 = arith.constant 5.000000e-01 : f32
    %272 = vector.broadcast %cst_111 : f32 to vector<8x128xf32>
    %273 = arith.mulf %272, %271 : vector<8x128xf32>
    %cst_112 = arith.constant 5.000000e-01 : f32
    %274 = vector.broadcast %cst_112 : f32 to vector<8x128xf32>
    %275 = arith.addf %273, %274 : vector<8x128xf32>
    %276 = vector.extract_strided_slice %259 {offsets = [0, 256], sizes = [8, 128], strides = [1, 1]} : vector<8x512xf32> to vector<8x128xf32>
    %277 = math.tanh %276 : vector<8x128xf32>
    %278 = vector.extract_strided_slice %259 {offsets = [0, 384], sizes = [8, 128], strides = [1, 1]} : vector<8x512xf32> to vector<8x128xf32>
    %cst_113 = arith.constant 5.000000e-01 : f32
    %279 = vector.broadcast %cst_113 : f32 to vector<8x128xf32>
    %280 = arith.mulf %279, %278 : vector<8x128xf32>
    %281 = math.tanh %280 : vector<8x128xf32>
    %cst_114 = arith.constant 5.000000e-01 : f32
    %282 = vector.broadcast %cst_114 : f32 to vector<8x128xf32>
    %283 = arith.mulf %282, %281 : vector<8x128xf32>
    %cst_115 = arith.constant 5.000000e-01 : f32
    %284 = vector.broadcast %cst_115 : f32 to vector<8x128xf32>
    %285 = arith.addf %283, %284 : vector<8x128xf32>
    %286 = arith.mulf %275, %253 : vector<8x128xf32>
    %287 = arith.mulf %267, %277 : vector<8x128xf32>
    %288 = arith.addf %286, %287 : vector<8x128xf32>
    %289 = math.tanh %288 : vector<8x128xf32>
    %290 = arith.mulf %285, %289 : vector<8x128xf32>
    %c56_116 = arith.constant 56 : index
    %c0_117 = arith.constant 0 : index
    %291 = vector.load %arg9[%c56_116, %c0_117] : memref<64x128xf32, #tpu.memory_space<vmem>>, vector<8x128xf32>
    tpu.vector_store %arg9[%c56_116, %c0_117], %290 {strides = array<i32>} : memref<64x128xf32, #tpu.memory_space<vmem>>, vector<8x128xf32>,
    %c0_118 = arith.constant 0 : index
    %c0_119 = arith.constant 0 : index
    %c0_120 = arith.constant 0 : index
    %292 = vector.load %arg7[%c0_118, %c0_119, %c0_120] : memref<2x8x128xf32, #tpu.memory_space<vmem>>, vector<1x8x128xf32>
    %293 = vector.shape_cast %292 : vector<1x8x128xf32> to vector<8x128xf32>
    %294 = vector.shape_cast %290 : vector<8x128xf32> to vector<1x8x128xf32>
    tpu.vector_store %arg7[%c0_118, %c0_119, %c0_120], %294 {strides = array<i32>} : memref<2x8x128xf32, #tpu.memory_space<vmem>>, vector<1x8x128xf32>,
    %c0_121 = arith.constant 0 : index
    %c0_122 = arith.constant 0 : index
    %c0_123 = arith.constant 0 : index
    %295 = vector.load %arg8[%c0_121, %c0_122, %c0_123] : memref<2x8x128xf32, #tpu.memory_space<vmem>>, vector<1x8x128xf32>
    %296 = vector.shape_cast %295 : vector<1x8x128xf32> to vector<8x128xf32>
    %297 = vector.shape_cast %288 : vector<8x128xf32> to vector<1x8x128xf32>
    tpu.vector_store %arg8[%c0_121, %c0_122, %c0_123], %297 {strides = array<i32>} : memref<2x8x128xf32, #tpu.memory_space<vmem>>, vector<1x8x128xf32>,
    %c0_124 = arith.constant 0 : index
    %c0_125 = arith.constant 0 : index
    %298 = vector.load %arg9[%c0_124, %c0_125] : memref<64x128xf32, #tpu.memory_space<vmem>>, vector<64x128xf32>
    %c0_126 = arith.constant 0 : index
    %c0_127 = arith.constant 0 : index
    %c0_128 = arith.constant 0 : index
    %299 = vector.load %arg3[%c0_126, %c0_127, %c0_128] : memref<1x128x512xf32, #tpu.memory_space<vmem>>, vector<1x128x512xf32>
    %300 = vector.shape_cast %299 : vector<1x128x512xf32> to vector<128x512xf32>
    %cst_129 = arith.constant dense<0.000000e+00> : vector<64x512xf32>
    %301 = tpu.matmul %298, %300, %cst_129 {dimension_numbers = #tpu.dot_dimension_numbers<[1], [0], [0], [1], [0, 0, 1, 1], [], []>} : vector<64x128xf32>, vector<128x512xf32>, vector<64x512xf32> -> vector<64x512xf32>
    %c1 = arith.constant 1 : index
    %c0_130 = arith.constant 0 : index
    %c0_131 = arith.constant 0 : index
    %302 = vector.load %arg5[%c1, %c0_130, %c0_131] : memref<2x1x512xf32, #tpu.memory_space<vmem>>, vector<1x1x512xf32>
    %303 = vector.shape_cast %302 : vector<1x1x512xf32> to vector<1x512xf32>
    %304 = vector.broadcast %303 : vector<1x512xf32> to vector<64x512xf32>
    %305 = arith.addf %301, %304 : vector<64x512xf32>
    %c0_132 = arith.constant 0 : index
    %c0_133 = arith.constant 0 : index
    %306 = vector.load %arg10[%c0_132, %c0_133] : memref<64x512xf32, #tpu.memory_space<vmem>>, vector<64x512xf32>
    tpu.vector_store %arg10[%c0_132, %c0_133], %305 {strides = array<i32>} : memref<64x512xf32, #tpu.memory_space<vmem>>, vector<64x512xf32>,
    %c1_134 = arith.constant 1 : index
    %c0_135 = arith.constant 0 : index
    %c0_136 = arith.constant 0 : index
    %307 = vector.load %arg4[%c1_134, %c0_135, %c0_136] : memref<2x128x512xf32, #tpu.memory_space<vmem>>, vector<1x128x512xf32>
    %308 = vector.shape_cast %307 : vector<1x128x512xf32> to vector<128x512xf32>
    %cst_137 = arith.constant 0.000000e+00 : f32
    %309 = vector.broadcast %cst_137 : f32 to vector<8x128xf32>
    %cst_138 = arith.constant 0.000000e+00 : f32
    %310 = vector.broadcast %cst_138 : f32 to vector<8x128xf32>
    %c0_139 = arith.constant 0 : index
    %c0_140 = arith.constant 0 : index
    %311 = vector.load %arg10[%c0_139, %c0_140] : memref<64x512xf32, #tpu.memory_space<vmem>>, vector<8x512xf32>
    %cst_141 = arith.constant dense<0.000000e+00> : vector<8x512xf32>
    %312 = tpu.matmul %309, %308, %cst_141 {dimension_numbers = #tpu.dot_dimension_numbers<[1], [0], [0], [1], [0, 0, 1, 1], [], []>} : vector<8x128xf32>, vector<128x512xf32>, vector<8x512xf32> -> vector<8x512xf32>
    %313 = arith.addf %311, %312 : vector<8x512xf32>
    %314 = vector.extract_strided_slice %313 {offsets = [0, 0], sizes = [8, 128], strides = [1, 1]} : vector<8x512xf32> to vector<8x128xf32>
    %cst_142 = arith.constant 5.000000e-01 : f32
    %315 = vector.broadcast %cst_142 : f32 to vector<8x128xf32>
    %316 = arith.mulf %315, %314 : vector<8x128xf32>
    %317 = math.tanh %316 : vector<8x128xf32>
    %cst_143 = arith.constant 5.000000e-01 : f32
    %318 = vector.broadcast %cst_143 : f32 to vector<8x128xf32>
    %319 = arith.mulf %318, %317 : vector<8x128xf32>
    %cst_144 = arith.constant 5.000000e-01 : f32
    %320 = vector.broadcast %cst_144 : f32 to vector<8x128xf32>
    %321 = arith.addf %319, %320 : vector<8x128xf32>
    %322 = vector.extract_strided_slice %313 {offsets = [0, 128], sizes = [8, 128], strides = [1, 1]} : vector<8x512xf32> to vector<8x128xf32>
    %cst_145 = arith.constant 5.000000e-01 : f32
    %323 = vector.broadcast %cst_145 : f32 to vector<8x128xf32>
    %324 = arith.mulf %323, %322 : vector<8x128xf32>
    %325 = math.tanh %324 : vector<8x128xf32>
    %cst_146 = arith.constant 5.000000e-01 : f32
    %326 = vector.broadcast %cst_146 : f32 to vector<8x128xf32>
    %327 = arith.mulf %326, %325 : vector<8x128xf32>
    %cst_147 = arith.constant 5.000000e-01 : f32
    %328 = vector.broadcast %cst_147 : f32 to vector<8x128xf32>
    %329 = arith.addf %327, %328 : vector<8x128xf32>
    %330 = vector.extract_strided_slice %313 {offsets = [0, 256], sizes = [8, 128], strides = [1, 1]} : vector<8x512xf32> to vector<8x128xf32>
    %331 = math.tanh %330 : vector<8x128xf32>
    %332 = vector.extract_strided_slice %313 {offsets = [0, 384], sizes = [8, 128], strides = [1, 1]} : vector<8x512xf32> to vector<8x128xf32>
    %cst_148 = arith.constant 5.000000e-01 : f32
    %333 = vector.broadcast %cst_148 : f32 to vector<8x128xf32>
    %334 = arith.mulf %333, %332 : vector<8x128xf32>
    %335 = math.tanh %334 : vector<8x128xf32>
    %cst_149 = arith.constant 5.000000e-01 : f32
    %336 = vector.broadcast %cst_149 : f32 to vector<8x128xf32>
    %337 = arith.mulf %336, %335 : vector<8x128xf32>
    %cst_150 = arith.constant 5.000000e-01 : f32
    %338 = vector.broadcast %cst_150 : f32 to vector<8x128xf32>
    %339 = arith.addf %337, %338 : vector<8x128xf32>
    %340 = arith.mulf %329, %310 : vector<8x128xf32>
    %341 = arith.mulf %321, %331 : vector<8x128xf32>
    %342 = arith.addf %340, %341 : vector<8x128xf32>
    %343 = math.tanh %342 : vector<8x128xf32>
    %344 = arith.mulf %339, %343 : vector<8x128xf32>
    %c0_151 = arith.constant 0 : index
    %c0_152 = arith.constant 0 : index
    %345 = vector.load %arg6[%c0_151, %c0_152] : memref<64x128xf32, #tpu.memory_space<vmem>>, vector<8x128xf32>
    tpu.vector_store %arg6[%c0_151, %c0_152], %344 {strides = array<i32>} : memref<64x128xf32, #tpu.memory_space<vmem>>, vector<8x128xf32>,
    %c8_153 = arith.constant 8 : index
    %c0_154 = arith.constant 0 : index
    %346 = vector.load %arg10[%c8_153, %c0_154] : memref<64x512xf32, #tpu.memory_space<vmem>>, vector<8x512xf32>
    %cst_155 = arith.constant dense<0.000000e+00> : vector<8x512xf32>
    %347 = tpu.matmul %344, %308, %cst_155 {dimension_numbers = #tpu.dot_dimension_numbers<[1], [0], [0], [1], [0, 0, 1, 1], [], []>} : vector<8x128xf32>, vector<128x512xf32>, vector<8x512xf32> -> vector<8x512xf32>
    %348 = arith.addf %346, %347 : vector<8x512xf32>
    %349 = vector.extract_strided_slice %348 {offsets = [0, 0], sizes = [8, 128], strides = [1, 1]} : vector<8x512xf32> to vector<8x128xf32>
    %cst_156 = arith.constant 5.000000e-01 : f32
    %350 = vector.broadcast %cst_156 : f32 to vector<8x128xf32>
    %351 = arith.mulf %350, %349 : vector<8x128xf32>
    %352 = math.tanh %351 : vector<8x128xf32>
    %cst_157 = arith.constant 5.000000e-01 : f32
    %353 = vector.broadcast %cst_157 : f32 to vector<8x128xf32>
    %354 = arith.mulf %353, %352 : vector<8x128xf32>
    %cst_158 = arith.constant 5.000000e-01 : f32
    %355 = vector.broadcast %cst_158 : f32 to vector<8x128xf32>
    %356 = arith.addf %354, %355 : vector<8x128xf32>
    %357 = vector.extract_strided_slice %348 {offsets = [0, 128], sizes = [8, 128], strides = [1, 1]} : vector<8x512xf32> to vector<8x128xf32>
    %cst_159 = arith.constant 5.000000e-01 : f32
    %358 = vector.broadcast %cst_159 : f32 to vector<8x128xf32>
    %359 = arith.mulf %358, %357 : vector<8x128xf32>
    %360 = math.tanh %359 : vector<8x128xf32>
    %cst_160 = arith.constant 5.000000e-01 : f32
    %361 = vector.broadcast %cst_160 : f32 to vector<8x128xf32>
    %362 = arith.mulf %361, %360 : vector<8x128xf32>
    %cst_161 = arith.constant 5.000000e-01 : f32
    %363 = vector.broadcast %cst_161 : f32 to vector<8x128xf32>
    %364 = arith.addf %362, %363 : vector<8x128xf32>
    %365 = vector.extract_strided_slice %348 {offsets = [0, 256], sizes = [8, 128], strides = [1, 1]} : vector<8x512xf32> to vector<8x128xf32>
    %366 = math.tanh %365 : vector<8x128xf32>
    %367 = vector.extract_strided_slice %348 {offsets = [0, 384], sizes = [8, 128], strides = [1, 1]} : vector<8x512xf32> to vector<8x128xf32>
    %cst_162 = arith.constant 5.000000e-01 : f32
    %368 = vector.broadcast %cst_162 : f32 to vector<8x128xf32>
    %369 = arith.mulf %368, %367 : vector<8x128xf32>
    %370 = math.tanh %369 : vector<8x128xf32>
    %cst_163 = arith.constant 5.000000e-01 : f32
    %371 = vector.broadcast %cst_163 : f32 to vector<8x128xf32>
    %372 = arith.mulf %371, %370 : vector<8x128xf32>
    %cst_164 = arith.constant 5.000000e-01 : f32
    %373 = vector.broadcast %cst_164 : f32 to vector<8x128xf32>
    %374 = arith.addf %372, %373 : vector<8x128xf32>
    %375 = arith.mulf %364, %342 : vector<8x128xf32>
    %376 = arith.mulf %356, %366 : vector<8x128xf32>
    %377 = arith.addf %375, %376 : vector<8x128xf32>
    %378 = math.tanh %377 : vector<8x128xf32>
    %379 = arith.mulf %374, %378 : vector<8x128xf32>
    %c8_165 = arith.constant 8 : index
    %c0_166 = arith.constant 0 : index
    %380 = vector.load %arg6[%c8_165, %c0_166] : memref<64x128xf32, #tpu.memory_space<vmem>>, vector<8x128xf32>
    tpu.vector_store %arg6[%c8_165, %c0_166], %379 {strides = array<i32>} : memref<64x128xf32, #tpu.memory_space<vmem>>, vector<8x128xf32>,
    %c16_167 = arith.constant 16 : index
    %c0_168 = arith.constant 0 : index
    %381 = vector.load %arg10[%c16_167, %c0_168] : memref<64x512xf32, #tpu.memory_space<vmem>>, vector<8x512xf32>
    %cst_169 = arith.constant dense<0.000000e+00> : vector<8x512xf32>
    %382 = tpu.matmul %379, %308, %cst_169 {dimension_numbers = #tpu.dot_dimension_numbers<[1], [0], [0], [1], [0, 0, 1, 1], [], []>} : vector<8x128xf32>, vector<128x512xf32>, vector<8x512xf32> -> vector<8x512xf32>
    %383 = arith.addf %381, %382 : vector<8x512xf32>
    %384 = vector.extract_strided_slice %383 {offsets = [0, 0], sizes = [8, 128], strides = [1, 1]} : vector<8x512xf32> to vector<8x128xf32>
    %cst_170 = arith.constant 5.000000e-01 : f32
    %385 = vector.broadcast %cst_170 : f32 to vector<8x128xf32>
    %386 = arith.mulf %385, %384 : vector<8x128xf32>
    %387 = math.tanh %386 : vector<8x128xf32>
    %cst_171 = arith.constant 5.000000e-01 : f32
    %388 = vector.broadcast %cst_171 : f32 to vector<8x128xf32>
    %389 = arith.mulf %388, %387 : vector<8x128xf32>
    %cst_172 = arith.constant 5.000000e-01 : f32
    %390 = vector.broadcast %cst_172 : f32 to vector<8x128xf32>
    %391 = arith.addf %389, %390 : vector<8x128xf32>
    %392 = vector.extract_strided_slice %383 {offsets = [0, 128], sizes = [8, 128], strides = [1, 1]} : vector<8x512xf32> to vector<8x128xf32>
    %cst_173 = arith.constant 5.000000e-01 : f32
    %393 = vector.broadcast %cst_173 : f32 to vector<8x128xf32>
    %394 = arith.mulf %393, %392 : vector<8x128xf32>
    %395 = math.tanh %394 : vector<8x128xf32>
    %cst_174 = arith.constant 5.000000e-01 : f32
    %396 = vector.broadcast %cst_174 : f32 to vector<8x128xf32>
    %397 = arith.mulf %396, %395 : vector<8x128xf32>
    %cst_175 = arith.constant 5.000000e-01 : f32
    %398 = vector.broadcast %cst_175 : f32 to vector<8x128xf32>
    %399 = arith.addf %397, %398 : vector<8x128xf32>
    %400 = vector.extract_strided_slice %383 {offsets = [0, 256], sizes = [8, 128], strides = [1, 1]} : vector<8x512xf32> to vector<8x128xf32>
    %401 = math.tanh %400 : vector<8x128xf32>
    %402 = vector.extract_strided_slice %383 {offsets = [0, 384], sizes = [8, 128], strides = [1, 1]} : vector<8x512xf32> to vector<8x128xf32>
    %cst_176 = arith.constant 5.000000e-01 : f32
    %403 = vector.broadcast %cst_176 : f32 to vector<8x128xf32>
    %404 = arith.mulf %403, %402 : vector<8x128xf32>
    %405 = math.tanh %404 : vector<8x128xf32>
    %cst_177 = arith.constant 5.000000e-01 : f32
    %406 = vector.broadcast %cst_177 : f32 to vector<8x128xf32>
    %407 = arith.mulf %406, %405 : vector<8x128xf32>
    %cst_178 = arith.constant 5.000000e-01 : f32
    %408 = vector.broadcast %cst_178 : f32 to vector<8x128xf32>
    %409 = arith.addf %407, %408 : vector<8x128xf32>
    %410 = arith.mulf %399, %377 : vector<8x128xf32>
    %411 = arith.mulf %391, %401 : vector<8x128xf32>
    %412 = arith.addf %410, %411 : vector<8x128xf32>
    %413 = math.tanh %412 : vector<8x128xf32>
    %414 = arith.mulf %409, %413 : vector<8x128xf32>
    %c16_179 = arith.constant 16 : index
    %c0_180 = arith.constant 0 : index
    %415 = vector.load %arg6[%c16_179, %c0_180] : memref<64x128xf32, #tpu.memory_space<vmem>>, vector<8x128xf32>
    tpu.vector_store %arg6[%c16_179, %c0_180], %414 {strides = array<i32>} : memref<64x128xf32, #tpu.memory_space<vmem>>, vector<8x128xf32>,
    %c24_181 = arith.constant 24 : index
    %c0_182 = arith.constant 0 : index
    %416 = vector.load %arg10[%c24_181, %c0_182] : memref<64x512xf32, #tpu.memory_space<vmem>>, vector<8x512xf32>
    %cst_183 = arith.constant dense<0.000000e+00> : vector<8x512xf32>
    %417 = tpu.matmul %414, %308, %cst_183 {dimension_numbers = #tpu.dot_dimension_numbers<[1], [0], [0], [1], [0, 0, 1, 1], [], []>} : vector<8x128xf32>, vector<128x512xf32>, vector<8x512xf32> -> vector<8x512xf32>
    %418 = arith.addf %416, %417 : vector<8x512xf32>
    %419 = vector.extract_strided_slice %418 {offsets = [0, 0], sizes = [8, 128], strides = [1, 1]} : vector<8x512xf32> to vector<8x128xf32>
    %cst_184 = arith.constant 5.000000e-01 : f32
    %420 = vector.broadcast %cst_184 : f32 to vector<8x128xf32>
    %421 = arith.mulf %420, %419 : vector<8x128xf32>
    %422 = math.tanh %421 : vector<8x128xf32>
    %cst_185 = arith.constant 5.000000e-01 : f32
    %423 = vector.broadcast %cst_185 : f32 to vector<8x128xf32>
    %424 = arith.mulf %423, %422 : vector<8x128xf32>
    %cst_186 = arith.constant 5.000000e-01 : f32
    %425 = vector.broadcast %cst_186 : f32 to vector<8x128xf32>
    %426 = arith.addf %424, %425 : vector<8x128xf32>
    %427 = vector.extract_strided_slice %418 {offsets = [0, 128], sizes = [8, 128], strides = [1, 1]} : vector<8x512xf32> to vector<8x128xf32>
    %cst_187 = arith.constant 5.000000e-01 : f32
    %428 = vector.broadcast %cst_187 : f32 to vector<8x128xf32>
    %429 = arith.mulf %428, %427 : vector<8x128xf32>
    %430 = math.tanh %429 : vector<8x128xf32>
    %cst_188 = arith.constant 5.000000e-01 : f32
    %431 = vector.broadcast %cst_188 : f32 to vector<8x128xf32>
    %432 = arith.mulf %431, %430 : vector<8x128xf32>
    %cst_189 = arith.constant 5.000000e-01 : f32
    %433 = vector.broadcast %cst_189 : f32 to vector<8x128xf32>
    %434 = arith.addf %432, %433 : vector<8x128xf32>
    %435 = vector.extract_strided_slice %418 {offsets = [0, 256], sizes = [8, 128], strides = [1, 1]} : vector<8x512xf32> to vector<8x128xf32>
    %436 = math.tanh %435 : vector<8x128xf32>
    %437 = vector.extract_strided_slice %418 {offsets = [0, 384], sizes = [8, 128], strides = [1, 1]} : vector<8x512xf32> to vector<8x128xf32>
    %cst_190 = arith.constant 5.000000e-01 : f32
    %438 = vector.broadcast %cst_190 : f32 to vector<8x128xf32>
    %439 = arith.mulf %438, %437 : vector<8x128xf32>
    %440 = math.tanh %439 : vector<8x128xf32>
    %cst_191 = arith.constant 5.000000e-01 : f32
    %441 = vector.broadcast %cst_191 : f32 to vector<8x128xf32>
    %442 = arith.mulf %441, %440 : vector<8x128xf32>
    %cst_192 = arith.constant 5.000000e-01 : f32
    %443 = vector.broadcast %cst_192 : f32 to vector<8x128xf32>
    %444 = arith.addf %442, %443 : vector<8x128xf32>
    %445 = arith.mulf %434, %412 : vector<8x128xf32>
    %446 = arith.mulf %426, %436 : vector<8x128xf32>
    %447 = arith.addf %445, %446 : vector<8x128xf32>
    %448 = math.tanh %447 : vector<8x128xf32>
    %449 = arith.mulf %444, %448 : vector<8x128xf32>
    %c24_193 = arith.constant 24 : index
    %c0_194 = arith.constant 0 : index
    %450 = vector.load %arg6[%c24_193, %c0_194] : memref<64x128xf32, #tpu.memory_space<vmem>>, vector<8x128xf32>
    tpu.vector_store %arg6[%c24_193, %c0_194], %449 {strides = array<i32>} : memref<64x128xf32, #tpu.memory_space<vmem>>, vector<8x128xf32>,
    %c32_195 = arith.constant 32 : index
    %c0_196 = arith.constant 0 : index
    %451 = vector.load %arg10[%c32_195, %c0_196] : memref<64x512xf32, #tpu.memory_space<vmem>>, vector<8x512xf32>
    %cst_197 = arith.constant dense<0.000000e+00> : vector<8x512xf32>
    %452 = tpu.matmul %449, %308, %cst_197 {dimension_numbers = #tpu.dot_dimension_numbers<[1], [0], [0], [1], [0, 0, 1, 1], [], []>} : vector<8x128xf32>, vector<128x512xf32>, vector<8x512xf32> -> vector<8x512xf32>
    %453 = arith.addf %451, %452 : vector<8x512xf32>
    %454 = vector.extract_strided_slice %453 {offsets = [0, 0], sizes = [8, 128], strides = [1, 1]} : vector<8x512xf32> to vector<8x128xf32>
    %cst_198 = arith.constant 5.000000e-01 : f32
    %455 = vector.broadcast %cst_198 : f32 to vector<8x128xf32>
    %456 = arith.mulf %455, %454 : vector<8x128xf32>
    %457 = math.tanh %456 : vector<8x128xf32>
    %cst_199 = arith.constant 5.000000e-01 : f32
    %458 = vector.broadcast %cst_199 : f32 to vector<8x128xf32>
    %459 = arith.mulf %458, %457 : vector<8x128xf32>
    %cst_200 = arith.constant 5.000000e-01 : f32
    %460 = vector.broadcast %cst_200 : f32 to vector<8x128xf32>
    %461 = arith.addf %459, %460 : vector<8x128xf32>
    %462 = vector.extract_strided_slice %453 {offsets = [0, 128], sizes = [8, 128], strides = [1, 1]} : vector<8x512xf32> to vector<8x128xf32>
    %cst_201 = arith.constant 5.000000e-01 : f32
    %463 = vector.broadcast %cst_201 : f32 to vector<8x128xf32>
    %464 = arith.mulf %463, %462 : vector<8x128xf32>
    %465 = math.tanh %464 : vector<8x128xf32>
    %cst_202 = arith.constant 5.000000e-01 : f32
    %466 = vector.broadcast %cst_202 : f32 to vector<8x128xf32>
    %467 = arith.mulf %466, %465 : vector<8x128xf32>
    %cst_203 = arith.constant 5.000000e-01 : f32
    %468 = vector.broadcast %cst_203 : f32 to vector<8x128xf32>
    %469 = arith.addf %467, %468 : vector<8x128xf32>
    %470 = vector.extract_strided_slice %453 {offsets = [0, 256], sizes = [8, 128], strides = [1, 1]} : vector<8x512xf32> to vector<8x128xf32>
    %471 = math.tanh %470 : vector<8x128xf32>
    %472 = vector.extract_strided_slice %453 {offsets = [0, 384], sizes = [8, 128], strides = [1, 1]} : vector<8x512xf32> to vector<8x128xf32>
    %cst_204 = arith.constant 5.000000e-01 : f32
    %473 = vector.broadcast %cst_204 : f32 to vector<8x128xf32>
    %474 = arith.mulf %473, %472 : vector<8x128xf32>
    %475 = math.tanh %474 : vector<8x128xf32>
    %cst_205 = arith.constant 5.000000e-01 : f32
    %476 = vector.broadcast %cst_205 : f32 to vector<8x128xf32>
    %477 = arith.mulf %476, %475 : vector<8x128xf32>
    %cst_206 = arith.constant 5.000000e-01 : f32
    %478 = vector.broadcast %cst_206 : f32 to vector<8x128xf32>
    %479 = arith.addf %477, %478 : vector<8x128xf32>
    %480 = arith.mulf %469, %447 : vector<8x128xf32>
    %481 = arith.mulf %461, %471 : vector<8x128xf32>
    %482 = arith.addf %480, %481 : vector<8x128xf32>
    %483 = math.tanh %482 : vector<8x128xf32>
    %484 = arith.mulf %479, %483 : vector<8x128xf32>
    %c32_207 = arith.constant 32 : index
    %c0_208 = arith.constant 0 : index
    %485 = vector.load %arg6[%c32_207, %c0_208] : memref<64x128xf32, #tpu.memory_space<vmem>>, vector<8x128xf32>
    tpu.vector_store %arg6[%c32_207, %c0_208], %484 {strides = array<i32>} : memref<64x128xf32, #tpu.memory_space<vmem>>, vector<8x128xf32>,
    %c40_209 = arith.constant 40 : index
    %c0_210 = arith.constant 0 : index
    %486 = vector.load %arg10[%c40_209, %c0_210] : memref<64x512xf32, #tpu.memory_space<vmem>>, vector<8x512xf32>
    %cst_211 = arith.constant dense<0.000000e+00> : vector<8x512xf32>
    %487 = tpu.matmul %484, %308, %cst_211 {dimension_numbers = #tpu.dot_dimension_numbers<[1], [0], [0], [1], [0, 0, 1, 1], [], []>} : vector<8x128xf32>, vector<128x512xf32>, vector<8x512xf32> -> vector<8x512xf32>
    %488 = arith.addf %486, %487 : vector<8x512xf32>
    %489 = vector.extract_strided_slice %488 {offsets = [0, 0], sizes = [8, 128], strides = [1, 1]} : vector<8x512xf32> to vector<8x128xf32>
    %cst_212 = arith.constant 5.000000e-01 : f32
    %490 = vector.broadcast %cst_212 : f32 to vector<8x128xf32>
    %491 = arith.mulf %490, %489 : vector<8x128xf32>
    %492 = math.tanh %491 : vector<8x128xf32>
    %cst_213 = arith.constant 5.000000e-01 : f32
    %493 = vector.broadcast %cst_213 : f32 to vector<8x128xf32>
    %494 = arith.mulf %493, %492 : vector<8x128xf32>
    %cst_214 = arith.constant 5.000000e-01 : f32
    %495 = vector.broadcast %cst_214 : f32 to vector<8x128xf32>
    %496 = arith.addf %494, %495 : vector<8x128xf32>
    %497 = vector.extract_strided_slice %488 {offsets = [0, 128], sizes = [8, 128], strides = [1, 1]} : vector<8x512xf32> to vector<8x128xf32>
    %cst_215 = arith.constant 5.000000e-01 : f32
    %498 = vector.broadcast %cst_215 : f32 to vector<8x128xf32>
    %499 = arith.mulf %498, %497 : vector<8x128xf32>
    %500 = math.tanh %499 : vector<8x128xf32>
    %cst_216 = arith.constant 5.000000e-01 : f32
    %501 = vector.broadcast %cst_216 : f32 to vector<8x128xf32>
    %502 = arith.mulf %501, %500 : vector<8x128xf32>
    %cst_217 = arith.constant 5.000000e-01 : f32
    %503 = vector.broadcast %cst_217 : f32 to vector<8x128xf32>
    %504 = arith.addf %502, %503 : vector<8x128xf32>
    %505 = vector.extract_strided_slice %488 {offsets = [0, 256], sizes = [8, 128], strides = [1, 1]} : vector<8x512xf32> to vector<8x128xf32>
    %506 = math.tanh %505 : vector<8x128xf32>
    %507 = vector.extract_strided_slice %488 {offsets = [0, 384], sizes = [8, 128], strides = [1, 1]} : vector<8x512xf32> to vector<8x128xf32>
    %cst_218 = arith.constant 5.000000e-01 : f32
    %508 = vector.broadcast %cst_218 : f32 to vector<8x128xf32>
    %509 = arith.mulf %508, %507 : vector<8x128xf32>
    %510 = math.tanh %509 : vector<8x128xf32>
    %cst_219 = arith.constant 5.000000e-01 : f32
    %511 = vector.broadcast %cst_219 : f32 to vector<8x128xf32>
    %512 = arith.mulf %511, %510 : vector<8x128xf32>
    %cst_220 = arith.constant 5.000000e-01 : f32
    %513 = vector.broadcast %cst_220 : f32 to vector<8x128xf32>
    %514 = arith.addf %512, %513 : vector<8x128xf32>
    %515 = arith.mulf %504, %482 : vector<8x128xf32>
    %516 = arith.mulf %496, %506 : vector<8x128xf32>
    %517 = arith.addf %515, %516 : vector<8x128xf32>
    %518 = math.tanh %517 : vector<8x128xf32>
    %519 = arith.mulf %514, %518 : vector<8x128xf32>
    %c40_221 = arith.constant 40 : index
    %c0_222 = arith.constant 0 : index
    %520 = vector.load %arg6[%c40_221, %c0_222] : memref<64x128xf32, #tpu.memory_space<vmem>>, vector<8x128xf32>
    tpu.vector_store %arg6[%c40_221, %c0_222], %519 {strides = array<i32>} : memref<64x128xf32, #tpu.memory_space<vmem>>, vector<8x128xf32>,
    %c48_223 = arith.constant 48 : index
    %c0_224 = arith.constant 0 : index
    %521 = vector.load %arg10[%c48_223, %c0_224] : memref<64x512xf32, #tpu.memory_space<vmem>>, vector<8x512xf32>
    %cst_225 = arith.constant dense<0.000000e+00> : vector<8x512xf32>
    %522 = tpu.matmul %519, %308, %cst_225 {dimension_numbers = #tpu.dot_dimension_numbers<[1], [0], [0], [1], [0, 0, 1, 1], [], []>} : vector<8x128xf32>, vector<128x512xf32>, vector<8x512xf32> -> vector<8x512xf32>
    %523 = arith.addf %521, %522 : vector<8x512xf32>
    %524 = vector.extract_strided_slice %523 {offsets = [0, 0], sizes = [8, 128], strides = [1, 1]} : vector<8x512xf32> to vector<8x128xf32>
    %cst_226 = arith.constant 5.000000e-01 : f32
    %525 = vector.broadcast %cst_226 : f32 to vector<8x128xf32>
    %526 = arith.mulf %525, %524 : vector<8x128xf32>
    %527 = math.tanh %526 : vector<8x128xf32>
    %cst_227 = arith.constant 5.000000e-01 : f32
    %528 = vector.broadcast %cst_227 : f32 to vector<8x128xf32>
    %529 = arith.mulf %528, %527 : vector<8x128xf32>
    %cst_228 = arith.constant 5.000000e-01 : f32
    %530 = vector.broadcast %cst_228 : f32 to vector<8x128xf32>
    %531 = arith.addf %529, %530 : vector<8x128xf32>
    %532 = vector.extract_strided_slice %523 {offsets = [0, 128], sizes = [8, 128], strides = [1, 1]} : vector<8x512xf32> to vector<8x128xf32>
    %cst_229 = arith.constant 5.000000e-01 : f32
    %533 = vector.broadcast %cst_229 : f32 to vector<8x128xf32>
    %534 = arith.mulf %533, %532 : vector<8x128xf32>
    %535 = math.tanh %534 : vector<8x128xf32>
    %cst_230 = arith.constant 5.000000e-01 : f32
    %536 = vector.broadcast %cst_230 : f32 to vector<8x128xf32>
    %537 = arith.mulf %536, %535 : vector<8x128xf32>
    %cst_231 = arith.constant 5.000000e-01 : f32
    %538 = vector.broadcast %cst_231 : f32 to vector<8x128xf32>
    %539 = arith.addf %537, %538 : vector<8x128xf32>
    %540 = vector.extract_strided_slice %523 {offsets = [0, 256], sizes = [8, 128], strides = [1, 1]} : vector<8x512xf32> to vector<8x128xf32>
    %541 = math.tanh %540 : vector<8x128xf32>
    %542 = vector.extract_strided_slice %523 {offsets = [0, 384], sizes = [8, 128], strides = [1, 1]} : vector<8x512xf32> to vector<8x128xf32>
    %cst_232 = arith.constant 5.000000e-01 : f32
    %543 = vector.broadcast %cst_232 : f32 to vector<8x128xf32>
    %544 = arith.mulf %543, %542 : vector<8x128xf32>
    %545 = math.tanh %544 : vector<8x128xf32>
    %cst_233 = arith.constant 5.000000e-01 : f32
    %546 = vector.broadcast %cst_233 : f32 to vector<8x128xf32>
    %547 = arith.mulf %546, %545 : vector<8x128xf32>
    %cst_234 = arith.constant 5.000000e-01 : f32
    %548 = vector.broadcast %cst_234 : f32 to vector<8x128xf32>
    %549 = arith.addf %547, %548 : vector<8x128xf32>
    %550 = arith.mulf %539, %517 : vector<8x128xf32>
    %551 = arith.mulf %531, %541 : vector<8x128xf32>
    %552 = arith.addf %550, %551 : vector<8x128xf32>
    %553 = math.tanh %552 : vector<8x128xf32>
    %554 = arith.mulf %549, %553 : vector<8x128xf32>
    %c48_235 = arith.constant 48 : index
    %c0_236 = arith.constant 0 : index
    %555 = vector.load %arg6[%c48_235, %c0_236] : memref<64x128xf32, #tpu.memory_space<vmem>>, vector<8x128xf32>
    tpu.vector_store %arg6[%c48_235, %c0_236], %554 {strides = array<i32>} : memref<64x128xf32, #tpu.memory_space<vmem>>, vector<8x128xf32>,
    %c56_237 = arith.constant 56 : index
    %c0_238 = arith.constant 0 : index
    %556 = vector.load %arg10[%c56_237, %c0_238] : memref<64x512xf32, #tpu.memory_space<vmem>>, vector<8x512xf32>
    %cst_239 = arith.constant dense<0.000000e+00> : vector<8x512xf32>
    %557 = tpu.matmul %554, %308, %cst_239 {dimension_numbers = #tpu.dot_dimension_numbers<[1], [0], [0], [1], [0, 0, 1, 1], [], []>} : vector<8x128xf32>, vector<128x512xf32>, vector<8x512xf32> -> vector<8x512xf32>
    %558 = arith.addf %556, %557 : vector<8x512xf32>
    %559 = vector.extract_strided_slice %558 {offsets = [0, 0], sizes = [8, 128], strides = [1, 1]} : vector<8x512xf32> to vector<8x128xf32>
    %cst_240 = arith.constant 5.000000e-01 : f32
    %560 = vector.broadcast %cst_240 : f32 to vector<8x128xf32>
    %561 = arith.mulf %560, %559 : vector<8x128xf32>
    %562 = math.tanh %561 : vector<8x128xf32>
    %cst_241 = arith.constant 5.000000e-01 : f32
    %563 = vector.broadcast %cst_241 : f32 to vector<8x128xf32>
    %564 = arith.mulf %563, %562 : vector<8x128xf32>
    %cst_242 = arith.constant 5.000000e-01 : f32
    %565 = vector.broadcast %cst_242 : f32 to vector<8x128xf32>
    %566 = arith.addf %564, %565 : vector<8x128xf32>
    %567 = vector.extract_strided_slice %558 {offsets = [0, 128], sizes = [8, 128], strides = [1, 1]} : vector<8x512xf32> to vector<8x128xf32>
    %cst_243 = arith.constant 5.000000e-01 : f32
    %568 = vector.broadcast %cst_243 : f32 to vector<8x128xf32>
    %569 = arith.mulf %568, %567 : vector<8x128xf32>
    %570 = math.tanh %569 : vector<8x128xf32>
    %cst_244 = arith.constant 5.000000e-01 : f32
    %571 = vector.broadcast %cst_244 : f32 to vector<8x128xf32>
    %572 = arith.mulf %571, %570 : vector<8x128xf32>
    %cst_245 = arith.constant 5.000000e-01 : f32
    %573 = vector.broadcast %cst_245 : f32 to vector<8x128xf32>
    %574 = arith.addf %572, %573 : vector<8x128xf32>
    %575 = vector.extract_strided_slice %558 {offsets = [0, 256], sizes = [8, 128], strides = [1, 1]} : vector<8x512xf32> to vector<8x128xf32>
    %576 = math.tanh %575 : vector<8x128xf32>
    %577 = vector.extract_strided_slice %558 {offsets = [0, 384], sizes = [8, 128], strides = [1, 1]} : vector<8x512xf32> to vector<8x128xf32>
    %cst_246 = arith.constant 5.000000e-01 : f32
    %578 = vector.broadcast %cst_246 : f32 to vector<8x128xf32>
    %579 = arith.mulf %578, %577 : vector<8x128xf32>
    %580 = math.tanh %579 : vector<8x128xf32>
    %cst_247 = arith.constant 5.000000e-01 : f32
    %581 = vector.broadcast %cst_247 : f32 to vector<8x128xf32>
    %582 = arith.mulf %581, %580 : vector<8x128xf32>
    %cst_248 = arith.constant 5.000000e-01 : f32
    %583 = vector.broadcast %cst_248 : f32 to vector<8x128xf32>
    %584 = arith.addf %582, %583 : vector<8x128xf32>
    %585 = arith.mulf %574, %552 : vector<8x128xf32>
    %586 = arith.mulf %566, %576 : vector<8x128xf32>
    %587 = arith.addf %585, %586 : vector<8x128xf32>
    %588 = math.tanh %587 : vector<8x128xf32>
    %589 = arith.mulf %584, %588 : vector<8x128xf32>
    %c56_249 = arith.constant 56 : index
    %c0_250 = arith.constant 0 : index
    %590 = vector.load %arg6[%c56_249, %c0_250] : memref<64x128xf32, #tpu.memory_space<vmem>>, vector<8x128xf32>
    tpu.vector_store %arg6[%c56_249, %c0_250], %589 {strides = array<i32>} : memref<64x128xf32, #tpu.memory_space<vmem>>, vector<8x128xf32>,
    %c1_251 = arith.constant 1 : index
    %c0_252 = arith.constant 0 : index
    %c0_253 = arith.constant 0 : index
    %591 = vector.load %arg7[%c1_251, %c0_252, %c0_253] : memref<2x8x128xf32, #tpu.memory_space<vmem>>, vector<1x8x128xf32>
    %592 = vector.shape_cast %591 : vector<1x8x128xf32> to vector<8x128xf32>
    %593 = vector.shape_cast %589 : vector<8x128xf32> to vector<1x8x128xf32>
    tpu.vector_store %arg7[%c1_251, %c0_252, %c0_253], %593 {strides = array<i32>} : memref<2x8x128xf32, #tpu.memory_space<vmem>>, vector<1x8x128xf32>,
    %c1_254 = arith.constant 1 : index
    %c0_255 = arith.constant 0 : index
    %c0_256 = arith.constant 0 : index
    %594 = vector.load %arg8[%c1_254, %c0_255, %c0_256] : memref<2x8x128xf32, #tpu.memory_space<vmem>>, vector<1x8x128xf32>
    %595 = vector.shape_cast %594 : vector<1x8x128xf32> to vector<8x128xf32>
    %596 = vector.shape_cast %587 : vector<8x128xf32> to vector<1x8x128xf32>
    tpu.vector_store %arg8[%c1_254, %c0_255, %c0_256], %596 {strides = array<i32>} : memref<2x8x128xf32, #tpu.memory_space<vmem>>, vector<1x8x128xf32>,
    return
  }
  func.func @transform_0(%arg0: i32) -> (i32, i32) {
    %c0_i32 = arith.constant 0 : i32
    %c0_i32_0 = arith.constant 0 : i32
    %c0_i32_1 = arith.constant 0 : i32
    return %c0_i32, %c0_i32_0 : i32, i32
  }
  func.func @transform_1(%arg0: i32) -> (i32, i32) {
    %c0_i32 = arith.constant 0 : i32
    %c0_i32_0 = arith.constant 0 : i32
    %c0_i32_1 = arith.constant 0 : i32
    return %c0_i32, %c0_i32_0 : i32, i32
  }
  func.func @transform_2(%arg0: i32) -> (i32, i32, i32) {
    %c0_i32 = arith.constant 0 : i32
    %c0_i32_0 = arith.constant 0 : i32
    %c0_i32_1 = arith.constant 0 : i32
    %c0_i32_2 = arith.constant 0 : i32
    return %c0_i32, %c0_i32_0, %c0_i32_1 : i32, i32, i32
  }
  func.func @transform_3(%arg0: i32) -> (i32, i32, i32) {
    %c0_i32 = arith.constant 0 : i32
    %c0_i32_0 = arith.constant 0 : i32
    %c0_i32_1 = arith.constant 0 : i32
    %c0_i32_2 = arith.constant 0 : i32
    return %c0_i32, %c0_i32_0, %c0_i32_1 : i32, i32, i32
  }
  func.func @transform_4(%arg0: i32) -> (i32, i32, i32) {
    %c0_i32 = arith.constant 0 : i32
    %c0_i32_0 = arith.constant 0 : i32
    %c0_i32_1 = arith.constant 0 : i32
    %c0_i32_2 = arith.constant 0 : i32
    return %c0_i32, %c0_i32_0, %c0_i32_1 : i32, i32, i32
  }
  func.func @transform_5(%arg0: i32) -> (i32, i32) {
    %c0_i32 = arith.constant 0 : i32
    %c0_i32_0 = arith.constant 0 : i32
    %c0_i32_1 = arith.constant 0 : i32
    return %c0_i32, %c0_i32_0 : i32, i32
  }
  func.func @transform_6(%arg0: i32) -> (i32, i32, i32) {
    %c0_i32 = arith.constant 0 : i32
    %c0_i32_0 = arith.constant 0 : i32
    %c0_i32_1 = arith.constant 0 : i32
    %c0_i32_2 = arith.constant 0 : i32
    return %c0_i32, %c0_i32_0, %c0_i32_1 : i32, i32, i32
  }
  func.func @transform_7(%arg0: i32) -> (i32, i32, i32) {
    %c0_i32 = arith.constant 0 : i32
    %c0_i32_0 = arith.constant 0 : i32
    %c0_i32_1 = arith.constant 0 : i32
    %c0_i32_2 = arith.constant 0 : i32
    return %c0_i32, %c0_i32_0, %c0_i32_1 : i32, i32, i32
  }
}

</mosaic_0001>

<bundles_post_ra>
// kernel: tpu_custom_call.1
= control target key start
LH: loop header
LB: loop body
LE: loop exit
PB: predicated region body
PF: predicated region fallthrough
CT: control target
= control target key end

     0   :  { %13 = vsyncpa [#allocation5], 0  ;;  %s6251_s0 = inlined_call_operand.vmem [shape: f32[64,16], index: 0, kind: input, shape index: {}]   ;;  %s6252_s1 = inlined_call_operand.vmem [shape: f32[16,512], index: 1, kind: input, shape index: {}]   ;;  %s6253_s2 = inlined_call_operand.hbm [shape: f32[1,128,512], index: 2, kind: input, shape index: {}]   ;;  %s6254_s3 = inlined_call_operand.hbm [shape: f32[2,128,512], index: 3, kind: input, shape index: {}]   ;;  %s6255_s4 = inlined_call_operand.vmem [shape: f32[2,1,512], index: 4, kind: input, shape index: {}]   ;;  %s6256_s5 = inlined_call_operand.hbm [shape: f32[64,128], index: 5, kind: output, shape index: {0}]   ;;  %s6257_s6 = inlined_call_operand.hbm [shape: f32[2,8,128], index: 6, kind: output, shape index: {1}]   ;;  %s6258_s7 = inlined_call_operand.hbm [shape: f32[2,8,128], index: 7, kind: output, shape index: {2}]  }
   0x1   :  { %14 = vsyncpa [#allocation8], 0 }
   0x2   :  { %15 = vsyncpa [#allocation6], 0 }
   0x3   :  { %16 = vsyncpa [#allocation11], 0  ;;  %s5144_s24 = smov [#allocation4]   ;;  %s5026_s28 = scalar_lea.hbm %s6253_s2, 8192 }
   0x4   :  { %s26_s25 = sshll.u32 %s5144_s24, 4  ;;  %p5027_p0 = scmp.ne.s32.totalorder %s6253_s2, %s5026_s28  ;;  %s27_s25 = int_to_ptr.vmem [resolvable:$true] %s26_s25 }
   0x5   :  { %p5030_p1 = scmp.lt.u32.totalorder %s5026_s28, %s6253_s2 }
   0x7   :  { %p5032_p2 = pnand %p5030_p1, %p5027_p0 }
   0x9   :  { %5035 = shalt.err (!%p5032_p2)
}
   0xa   :  { %s5036_s10 = scalar_lea.vmem %s27_s25, 8192  ;;  %p5041_p4 = scmp.lt.s32.totalorder %s27_s25, %s27_s25 }
   0xb   :  { %p5037_p3 = scmp.ne.s32.totalorder %s27_s25, %s5036_s10  ;;  %p5042_p5 = scmp.lt.s32.totalorder %s5036_s10, %s5036_s10 }
   0xd   :  { %p5043_p6 = por %p5042_p5, %p5041_p4 }
   0xf   :  { %p5044_p7 = pnand %p5043_p6, %p5037_p3 }
  0x11   :  { %5047 = shalt.err (!%p5044_p7)
}
  0x12   :  { %s5145_s11 = smov 512   ;;  %s5146_s12 = smov 32  }
  0x13   :  { %32 = dma.hbm_to_vmem [thread:$0]  %s6253_s2, 8192, %s27_s25, [#allocation5], %s5145_s11, %s5145_s11, %s5146_s12  }
  0x14   :  { %s5147_s15 = smov [#allocation7]   ;;  %s5048_s19 = scalar_lea.hbm %s6254_s3, 16384 }
  0x15   :  { %s38_s16 = sshll.u32 %s5147_s15, 4  ;;  %p5049_p8 = scmp.ne.s32.totalorder %s6254_s3, %s5048_s19  ;;  %s39_s16 = int_to_ptr.vmem [resolvable:$true] %s38_s16 }
  0x16   :  { %p5052_p9 = scmp.lt.u32.totalorder %s5048_s19, %s6254_s3 }
  0x18   :  { %p5054_p10 = pnand %p5052_p9, %p5049_p8 }
  0x1a   :  { %5057 = shalt.err (!%p5054_p10)
}
  0x1b   :  { %s5058_s24 = scalar_lea.vmem %s39_s16, 16384  ;;  %p5063_p12 = scmp.lt.s32.totalorder %s39_s16, %s39_s16 }
  0x1c   :  { %p5059_p11 = scmp.ne.s32.totalorder %s39_s16, %s5058_s24  ;;  %p5064_p13 = scmp.lt.s32.totalorder %s5058_s24, %s5058_s24 }
  0x1e   :  { %p5065_p0 = por %p5064_p13, %p5063_p12 }
  0x20   :  { %p5066_p1 = pnand %p5065_p0, %p5059_p11 }
  0x22   :  { %5069 = shalt.err (!%p5066_p1)
}
  0x23   :  { %44 = dma.hbm_to_vmem [thread:$0]  %s6254_s3, 16384, %s39_s16, [#allocation8], %s5145_s11, %s5145_s11, %s5146_s12  }
  0x24   :  { %5136 = dma.done.wait [#allocation5], 8192  }
  0x25   :  { %5137 = vsyncadd [#allocation5], 4294959104 }
  0x26   :  { %5138 = dma.done.wait [#allocation8], 16384  }
  0x27   :  { %5139 = vsyncadd [#allocation8], 4294950912  ;;  %v5148_v0 = vmov 0.0   ;;  %v62_v1 = vld [vmem:[%s6252_s1 + $0x8] sm:$0xff]  ;;  %v64_v3 = vld [vmem:[%s6252_s1 + $0x18] sm:$0xff]  ;;  %vm91_vm0 = vcmask 130048  }
  0x28   :  { %180 = vmatprep.mubr.f32.mxu0 %v5148_v0  ;;  %293 = vmatprep.mubr.f32.mxu1 %v5148_v0  ;;  %v66_v2 = vld [vmem:[%s6252_s1 + $0x28] sm:$0xff]  ;;  %v68_v5 = vld [vmem:[%s6252_s1 + $0x38] sm:$0xff]  ;;  %v61_v6 = vld [vmem:[%s6252_s1] sm:$0xff]  ;;  %s5150_s12 = smov [#allocation9]   ;;  %s5151_s14 = smov [#allocation12]  }
  0x29   :  { %v3632_v4 = vpack.c.bf16 %v66_v2, %v62_v1  ;;  %v65_v7 = vld [vmem:[%s6252_s1 + $0x20] sm:$0xff]  ;;  %v3636_v8 = vpack.c.bf16 %v68_v5, %v64_v3  ;;  %v63_v10 = vld [vmem:[%s6252_s1 + $0x10] sm:$0xff]  ;;  %v375_v14 = vld [vmem:[#allocation7 + $0x8] sm:$0xff]  ;;  %s3571_s13 = sshll.u32 %s5150_s12, 4  ;;  %s3595_s15 = sshll.u32 %s5151_s14, 4  ;;  %s6192_s13 = int_to_ptr.vmem [resolvable:$true] %s3571_s13  ;;  %s6194_s15 = int_to_ptr.vmem [resolvable:$true] %s3595_s15 }
  0x2a   :  { %v3634_v9 = vpack.c.bf16 %v65_v7, %v61_v6  ;;  %v67_v11 = vld [vmem:[%s6252_s1 + $0x30] sm:$0xff]  ;;  %v53_v12 = vld [vmem:[%s6251_s0] sm:$0xff]  ;;  %v379_v15 = vld [vmem:[#allocation7 + $0x28] sm:$0xff] }
  0x2b   :  { %3633 = vmatprep.subr.bf16.mxu0 %v3632_v4  ;;  %v3638_v13 = vpack.c.bf16 %v67_v11, %v63_v10  ;;  %v377_v16 = vld [vmem:[#allocation7 + $0x18] sm:$0xff]  ;;  %3637 = vmatprep.subr.bf16.mxu1 %v3636_v8  ;;  %v5247_v17 = vpack.c.bf16 %v379_v15, %v375_v14  ;;  %v374_v19 = vld [vmem:[#allocation7] sm:$0xff]  ;;  %v376_v23 = vld [vmem:[#allocation7 + $0x10] sm:$0xff] }
  0x2c   :  { %3635 = vmatpush1.bf16.msra.mxu0 %v3634_v9  ;;  %v381_v18 = vld [vmem:[#allocation7 + $0x38] sm:$0xff]  ;;  %v378_v20 = vld [vmem:[#allocation7 + $0x20] sm:$0xff]  ;;  %v380_v24 = vld [vmem:[#allocation7 + $0x30] sm:$0xff] }
  0x2d   :  { %3639 = vmatpush1.bf16.msra.mxu1 %v3638_v13  ;;  %v5249_v21 = vpack.c.bf16 %v381_v18, %v377_v16  ;;  %v5251_v22 = vpack.c.bf16 %v378_v20, %v374_v19  ;;  %3641 = vmatprep.subr.bf16.mxu0 %v5247_v17  ;;  %v5254_v25 = vpack.c.bf16 %v380_v24, %v376_v23  ;;  %v383_v26 = vld [vmem:[#allocation7 + $0x48] sm:$0xff]  ;;  %v385_v28 = vld [vmem:[#allocation7 + $0x58] sm:$0xff]  ;;  %v382_v31 = vld [vmem:[#allocation7 + $0x40] sm:$0xff] }
  0x2e   :  { %v387_v27 = vld [vmem:[#allocation7 + $0x68] sm:$0xff]  ;;  %v389_v30 = vld [vmem:[#allocation7 + $0x78] sm:$0xff]  ;;  %v386_v32 = vld [vmem:[#allocation7 + $0x60] sm:$0xff] }
  0x2f   :  { %3615 = vmatmul.mubr.msk.f32.vlgmr.msra.gmra.mrb[0].mxu0 %vm91_vm0, %v53_v12  ;;  %3673 = vmatprep.subr.bf16.mxu1 %v5249_v21  ;;  %v5258_v29 = vpack.c.bf16 %v387_v27, %v383_v26  ;;  %v54_v33 = vld [vmem:[%s6251_s0 + $0x8] sm:$0xff]  ;;  %v5265_v34 = vpack.c.bf16 %v389_v30, %v385_v28  ;;  %v5267_v35 = vpack.c.bf16 %v386_v32, %v382_v31  ;;  %v384_v36 = vld [vmem:[#allocation7 + $0x50] sm:$0xff]  ;;  %v393_v41 = vld [vmem:[#allocation7 + $0x98] sm:$0xff] }
  0x30   :  { %3623 = vmatmul.mubr.msk.f32.vlgmr.msra.gmra.mrb[0].mxu1 %vm91_vm0, %v53_v12  ;;  %3643 = vmatpush1.bf16.msra.mxu0 %v5251_v22  ;;  %v388_v37 = vld [vmem:[#allocation7 + $0x70] sm:$0xff]  ;;  %v391_v39 = vld [vmem:[#allocation7 + $0x88] sm:$0xff]  ;;  %v397_v43 = vld [vmem:[#allocation7 + $0xb8] sm:$0xff] }
  0x31   :  { %3675 = vmatpush1.bf16.msra.mxu1 %v5254_v25  ;;  %186 = vmatprep.mubr.f32.mxu0 %v5148_v0  ;;  %v5271_v38 = vpack.c.bf16 %v388_v37, %v384_v36  ;;  %v395_v40 = vld [vmem:[#allocation7 + $0xa8] sm:$0xff]  ;;  %v390_v44 = vld [vmem:[#allocation7 + $0x80] sm:$0xff]  ;;  %v55_v46 = vld [vmem:[%s6251_s0 + $0x10] sm:$0xff]  ;;  %v5282_v47 = vpack.c.bf16 %v397_v43, %v393_v41 }
  0x32   :  { %299 = vmatprep.mubr.f32.mxu1 %v5148_v0  ;;  %3645 = vmatprep.subr.bf16.mxu0 %v5258_v29  ;;  %v5275_v42 = vpack.c.bf16 %v395_v40, %v391_v39  ;;  %v394_v45 = vld [vmem:[#allocation7 + $0xa0] sm:$0xff]  ;;  %v392_v48 = vld [vmem:[#allocation7 + $0x90] sm:$0xff]  ;;  %v399_v51 = vld [vmem:[#allocation7 + $0xc8] sm:$0xff] }
  0x33   :  { %3616 = vmatmul.mubr.msk.f32.gmra.mrb[2].mxu0 %vm91_vm0, %v54_v33  ;;  %3677 = vmatprep.subr.bf16.mxu1 %v5265_v34  ;;  %v396_v49 = vld [vmem:[#allocation7 + $0xb0] sm:$0xff]  ;;  %v5286_v50 = vpack.c.bf16 %v394_v45, %v390_v44  ;;  %v403_v52 = vld [vmem:[#allocation7 + $0xe8] sm:$0xff]  ;;  %v401_v53 = vld [vmem:[#allocation7 + $0xd8] sm:$0xff] }
  0x34   :  { %3624 = vmatmul.mubr.msk.f32.gmra.mrb[2].mxu1 %vm91_vm0, %v54_v33  ;;  %3647 = vmatpush1.bf16.msra.mxu0 %v5267_v35  ;;  %v5290_v54 = vpack.c.bf16 %v396_v49, %v392_v48  ;;  %v405_v55 = vld [vmem:[#allocation7 + $0xf8] sm:$0xff]  ;;  %v398_v56 = vld [vmem:[#allocation7 + $0xc0] sm:$0xff]  ;;  %v5294_v58 = vpack.c.bf16 %v403_v52, %v399_v51  ;;  %v400_v59 = vld [vmem:[#allocation7 + $0xd0] sm:$0xff] }
  0x35   :  { %3679 = vmatpush1.bf16.msra.mxu1 %v5271_v38  ;;  %192 = vmatprep.mubr.f32.mxu0 %v5148_v0  ;;  %v402_v57 = vld [vmem:[#allocation7 + $0xe0] sm:$0xff]  ;;  %v404_v60 = vld [vmem:[#allocation7 + $0xf0] sm:$0xff]  ;;  %v5298_v61 = vpack.c.bf16 %v405_v55, %v401_v53  ;;  %v407_v62 = vld [vmem:[#allocation7 + $0x108] sm:$0xff] }
  0x36   :  { %305 = vmatprep.mubr.f32.mxu1 %v5148_v0  ;;  %3649 = vmatprep.subr.bf16.mxu0 %v5275_v42  ;;  %v411_v63 = vld [vmem:[#allocation7 + $0x128] sm:$0xff]  ;;  %v56_v1 = vld [vmem:[%s6251_s0 + $0x18] sm:$0xff]  ;;  %v5305_v2 = vpack.c.bf16 %v402_v57, %v398_v56  ;;  %v5309_v5 = vpack.c.bf16 %v404_v60, %v400_v59  ;;  %v406_v6 = vld [vmem:[#allocation7 + $0x100] sm:$0xff] }
  0x37   :  { %3617 = vmatmul.mubr.msk.f32.gmra.mrb[4].mxu0 %vm91_vm0, %v55_v46  ;;  %3681 = vmatprep.subr.bf16.mxu1 %v5282_v47  ;;  %v409_v3 = vld [vmem:[#allocation7 + $0x118] sm:$0xff]  ;;  %v410_v7 = vld [vmem:[#allocation7 + $0x120] sm:$0xff]  ;;  %v5313_v8 = vpack.c.bf16 %v411_v63, %v407_v62  ;;  %v408_v9 = vld [vmem:[#allocation7 + $0x110] sm:$0xff] }
  0x38   :  { %3625 = vmatmul.mubr.msk.f32.gmra.mrb[4].mxu1 %vm91_vm0, %v55_v46  ;;  %3651 = vmatpush1.bf16.msra.mxu0 %v5286_v50  ;;  %v413_v4 = vld [vmem:[#allocation7 + $0x138] sm:$0xff]  ;;  %v412_v10 = vld [vmem:[#allocation7 + $0x130] sm:$0xff]  ;;  %v415_v12 = vld [vmem:[#allocation7 + $0x148] sm:$0xff]  ;;  %v5324_v15 = vpack.c.bf16 %v410_v7, %v406_v6  ;;  %v71_v7 = vlaneseq }
  0x39   :  { %3683 = vmatpush1.bf16.msra.mxu1 %v5290_v54  ;;  %198 = vmatprep.mubr.f32.mxu0 %v5148_v0  ;;  %v5317_v11 = vpack.c.bf16 %v413_v4, %v409_v3  ;;  %v419_v13 = vld [vmem:[#allocation7 + $0x168] sm:$0xff]  ;;  %v57_v14 = vld [vmem:[%s6251_s0 + $0x20] sm:$0xff]  ;;  %v417_v16 = vld [vmem:[#allocation7 + $0x158] sm:$0xff]  ;;  %v5328_v19 = vpack.c.bf16 %v412_v10, %v408_v9 }
  0x3a   :  { %311 = vmatprep.mubr.f32.mxu1 %v5148_v0  ;;  %3653 = vmatprep.subr.bf16.mxu0 %v5294_v58  ;;  %v421_v18 = vld [vmem:[#allocation7 + $0x178] sm:$0xff]  ;;  %v414_v20 = vld [vmem:[#allocation7 + $0x140] sm:$0xff]  ;;  %v5332_v24 = vpack.c.bf16 %v419_v13, %v415_v12  ;;  %v416_v26 = vld [vmem:[#allocation7 + $0x150] sm:$0xff]  ;;  %v5434_v9 = vshrl.u32 %v71_v7, 7 }
  0x3b   :  { %3618 = vmatmul.mubr.msk.f32.gmra.mrb[6].mxu0 %vm91_vm0, %v56_v1  ;;  %3685 = vmatprep.subr.bf16.mxu1 %v5298_v61  ;;  %v418_v23 = vld [vmem:[#allocation7 + $0x160] sm:$0xff]  ;;  %v420_v27 = vld [vmem:[#allocation7 + $0x170] sm:$0xff]  ;;  %v5336_v28 = vpack.c.bf16 %v421_v18, %v417_v16  ;;  %v423_v30 = vld [vmem:[#allocation7 + $0x188] sm:$0xff] }
  0x3c   :  { %3626 = vmatmul.mubr.msk.f32.gmra.mrb[6].mxu1 %vm91_vm0, %v56_v1  ;;  %3655 = vmatpush1.bf16.msra.mxu0 %v5305_v2  ;;  %v427_v31 = vld [vmem:[#allocation7 + $0x1a8] sm:$0xff]  ;;  %v5343_v33 = vpack.c.bf16 %v418_v23, %v414_v20  ;;  %v425_v36 = vld [vmem:[#allocation7 + $0x198] sm:$0xff]  ;;  %v5347_v39 = vpack.c.bf16 %v420_v27, %v416_v26  ;;  %v422_v40 = vld [vmem:[#allocation7 + $0x180] sm:$0xff]  ;;  %v73_v10 = vsub.s32 0, %v5434_v9  ;;  %v77_v13 = vsub.s32 1, %v5434_v9 }
  0x3d   :  { %3687 = vmatpush1.bf16.msra.mxu1 %v5309_v5  ;;  %204 = vmatprep.mubr.f32.mxu0 %v5148_v0  ;;  %v58_v32 = vld [vmem:[%s6251_s0 + $0x28] sm:$0xff]  ;;  %v429_v37 = vld [vmem:[#allocation7 + $0x1b8] sm:$0xff]  ;;  %v426_v41 = vld [vmem:[#allocation7 + $0x1a0] sm:$0xff]  ;;  %v5351_v43 = vpack.c.bf16 %v427_v31, %v423_v30  ;;  %v81_v16 = vsub.s32 2, %v5434_v9  ;;  %v6259_v31 = vsub.s32 3, %v5434_v9 }
  0x3e   :  { %317 = vmatprep.mubr.f32.mxu1 %v5148_v0  ;;  %3657 = vmatprep.subr.bf16.mxu0 %v5313_v8  ;;  %v424_v44 = vld [vmem:[#allocation7 + $0x190] sm:$0xff]  ;;  %v5355_v46 = vpack.c.bf16 %v429_v37, %v425_v36  ;;  %v431_v48 = vld [vmem:[#allocation7 + $0x1c8] sm:$0xff]  ;;  %v5362_v52 = vpack.c.bf16 %v426_v41, %v422_v40  ;;  %v433_v53 = vld [vmem:[#allocation7 + $0x1d8] sm:$0xff] }
  0x3f   :  { %3619 = vmatmul.mubr.msk.f32.gmra.mrb[8].mxu0 %vm91_vm0, %v57_v14  ;;  %3689 = vmatprep.subr.bf16.mxu1 %v5317_v11  ;;  %v428_v45 = vld [vmem:[#allocation7 + $0x1b0] sm:$0xff]  ;;  %v435_v49 = vld [vmem:[#allocation7 + $0x1e8] sm:$0xff]  ;;  %v437_v55 = vld [vmem:[#allocation7 + $0x1f8] sm:$0xff] }
  0x40   :  { %3627 = vmatmul.mubr.msk.f32.gmra.mrb[8].mxu1 %vm91_vm0, %v57_v14  ;;  %3659 = vmatpush1.bf16.msra.mxu0 %v5324_v15  ;;  %v59_v51 = vld [vmem:[%s6251_s0 + $0x30] sm:$0xff]  ;;  %v5366_v56 = vpack.c.bf16 %v428_v45, %v424_v44  ;;  %v430_v57 = vld [vmem:[#allocation7 + $0x1c0] sm:$0xff]  ;;  %v5370_v60 = vpack.c.bf16 %v435_v49, %v431_v48  ;;  %v5374_v1 = vpack.c.bf16 %v437_v55, %v433_v53  ;;  %v60_v3 = vld [vmem:[%s6251_s0 + $0x38] sm:$0xff] }
  0x41   :  { %3691 = vmatpush1.bf16.msra.mxu1 %v5328_v19  ;;  %210 = vmatprep.mubr.f32.mxu0 %v5148_v0  ;;  %v434_v59 = vld [vmem:[#allocation7 + $0x1e0] sm:$0xff]  ;;  %v432_v62 = vld [vmem:[#allocation7 + $0x1d0] sm:$0xff] }
  0x42   :  { %323 = vmatprep.mubr.f32.mxu1 %v5148_v0  ;;  %3661 = vmatprep.subr.bf16.mxu0 %v5332_v24  ;;  %v436_v63 = vld [vmem:[#allocation7 + $0x1f0] sm:$0xff]  ;;  %v5381_v4 = vpack.c.bf16 %v434_v59, %v430_v57  ;;  %v69_v12 = vld [vmem:[%s6255_s4] sm:$0xf] }
  0x43   :  { %3620 = vmatmul.mubr.msk.f32.gmra.mrb[10].mxu0 %vm91_vm0, %v58_v32  ;;  %3693 = vmatprep.subr.bf16.mxu1 %v5336_v28  ;;  %v5385_v6 = vpack.c.bf16 %v436_v63, %v432_v62  ;;  %v5443_v14 = vrot.slane %v69_v12, %v73_v10  ;;  %v5448_v18 = vrot.slane %v69_v12, %v77_v13 }
  0x44   :  { %3628 = vmatmul.mubr.msk.f32.gmra.mrb[10].mxu1 %vm91_vm0, %v58_v32  ;;  %3663 = vmatpush1.bf16.msra.mxu0 %v5343_v33  ;;  %v5453_v26 = vrot.slane %v69_v12, %v81_v16  ;;  %v5460_v44 = vrot.slane %v69_v12, %v6259_v31 }
  0x45   :  { %3695 = vmatpush1.bf16.msra.mxu1 %v5347_v39  ;;  %216 = vmatprep.mubr.f32.mxu0 %v5148_v0 }
  0x46   :  { %329 = vmatprep.mubr.f32.mxu1 %v5148_v0  ;;  %3665 = vmatprep.subr.bf16.mxu0 %v5351_v43 }
  0x47   :  { %3621 = vmatmul.mubr.msk.f32.gmra.mrb[12].mxu0 %vm91_vm0, %v59_v51  ;;  %3697 = vmatprep.subr.bf16.mxu1 %v5355_v46 }
  0x48   :  { %3629 = vmatmul.mubr.msk.f32.gmra.mrb[12].mxu1 %vm91_vm0, %v59_v51  ;;  %3667 = vmatpush1.bf16.msra.mxu0 %v5362_v52 }
  0x49   :  { %3699 = vmatpush1.bf16.msra.mxu1 %v5366_v56  ;;  %222 = vmatprep.mubr.f32.mxu0 %v5148_v0 }
  0x4a   :  { %335 = vmatprep.mubr.f32.mxu1 %v5148_v0  ;;  %3669 = vmatprep.subr.bf16.mxu0 %v5370_v60 }
  0x4b   :  { %3622 = vmatmul.mubr.msk.f32.gmra.mrb[14].mxu0 %vm91_vm0, %v60_v3  ;;  %3701 = vmatprep.subr.bf16.mxu1 %v5374_v1 }
  0x4c   :  { %3630 = vmatmul.mubr.msk.f32.gmra.mrb[14].mxu1 %vm91_vm0, %v60_v3  ;;  %3671 = vmatpush1.bf16.msra.mxu0 %v5381_v4 }
  0x4d   :  { %3703 = vmatpush1.bf16.msra.mxu1 %v5385_v6  ;;  %506 = vmatprep.mubr.f32.mxu0 %v5148_v0 }
  0x4e   :  { %577 = vmatprep.mubr.f32.mxu1 %v5148_v0  ;;  %3705 = vmatprep.subr.bf16.mxu0 %v5247_v17 }
  0x4f   :  { %507 = vmatmul.mubr.f32.vlgmr.msra.gmra.mrb[0].mxu0 %v5148_v0  ;;  %3737 = vmatprep.subr.bf16.mxu1 %v5249_v21 }
  0x50   :  { %578 = vmatmul.mubr.f32.vlgmr.msra.gmra.mrb[0].mxu1 %v5148_v0  ;;  %3707 = vmatpush1.bf16.msra.mxu0 %v5251_v22 }
  0x51   :  { %3739 = vmatpush1.bf16.msra.mxu1 %v5254_v25  ;;  %3709 = vmatprep.subr.bf16.mxu0 %v5258_v29 }
  0x52   :  { %3741 = vmatprep.subr.bf16.mxu1 %v5265_v34  ;;  %675 = vmatprep.mubr.f32.mxu0 %v5148_v0 }
  0x53   :  { %746 = vmatprep.mubr.f32.mxu1 %v5148_v0 }
  0x54   :  { %3711 = vmatpush1.bf16.msra.mxu0 %v5267_v35 }
  0x55   :  { %3743 = vmatpush1.bf16.msra.mxu1 %v5271_v38  ;;  %3713 = vmatprep.subr.bf16.mxu0 %v5275_v42 }
  0x56   :  { %3745 = vmatprep.subr.bf16.mxu1 %v5282_v47 }
  0x58   :  { %3715 = vmatpush1.bf16.msra.mxu0 %v5286_v50 }
  0x59   :  { %3747 = vmatpush1.bf16.msra.mxu1 %v5290_v54  ;;  %3717 = vmatprep.subr.bf16.mxu0 %v5294_v58 }
  0x5a   :  { %3749 = vmatprep.subr.bf16.mxu1 %v5298_v61 }
  0x5c   :  { %3719 = vmatpush1.bf16.msra.mxu0 %v5305_v2 }
  0x5d   :  { %3751 = vmatpush1.bf16.msra.mxu1 %v5309_v5  ;;  %3721 = vmatprep.subr.bf16.mxu0 %v5313_v8 }
  0x5e   :  { %3753 = vmatprep.subr.bf16.mxu1 %v5317_v11 }
  0x60   :  { %3723 = vmatpush1.bf16.msra.mxu0 %v5324_v15 }
  0x61   :  { %3755 = vmatpush1.bf16.msra.mxu1 %v5328_v19  ;;  %3725 = vmatprep.subr.bf16.mxu0 %v5332_v24 }
  0x62   :  { %3757 = vmatprep.subr.bf16.mxu1 %v5336_v28 }
  0x64   :  { %3727 = vmatpush1.bf16.msra.mxu0 %v5343_v33 }
  0x65   :  { %3759 = vmatpush1.bf16.msra.mxu1 %v5347_v39  ;;  %3729 = vmatprep.subr.bf16.mxu0 %v5351_v43 }
  0x66   :  { %3761 = vmatprep.subr.bf16.mxu1 %v5355_v46 }
  0x68   :  { %3731 = vmatpush1.bf16.msra.mxu0 %v5362_v52 }
  0x69   :  { %3763 = vmatpush1.bf16.msra.mxu1 %v5366_v56  ;;  %3733 = vmatprep.subr.bf16.mxu0 %v5370_v60 }
  0x6a   :  { %3765 = vmatprep.subr.bf16.mxu1 %v5374_v1 }
  0x6c   :  { %3735 = vmatpush1.bf16.msra.mxu0 %v5381_v4 }
  0x6d   :  { %3767 = vmatpush1.bf16.msra.mxu1 %v5385_v6  ;;  %3769 = vmatprep.subr.bf16.mxu0 %v5247_v17 }
  0x6e   :  { %3801 = vmatprep.subr.bf16.mxu1 %v5249_v21 }
 0x122   :  { %v508_v20 = vpop.f32.mrb[0].mxu0 }
 0x123   :  { %v4728_v23 = vadd.f32 %v508_v20, %v5443_v14  ;;  %v579_v27 = vpop.f32.mrb[0].mxu1  ;;  %v510_v30 = vpop.f32.mrb[1].mxu0 }
 0x124   :  { %v4729_v32 = vadd.f32 %v510_v30, %v5448_v18  ;;  %v581_v36 = vpop.f32.mrb[1].mxu1  ;;  %v4744_v41 = vadd.f32 %v579_v27, %v5453_v26 }
 0x125   :  { %v588_v37 = vmul.f32 0.5, %v4728_v23  ;;  %v4745_v45 = vadd.f32 %v581_v36, %v5460_v44 }
 0x126   :  { %v592_v40 = vmul.f32 0.5, %v4729_v32 }
 0x127   :  { %4866 = vtanh.f32 %v588_v37  ;;  %v597_v48 = vmul.f32 0.5, %v4745_v45 }
 0x128   :  { %4868 = vtanh.f32 %v592_v40 }
 0x129   :  { %4870 = vtanh.f32 %v4744_v41 }
 0x12a   :  { %4872 = vtanh.f32 %v597_v48 }
 0x131   :  { %v4867_v49 = vpop.eup %4866 }
 0x132   :  { %v4869_v51 = vpop.eup %4868  ;;  %v590_v53 = vmul.f32 0.5, %v4867_v49 }
 0x133   :  { %v594_v55 = vmul.f32 0.5, %v4869_v51  ;;  %v4871_v59 = vpop.eup %4870 }
 0x134   :  { %v591_v57 = vadd.f32 0.5, %v590_v53  ;;  %v4873_v12 = vpop.eup %4872 }
 0x135   :  { %v595_v62 = vadd.f32 0.5, %v594_v55  ;;  %v599_v20 = vmul.f32 0.5, %v4873_v12 }
 0x136   :  { %v602_v63 = vmul.f32 %v4871_v59, %v591_v57 }
 0x137   :  { %v601_v3 = vmul.f32 0.0, %v595_v62  ;;  %v600_v23 = vadd.f32 0.5, %v599_v20 }
 0x139   :  { %v5463_v7 = vadd.f32 %v602_v63, %v601_v3 }
 0x13b   :  { %4874 = vtanh.f32 %v5463_v7 }
 0x145   :  { %v4875_v27 = vpop.eup %4874 }
 0x146   :  { %v5466_v30 = vmul.f32 %v4875_v27, %v600_v23 }
 0x148   :  { %676 = vmatmul.mubr.f32.vlgmr.msra.gmra.mrb[2].mxu0 %v5466_v30  ;;  %747 = vmatmul.mubr.f32.vlgmr.msra.gmra.mrb[2].mxu1 %v5466_v30 }
 0x149   :  { %3771 = vmatpush1.bf16.msra.mxu0 %v5251_v22  ;;  %3803 = vmatpush1.bf16.msra.mxu1 %v5254_v25 }
 0x14a   :  { %3773 = vmatprep.subr.bf16.mxu0 %v5258_v29  ;;  %3805 = vmatprep.subr.bf16.mxu1 %v5265_v34 }
 0x14b   :  { %844 = vmatprep.mubr.f32.mxu0 %v5148_v0  ;;  %915 = vmatprep.mubr.f32.mxu1 %v5148_v0 }
 0x14d   :  { %3775 = vmatpush1.bf16.msra.mxu0 %v5267_v35  ;;  %3807 = vmatpush1.bf16.msra.mxu1 %v5271_v38 }
 0x14e   :  { %3777 = vmatprep.subr.bf16.mxu0 %v5275_v42  ;;  %3809 = vmatprep.subr.bf16.mxu1 %v5282_v47 }
 0x151   :  { %3779 = vmatpush1.bf16.msra.mxu0 %v5286_v50  ;;  %3811 = vmatpush1.bf16.msra.mxu1 %v5290_v54 }
 0x152   :  { %3781 = vmatprep.subr.bf16.mxu0 %v5294_v58  ;;  %3813 = vmatprep.subr.bf16.mxu1 %v5298_v61 }
 0x155   :  { %3783 = vmatpush1.bf16.msra.mxu0 %v5305_v2  ;;  %3815 = vmatpush1.bf16.msra.mxu1 %v5309_v5 }
 0x156   :  { %3785 = vmatprep.subr.bf16.mxu0 %v5313_v8  ;;  %3817 = vmatprep.subr.bf16.mxu1 %v5317_v11 }
 0x159   :  { %3787 = vmatpush1.bf16.msra.mxu0 %v5324_v15  ;;  %3819 = vmatpush1.bf16.msra.mxu1 %v5328_v19 }
 0x15a   :  { %3789 = vmatprep.subr.bf16.mxu0 %v5332_v24  ;;  %3821 = vmatprep.subr.bf16.mxu1 %v5336_v28 }
 0x15d   :  { %3791 = vmatpush1.bf16.msra.mxu0 %v5343_v33  ;;  %3823 = vmatpush1.bf16.msra.mxu1 %v5347_v39 }
 0x15e   :  { %3793 = vmatprep.subr.bf16.mxu0 %v5351_v43  ;;  %3825 = vmatprep.subr.bf16.mxu1 %v5355_v46 }
 0x161   :  { %3795 = vmatpush1.bf16.msra.mxu0 %v5362_v52  ;;  %3827 = vmatpush1.bf16.msra.mxu1 %v5366_v56 }
 0x162   :  { %3797 = vmatprep.subr.bf16.mxu0 %v5370_v60  ;;  %3829 = vmatprep.subr.bf16.mxu1 %v5374_v1 }
 0x165   :  { %3799 = vmatpush1.bf16.msra.mxu0 %v5381_v4  ;;  %3831 = vmatpush1.bf16.msra.mxu1 %v5385_v6 }
 0x166   :  { %3833 = vmatprep.subr.bf16.mxu0 %v5247_v17  ;;  %3865 = vmatprep.subr.bf16.mxu1 %v5249_v21 }
 0x21b   :  { %v677_v32 = vpop.f32.mrb[2].mxu0  ;;  %v748_v36 = vpop.f32.mrb[2].mxu1 }
 0x21c   :  { %v4730_v37 = vadd.f32 %v677_v32, %v5443_v14  ;;  %v679_v40 = vpop.f32.mrb[3].mxu0  ;;  %v750_v41 = vpop.f32.mrb[3].mxu1  ;;  %v4746_v51 = vadd.f32 %v748_v36, %v5453_v26 }
 0x21d   :  { %v4731_v45 = vadd.f32 %v679_v40, %v5448_v18  ;;  %v4747_v53 = vadd.f32 %v750_v41, %v5460_v44 }
 0x21e   :  { %v757_v48 = vmul.f32 0.5, %v4730_v37 }
 0x21f   :  { %v761_v49 = vmul.f32 0.5, %v4731_v45  ;;  %v766_v55 = vmul.f32 0.5, %v4747_v53 }
 0x220   :  { %4876 = vtanh.f32 %v757_v48 }
 0x221   :  { %4878 = vtanh.f32 %v761_v49 }
 0x222   :  { %4880 = vtanh.f32 %v4746_v51 }
 0x223   :  { %4882 = vtanh.f32 %v766_v55 }
 0x22a   :  { %v4877_v57 = vpop.eup %4876 }
 0x22b   :  { %v4879_v59 = vpop.eup %4878  ;;  %v759_v62 = vmul.f32 0.5, %v4877_v57 }
 0x22c   :  { %v763_v63 = vmul.f32 0.5, %v4879_v59  ;;  %v4881_v12 = vpop.eup %4880 }
 0x22d   :  { %v760_v3 = vadd.f32 0.5, %v759_v62  ;;  %v4883_v36 = vpop.eup %4882 }
 0x22e   :  { %v764_v20 = vadd.f32 0.5, %v763_v63  ;;  %v768_v37 = vmul.f32 0.5, %v4883_v36 }
 0x22f   :  { %v771_v23 = vmul.f32 %v4881_v12, %v760_v3 }
 0x230   :  { %v770_v27 = vmul.f32 %v764_v20, %v5463_v7  ;;  %v769_v40 = vadd.f32 0.5, %v768_v37 }
 0x232   :  { %v5509_v32 = vadd.f32 %v771_v23, %v770_v27 }
 0x234   :  { %4884 = vtanh.f32 %v5509_v32 }
 0x23e   :  { %v4885_v41 = vpop.eup %4884 }
 0x23f   :  { %v5512_v45 = vmul.f32 %v4885_v41, %v769_v40 }
 0x241   :  { %845 = vmatmul.mubr.f32.vlgmr.msra.gmra.mrb[4].mxu0 %v5512_v45  ;;  %916 = vmatmul.mubr.f32.vlgmr.msra.gmra.mrb[4].mxu1 %v5512_v45 }
 0x242   :  { %3835 = vmatpush1.bf16.msra.mxu0 %v5251_v22  ;;  %3867 = vmatpush1.bf16.msra.mxu1 %v5254_v25 }
 0x243   :  { %3837 = vmatprep.subr.bf16.mxu0 %v5258_v29  ;;  %3869 = vmatprep.subr.bf16.mxu1 %v5265_v34 }
 0x244   :  { %1013 = vmatprep.mubr.f32.mxu0 %v5148_v0  ;;  %1084 = vmatprep.mubr.f32.mxu1 %v5148_v0 }
 0x246   :  { %3839 = vmatpush1.bf16.msra.mxu0 %v5267_v35  ;;  %3871 = vmatpush1.bf16.msra.mxu1 %v5271_v38 }
 0x247   :  { %3841 = vmatprep.subr.bf16.mxu0 %v5275_v42  ;;  %3873 = vmatprep.subr.bf16.mxu1 %v5282_v47 }
 0x24a   :  { %3843 = vmatpush1.bf16.msra.mxu0 %v5286_v50  ;;  %3875 = vmatpush1.bf16.msra.mxu1 %v5290_v54 }
 0x24b   :  { %3845 = vmatprep.subr.bf16.mxu0 %v5294_v58  ;;  %3877 = vmatprep.subr.bf16.mxu1 %v5298_v61 }
 0x24e   :  { %3847 = vmatpush1.bf16.msra.mxu0 %v5305_v2  ;;  %3879 = vmatpush1.bf16.msra.mxu1 %v5309_v5 }
 0x24f   :  { %3849 = vmatprep.subr.bf16.mxu0 %v5313_v8  ;;  %3881 = vmatprep.subr.bf16.mxu1 %v5317_v11 }
 0x252   :  { %3851 = vmatpush1.bf16.msra.mxu0 %v5324_v15  ;;  %3883 = vmatpush1.bf16.msra.mxu1 %v5328_v19 }
 0x253   :  { %3853 = vmatprep.subr.bf16.mxu0 %v5332_v24  ;;  %3885 = vmatprep.subr.bf16.mxu1 %v5336_v28 }
 0x256   :  { %3855 = vmatpush1.bf16.msra.mxu0 %v5343_v33  ;;  %3887 = vmatpush1.bf16.msra.mxu1 %v5347_v39 }
 0x257   :  { %3857 = vmatprep.subr.bf16.mxu0 %v5351_v43  ;;  %3889 = vmatprep.subr.bf16.mxu1 %v5355_v46 }
 0x25a   :  { %3859 = vmatpush1.bf16.msra.mxu0 %v5362_v52  ;;  %3891 = vmatpush1.bf16.msra.mxu1 %v5366_v56 }
 0x25b   :  { %3861 = vmatprep.subr.bf16.mxu0 %v5370_v60  ;;  %3893 = vmatprep.subr.bf16.mxu1 %v5374_v1 }
 0x25e   :  { %3863 = vmatpush1.bf16.msra.mxu0 %v5381_v4  ;;  %3895 = vmatpush1.bf16.msra.mxu1 %v5385_v6 }
 0x25f   :  { %3897 = vmatprep.subr.bf16.mxu0 %v5247_v17  ;;  %3929 = vmatprep.subr.bf16.mxu1 %v5249_v21 }
 0x314   :  { %v846_v7 = vpop.f32.mrb[4].mxu0  ;;  %v917_v48 = vpop.f32.mrb[4].mxu1 }
 0x315   :  { %v4732_v49 = vadd.f32 %v846_v7, %v5443_v14  ;;  %v848_v51 = vpop.f32.mrb[5].mxu0  ;;  %v919_v53 = vpop.f32.mrb[5].mxu1  ;;  %v4748_v62 = vadd.f32 %v917_v48, %v5453_v26 }
 0x316   :  { %v4733_v55 = vadd.f32 %v848_v51, %v5448_v18  ;;  %v4749_v63 = vadd.f32 %v919_v53, %v5460_v44 }
 0x317   :  { %v926_v57 = vmul.f32 0.5, %v4732_v49 }
 0x318   :  { %v930_v59 = vmul.f32 0.5, %v4733_v55  ;;  %v935_v3 = vmul.f32 0.5, %v4749_v63 }
 0x319   :  { %4886 = vtanh.f32 %v926_v57 }
 0x31a   :  { %4888 = vtanh.f32 %v930_v59 }
 0x31b   :  { %4890 = vtanh.f32 %v4748_v62 }
 0x31c   :  { %4892 = vtanh.f32 %v935_v3 }
 0x323   :  { %v4887_v12 = vpop.eup %4886 }
 0x324   :  { %v4889_v20 = vpop.eup %4888  ;;  %v928_v23 = vmul.f32 0.5, %v4887_v12 }
 0x325   :  { %v932_v27 = vmul.f32 0.5, %v4889_v20  ;;  %v4891_v37 = vpop.eup %4890 }
 0x326   :  { %v929_v36 = vadd.f32 0.5, %v928_v23  ;;  %v4893_v48 = vpop.eup %4892 }
 0x327   :  { %v933_v40 = vadd.f32 0.5, %v932_v27  ;;  %v937_v51 = vmul.f32 0.5, %v4893_v48 }
 0x328   :  { %v940_v41 = vmul.f32 %v4891_v37, %v929_v36 }
 0x329   :  { %v939_v7 = vmul.f32 %v933_v40, %v5509_v32  ;;  %v938_v55 = vadd.f32 0.5, %v937_v51 }
 0x32b   :  { %v5555_v49 = vadd.f32 %v940_v41, %v939_v7 }
 0x32d   :  { %4894 = vtanh.f32 %v5555_v49 }
 0x337   :  { %v4895_v53 = vpop.eup %4894 }
 0x338   :  { %v5558_v57 = vmul.f32 %v4895_v53, %v938_v55 }
 0x33a   :  { %1014 = vmatmul.mubr.f32.vlgmr.msra.gmra.mrb[6].mxu0 %v5558_v57  ;;  %1085 = vmatmul.mubr.f32.vlgmr.msra.gmra.mrb[6].mxu1 %v5558_v57 }
 0x33b   :  { %3899 = vmatpush1.bf16.msra.mxu0 %v5251_v22  ;;  %3931 = vmatpush1.bf16.msra.mxu1 %v5254_v25 }
 0x33c   :  { %3901 = vmatprep.subr.bf16.mxu0 %v5258_v29  ;;  %3933 = vmatprep.subr.bf16.mxu1 %v5265_v34 }
 0x33d   :  { %1182 = vmatprep.mubr.f32.mxu0 %v5148_v0  ;;  %1253 = vmatprep.mubr.f32.mxu1 %v5148_v0 }
 0x33f   :  { %3903 = vmatpush1.bf16.msra.mxu0 %v5267_v35  ;;  %3935 = vmatpush1.bf16.msra.mxu1 %v5271_v38 }
 0x340   :  { %3905 = vmatprep.subr.bf16.mxu0 %v5275_v42  ;;  %3937 = vmatprep.subr.bf16.mxu1 %v5282_v47 }
 0x343   :  { %3907 = vmatpush1.bf16.msra.mxu0 %v5286_v50  ;;  %3939 = vmatpush1.bf16.msra.mxu1 %v5290_v54 }
 0x344   :  { %3909 = vmatprep.subr.bf16.mxu0 %v5294_v58  ;;  %3941 = vmatprep.subr.bf16.mxu1 %v5298_v61 }
 0x347   :  { %3911 = vmatpush1.bf16.msra.mxu0 %v5305_v2  ;;  %3943 = vmatpush1.bf16.msra.mxu1 %v5309_v5 }
 0x348   :  { %3913 = vmatprep.subr.bf16.mxu0 %v5313_v8  ;;  %3945 = vmatprep.subr.bf16.mxu1 %v5317_v11 }
 0x34b   :  { %3915 = vmatpush1.bf16.msra.mxu0 %v5324_v15  ;;  %3947 = vmatpush1.bf16.msra.mxu1 %v5328_v19 }
 0x34c   :  { %3917 = vmatprep.subr.bf16.mxu0 %v5332_v24  ;;  %3949 = vmatprep.subr.bf16.mxu1 %v5336_v28 }
 0x34f   :  { %3919 = vmatpush1.bf16.msra.mxu0 %v5343_v33  ;;  %3951 = vmatpush1.bf16.msra.mxu1 %v5347_v39 }
 0x350   :  { %3921 = vmatprep.subr.bf16.mxu0 %v5351_v43  ;;  %3953 = vmatprep.subr.bf16.mxu1 %v5355_v46 }
 0x353   :  { %3923 = vmatpush1.bf16.msra.mxu0 %v5362_v52  ;;  %3955 = vmatpush1.bf16.msra.mxu1 %v5366_v56 }
 0x354   :  { %3925 = vmatprep.subr.bf16.mxu0 %v5370_v60  ;;  %3957 = vmatprep.subr.bf16.mxu1 %v5374_v1 }
 0x357   :  { %3927 = vmatpush1.bf16.msra.mxu0 %v5381_v4  ;;  %3959 = vmatpush1.bf16.msra.mxu1 %v5385_v6 }
 0x358   :  { %3961 = vmatprep.subr.bf16.mxu0 %v5247_v17  ;;  %3993 = vmatprep.subr.bf16.mxu1 %v5249_v21 }
 0x40d   :  { %v1015_v32 = vpop.f32.mrb[6].mxu0  ;;  %v1086_v59 = vpop.f32.mrb[6].mxu1 }
 0x40e   :  { %v4734_v62 = vadd.f32 %v1015_v32, %v5443_v14  ;;  %v1017_v63 = vpop.f32.mrb[7].mxu0  ;;  %v1088_v3 = vpop.f32.mrb[7].mxu1  ;;  %v4750_v27 = vadd.f32 %v1086_v59, %v5453_v26 }
 0x40f   :  { %v4735_v12 = vadd.f32 %v1017_v63, %v5448_v18  ;;  %v4751_v36 = vadd.f32 %v1088_v3, %v5460_v44 }
 0x410   :  { %v1095_v20 = vmul.f32 0.5, %v4734_v62 }
 0x411   :  { %v1099_v23 = vmul.f32 0.5, %v4735_v12  ;;  %v1104_v37 = vmul.f32 0.5, %v4751_v36 }
 0x412   :  { %4896 = vtanh.f32 %v1095_v20 }
 0x413   :  { %4898 = vtanh.f32 %v1099_v23 }
 0x414   :  { %4900 = vtanh.f32 %v4750_v27 }
 0x415   :  { %4902 = vtanh.f32 %v1104_v37 }
 0x41c   :  { %v4897_v40 = vpop.eup %4896 }
 0x41d   :  { %v4899_v41 = vpop.eup %4898  ;;  %v1097_v7 = vmul.f32 0.5, %v4897_v40 }
 0x41e   :  { %v1101_v48 = vmul.f32 0.5, %v4899_v41  ;;  %v4901_v55 = vpop.eup %4900 }
 0x41f   :  { %v1098_v51 = vadd.f32 0.5, %v1097_v7  ;;  %v4903_v59 = vpop.eup %4902 }
 0x420   :  { %v1102_v53 = vadd.f32 0.5, %v1101_v48  ;;  %v1106_v12 = vmul.f32 0.5, %v4903_v59 }
 0x421   :  { %v1109_v32 = vmul.f32 %v4901_v55, %v1098_v51 }
 0x422   :  { %v1108_v62 = vmul.f32 %v1102_v53, %v5555_v49  ;;  %v1107_v20 = vadd.f32 0.5, %v1106_v12 }
 0x424   :  { %v5601_v63 = vadd.f32 %v1109_v32, %v1108_v62 }
 0x426   :  { %4904 = vtanh.f32 %v5601_v63 }
 0x430   :  { %v4905_v3 = vpop.eup %4904 }
 0x431   :  { %v5604_v23 = vmul.f32 %v4905_v3, %v1107_v20 }
 0x433   :  { %1183 = vmatmul.mubr.f32.vlgmr.msra.gmra.mrb[8].mxu0 %v5604_v23  ;;  %1254 = vmatmul.mubr.f32.vlgmr.msra.gmra.mrb[8].mxu1 %v5604_v23 }
 0x434   :  { %3963 = vmatpush1.bf16.msra.mxu0 %v5251_v22  ;;  %3995 = vmatpush1.bf16.msra.mxu1 %v5254_v25 }
 0x435   :  { %3965 = vmatprep.subr.bf16.mxu0 %v5258_v29  ;;  %3997 = vmatprep.subr.bf16.mxu1 %v5265_v34 }
 0x436   :  { %1351 = vmatprep.mubr.f32.mxu0 %v5148_v0  ;;  %1422 = vmatprep.mubr.f32.mxu1 %v5148_v0 }
 0x438   :  { %3967 = vmatpush1.bf16.msra.mxu0 %v5267_v35  ;;  %3999 = vmatpush1.bf16.msra.mxu1 %v5271_v38 }
 0x439   :  { %3969 = vmatprep.subr.bf16.mxu0 %v5275_v42  ;;  %4001 = vmatprep.subr.bf16.mxu1 %v5282_v47 }
 0x43c   :  { %3971 = vmatpush1.bf16.msra.mxu0 %v5286_v50  ;;  %4003 = vmatpush1.bf16.msra.mxu1 %v5290_v54 }
 0x43d   :  { %3973 = vmatprep.subr.bf16.mxu0 %v5294_v58  ;;  %4005 = vmatprep.subr.bf16.mxu1 %v5298_v61 }
 0x440   :  { %3975 = vmatpush1.bf16.msra.mxu0 %v5305_v2  ;;  %4007 = vmatpush1.bf16.msra.mxu1 %v5309_v5 }
 0x441   :  { %3977 = vmatprep.subr.bf16.mxu0 %v5313_v8  ;;  %4009 = vmatprep.subr.bf16.mxu1 %v5317_v11 }
 0x444   :  { %3979 = vmatpush1.bf16.msra.mxu0 %v5324_v15  ;;  %4011 = vmatpush1.bf16.msra.mxu1 %v5328_v19 }
 0x445   :  { %3981 = vmatprep.subr.bf16.mxu0 %v5332_v24  ;;  %4013 = vmatprep.subr.bf16.mxu1 %v5336_v28 }
 0x448   :  { %3983 = vmatpush1.bf16.msra.mxu0 %v5343_v33  ;;  %4015 = vmatpush1.bf16.msra.mxu1 %v5347_v39 }
 0x449   :  { %3985 = vmatprep.subr.bf16.mxu0 %v5351_v43  ;;  %4017 = vmatprep.subr.bf16.mxu1 %v5355_v46 }
 0x44c   :  { %3987 = vmatpush1.bf16.msra.mxu0 %v5362_v52  ;;  %4019 = vmatpush1.bf16.msra.mxu1 %v5366_v56 }
 0x44d   :  { %3989 = vmatprep.subr.bf16.mxu0 %v5370_v60  ;;  %4021 = vmatprep.subr.bf16.mxu1 %v5374_v1 }
 0x450   :  { %3991 = vmatpush1.bf16.msra.mxu0 %v5381_v4  ;;  %4023 = vmatpush1.bf16.msra.mxu1 %v5385_v6 }
 0x451   :  { %4025 = vmatprep.subr.bf16.mxu0 %v5247_v17  ;;  %4057 = vmatprep.subr.bf16.mxu1 %v5249_v21 }
 0x506   :  { %v1184_v49 = vpop.f32.mrb[8].mxu0  ;;  %v1255_v27 = vpop.f32.mrb[8].mxu1 }
 0x507   :  { %v4736_v36 = vadd.f32 %v1184_v49, %v5443_v14  ;;  %v1186_v37 = vpop.f32.mrb[9].mxu0  ;;  %v1257_v40 = vpop.f32.mrb[9].mxu1  ;;  %v4752_v51 = vadd.f32 %v1255_v27, %v5453_v26 }
 0x508   :  { %v4737_v41 = vadd.f32 %v1186_v37, %v5448_v18  ;;  %v4753_v55 = vadd.f32 %v1257_v40, %v5460_v44 }
 0x509   :  { %v1264_v7 = vmul.f32 0.5, %v4736_v36 }
 0x50a   :  { %v1268_v48 = vmul.f32 0.5, %v4737_v41  ;;  %v1273_v53 = vmul.f32 0.5, %v4753_v55 }
 0x50b   :  { %4906 = vtanh.f32 %v1264_v7 }
 0x50c   :  { %4908 = vtanh.f32 %v1268_v48 }
 0x50d   :  { %4910 = vtanh.f32 %v4752_v51 }
 0x50e   :  { %4912 = vtanh.f32 %v1273_v53 }
 0x515   :  { %v4907_v32 = vpop.eup %4906 }
 0x516   :  { %v4909_v62 = vpop.eup %4908  ;;  %v1266_v59 = vmul.f32 0.5, %v4907_v32 }
 0x517   :  { %v1270_v12 = vmul.f32 0.5, %v4909_v62  ;;  %v4911_v3 = vpop.eup %4910 }
 0x518   :  { %v1267_v20 = vadd.f32 0.5, %v1266_v59  ;;  %v4913_v27 = vpop.eup %4912 }
 0x519   :  { %v1271_v49 = vadd.f32 0.5, %v1270_v12  ;;  %v1275_v41 = vmul.f32 0.5, %v4913_v27 }
 0x51a   :  { %v1278_v31 = vmul.f32 %v4911_v3, %v1267_v20 }
 0x51b   :  { %v1277_v36 = vmul.f32 %v1271_v49, %v5601_v63  ;;  %v1276_v7 = vadd.f32 0.5, %v1275_v41 }
 0x51d   :  { %v5647_v37 = vadd.f32 %v1278_v31, %v1277_v36 }
 0x51f   :  { %4914 = vtanh.f32 %v5647_v37 }
 0x529   :  { %v4915_v40 = vpop.eup %4914 }
 0x52a   :  { %v5650_v48 = vmul.f32 %v4915_v40, %v1276_v7 }
 0x52c   :  { %1352 = vmatmul.mubr.f32.vlgmr.msra.gmra.mrb[10].mxu0 %v5650_v48  ;;  %1423 = vmatmul.mubr.f32.vlgmr.msra.gmra.mrb[10].mxu1 %v5650_v48 }
 0x52d   :  { %4027 = vmatpush1.bf16.msra.mxu0 %v5251_v22  ;;  %4059 = vmatpush1.bf16.msra.mxu1 %v5254_v25 }
 0x52e   :  { %4029 = vmatprep.subr.bf16.mxu0 %v5258_v29  ;;  %4061 = vmatprep.subr.bf16.mxu1 %v5265_v34 }
 0x52f   :  { %1520 = vmatprep.mubr.f32.mxu0 %v5148_v0  ;;  %1591 = vmatprep.mubr.f32.mxu1 %v5148_v0 }
 0x531   :  { %4031 = vmatpush1.bf16.msra.mxu0 %v5267_v35  ;;  %4063 = vmatpush1.bf16.msra.mxu1 %v5271_v38 }
 0x532   :  { %4033 = vmatprep.subr.bf16.mxu0 %v5275_v42  ;;  %4065 = vmatprep.subr.bf16.mxu1 %v5282_v47 }
 0x535   :  { %4035 = vmatpush1.bf16.msra.mxu0 %v5286_v50  ;;  %4067 = vmatpush1.bf16.msra.mxu1 %v5290_v54 }
 0x536   :  { %4037 = vmatprep.subr.bf16.mxu0 %v5294_v58  ;;  %4069 = vmatprep.subr.bf16.mxu1 %v5298_v61 }
 0x539   :  { %4039 = vmatpush1.bf16.msra.mxu0 %v5305_v2  ;;  %4071 = vmatpush1.bf16.msra.mxu1 %v5309_v5 }
 0x53a   :  { %4041 = vmatprep.subr.bf16.mxu0 %v5313_v8  ;;  %4073 = vmatprep.subr.bf16.mxu1 %v5317_v11 }
 0x53d   :  { %4043 = vmatpush1.bf16.msra.mxu0 %v5324_v15  ;;  %4075 = vmatpush1.bf16.msra.mxu1 %v5328_v19 }
 0x53e   :  { %4045 = vmatprep.subr.bf16.mxu0 %v5332_v24  ;;  %4077 = vmatprep.subr.bf16.mxu1 %v5336_v28 }
 0x541   :  { %4047 = vmatpush1.bf16.msra.mxu0 %v5343_v33  ;;  %4079 = vmatpush1.bf16.msra.mxu1 %v5347_v39 }
 0x542   :  { %4049 = vmatprep.subr.bf16.mxu0 %v5351_v43  ;;  %4081 = vmatprep.subr.bf16.mxu1 %v5355_v46 }
 0x545   :  { %4051 = vmatpush1.bf16.msra.mxu0 %v5362_v52  ;;  %4083 = vmatpush1.bf16.msra.mxu1 %v5366_v56 }
 0x546   :  { %4053 = vmatprep.subr.bf16.mxu0 %v5370_v60  ;;  %4085 = vmatprep.subr.bf16.mxu1 %v5374_v1 }
 0x549   :  { %4055 = vmatpush1.bf16.msra.mxu0 %v5381_v4  ;;  %4087 = vmatpush1.bf16.msra.mxu1 %v5385_v6 }
 0x54a   :  { %4089 = vmatprep.subr.bf16.mxu0 %v5247_v17  ;;  %4121 = vmatprep.subr.bf16.mxu1 %v5249_v21 }
 0x5ff   :  { %v1353_v31 = vpop.f32.mrb[10].mxu0  ;;  %v1424_v63 = vpop.f32.mrb[10].mxu1 }
 0x600   :  { %v4738_v51 = vadd.f32 %v1353_v31, %v5443_v14  ;;  %v1355_v55 = vpop.f32.mrb[11].mxu0  ;;  %v1426_v53 = vpop.f32.mrb[11].mxu1  ;;  %v4754_v12 = vadd.f32 %v1424_v63, %v5453_v26 }
 0x601   :  { %v4739_v32 = vadd.f32 %v1355_v55, %v5448_v18  ;;  %v4755_v20 = vadd.f32 %v1426_v53, %v5460_v44 }
 0x602   :  { %v1433_v62 = vmul.f32 0.5, %v4738_v51 }
 0x603   :  { %v1437_v59 = vmul.f32 0.5, %v4739_v32  ;;  %v1442_v17 = vmul.f32 0.5, %v4755_v20  ;;  %v1809_v20 = vld [vmem:[#allocation4 + $0x48] sm:$0xff] }
 0x604   :  { %4916 = vtanh.f32 %v1433_v62 }
 0x605   :  { %4918 = vtanh.f32 %v1437_v59  ;;  %v1802_v59 = vld [vmem:[#allocation4 + $0x10] sm:$0xff] }
 0x606   :  { %4920 = vtanh.f32 %v4754_v12  ;;  %v1806_v12 = vld [vmem:[#allocation4 + $0x30] sm:$0xff] }
 0x607   :  { %4922 = vtanh.f32 %v1442_v17  ;;  %v1813_v17 = vld [vmem:[#allocation4 + $0x68] sm:$0xff] }
 0x60e   :  { %v4917_v3 = vpop.eup %4916 }
 0x60f   :  { %v4919_v21 = vpop.eup %4918  ;;  %v1435_v49 = vmul.f32 0.5, %v4917_v3  ;;  %v1811_v3 = vld [vmem:[#allocation4 + $0x58] sm:$0xff] }
 0x610   :  { %v1439_v36 = vmul.f32 0.5, %v4919_v21  ;;  %v4921_v41 = vpop.eup %4920  ;;  %v1815_v21 = vld [vmem:[#allocation4 + $0x78] sm:$0xff] }
 0x611   :  { %v1436_v27 = vadd.f32 0.5, %v1435_v49  ;;  %v4923_v63 = vpop.eup %4922 }
 0x612   :  { %v1440_v7 = vadd.f32 0.5, %v1439_v36  ;;  %v1444_v55 = vmul.f32 0.5, %v4923_v63  ;;  %v4188_v63 = vpack.c.bf16 %v1815_v21, %v1811_v3  ;;  %v1838_v3 = vld [vmem:[#allocation4 + $0x130] sm:$0xff]  ;;  %v1841_v21 = vld [vmem:[#allocation4 + $0x148] sm:$0xff] }
 0x613   :  { %v1447_v40 = vmul.f32 %v4921_v41, %v1436_v27  ;;  %v4186_v41 = vpack.c.bf16 %v1806_v12, %v1802_v59  ;;  %v1836_v59 = vld [vmem:[#allocation4 + $0x120] sm:$0xff] }
 0x614   :  { %v1446_v31 = vmul.f32 %v1440_v7, %v5647_v37  ;;  %v1445_v32 = vadd.f32 0.5, %v1444_v55  ;;  %v1804_v37 = vld [vmem:[#allocation4 + $0x20] sm:$0xff]  ;;  %v1810_v55 = vld [vmem:[#allocation4 + $0x50] sm:$0xff] }
 0x615   :  { %v1808_v7 = vld [vmem:[#allocation4 + $0x40] sm:$0xff] }
 0x616   :  { %v5693_v51 = vadd.f32 %v1447_v40, %v1446_v31  ;;  %v1812_v40 = vld [vmem:[#allocation4 + $0x60] sm:$0xff] }
 0x618   :  { %4924 = vtanh.f32 %v5693_v51 }
 0x622   :  { %v4925_v53 = vpop.eup %4924 }
 0x623   :  { %v5696_v62 = vmul.f32 %v4925_v53, %v1445_v32  ;;  %v1814_v32 = vld [vmem:[#allocation4 + $0x70] sm:$0xff]  ;;  %v1817_v53 = vld [vmem:[#allocation4 + $0x88] sm:$0xff] }
 0x625   :  { %1521 = vmatmul.mubr.f32.vlgmr.msra.gmra.mrb[12].mxu0 %v5696_v62  ;;  %1592 = vmatmul.mubr.f32.vlgmr.msra.gmra.mrb[12].mxu1 %v5696_v62 }
 0x626   :  { %4091 = vmatpush1.bf16.msra.mxu0 %v5251_v22  ;;  %4123 = vmatpush1.bf16.msra.mxu1 %v5254_v25  ;;  %v1801_v22 = vld [vmem:[#allocation4 + $0x8] sm:$0xff] }
 0x627   :  { %4093 = vmatprep.subr.bf16.mxu0 %v5258_v29  ;;  %4125 = vmatprep.subr.bf16.mxu1 %v5265_v34  ;;  %v1805_v25 = vld [vmem:[#allocation4 + $0x28] sm:$0xff]  ;;  %v1803_v29 = vld [vmem:[#allocation4 + $0x18] sm:$0xff] }
 0x628   :  { %1689 = vmatprep.mubr.f32.mxu0 %v5148_v0  ;;  %1760 = vmatprep.mubr.f32.mxu1 %v5148_v0  ;;  %v4152_v34 = vpack.c.bf16 %v1805_v25, %v1801_v22  ;;  %v1821_v22 = vld [vmem:[#allocation4 + $0xa8] sm:$0xff]  ;;  %v1819_v25 = vld [vmem:[#allocation4 + $0x98] sm:$0xff] }
 0x62a   :  { %4095 = vmatpush1.bf16.msra.mxu0 %v5267_v35  ;;  %4127 = vmatpush1.bf16.msra.mxu1 %v5271_v38  ;;  %v1807_v35 = vld [vmem:[#allocation4 + $0x38] sm:$0xff] }
 0x62b   :  { %4097 = vmatprep.subr.bf16.mxu0 %v5275_v42  ;;  %4129 = vmatprep.subr.bf16.mxu1 %v5282_v47  ;;  %v4184_v38 = vpack.c.bf16 %v1807_v35, %v1803_v29  ;;  %v1823_v29 = vld [vmem:[#allocation4 + $0xb8] sm:$0xff]  ;;  %v4190_v35 = vpack.c.bf16 %v1814_v32, %v1810_v55  ;;  %v1842_v32 = vld [vmem:[#allocation4 + $0x150] sm:$0xff] }
 0x62e   :  { %4099 = vmatpush1.bf16.msra.mxu0 %v5286_v50  ;;  %4131 = vmatpush1.bf16.msra.mxu1 %v5290_v54 }
 0x62f   :  { %4101 = vmatprep.subr.bf16.mxu0 %v5294_v58  ;;  %4133 = vmatprep.subr.bf16.mxu1 %v5298_v61 }
 0x632   :  { %4103 = vmatpush1.bf16.msra.mxu0 %v5305_v2  ;;  %4135 = vmatpush1.bf16.msra.mxu1 %v5309_v5 }
 0x633   :  { %4105 = vmatprep.subr.bf16.mxu0 %v5313_v8  ;;  %4137 = vmatprep.subr.bf16.mxu1 %v5317_v11 }
 0x636   :  { %4107 = vmatpush1.bf16.msra.mxu0 %v5324_v15  ;;  %4139 = vmatpush1.bf16.msra.mxu1 %v5328_v19 }
 0x637   :  { %4109 = vmatprep.subr.bf16.mxu0 %v5332_v24  ;;  %4141 = vmatprep.subr.bf16.mxu1 %v5336_v28 }
 0x63a   :  { %4111 = vmatpush1.bf16.msra.mxu0 %v5343_v33  ;;  %4143 = vmatpush1.bf16.msra.mxu1 %v5347_v39 }
 0x63b   :  { %4113 = vmatprep.subr.bf16.mxu0 %v5351_v43  ;;  %4145 = vmatprep.subr.bf16.mxu1 %v5355_v46 }
 0x63e   :  { %4115 = vmatpush1.bf16.msra.mxu0 %v5362_v52  ;;  %4147 = vmatpush1.bf16.msra.mxu1 %v5366_v56 }
 0x63f   :  { %4117 = vmatprep.subr.bf16.mxu0 %v5370_v60  ;;  %4149 = vmatprep.subr.bf16.mxu1 %v5374_v1 }
 0x642   :  { %4119 = vmatpush1.bf16.msra.mxu0 %v5381_v4  ;;  %4151 = vmatpush1.bf16.msra.mxu1 %v5385_v6  ;;  %v1800_v6 = vld [vmem:[#allocation4] sm:$0xff] }
 0x643   :  { %4153 = vmatprep.subr.bf16.mxu0 %v4152_v34  ;;  %4185 = vmatprep.subr.bf16.mxu1 %v4184_v38  ;;  %v4154_v27 = vpack.c.bf16 %v1804_v37, %v1800_v6  ;;  %v4158_v34 = vpack.c.bf16 %v1812_v40, %v1808_v7  ;;  %v1816_v38 = vld [vmem:[#allocation4 + $0x80] sm:$0xff] }
 0x644   :  { %v1832_v37 = vld [vmem:[#allocation4 + $0x100] sm:$0xff] }
 0x645   :  { %v1840_v40 = vld [vmem:[#allocation4 + $0x140] sm:$0xff] }
 0x6f8   :  { %v1522_v42 = vpop.f32.mrb[12].mxu0  ;;  %v1593_v47 = vpop.f32.mrb[12].mxu1 }
 0x6f9   :  { %v4740_v50 = vadd.f32 %v1522_v42, %v5443_v14  ;;  %v1524_v54 = vpop.f32.mrb[13].mxu0  ;;  %v1595_v58 = vpop.f32.mrb[13].mxu1  ;;  %v4756_v8 = vadd.f32 %v1593_v47, %v5453_v26  ;;  %v1820_v42 = vld [vmem:[#allocation4 + $0xa0] sm:$0xff]  ;;  %v4160_v47 = vpack.c.bf16 %v1821_v22, %v1817_v53  ;;  %v1846_v53 = vld [vmem:[#allocation4 + $0x170] sm:$0xff]  ;;  %v1849_v22 = vld [vmem:[#allocation4 + $0x188] sm:$0xff] }
 0x6fa   :  { %v4741_v61 = vadd.f32 %v1524_v54, %v5448_v18  ;;  %v4757_v11 = vadd.f32 %v1595_v58, %v5460_v44  ;;  %v1818_v54 = vld [vmem:[#allocation4 + $0x90] sm:$0xff] }
 0x6fb   :  { %v1602_v2 = vmul.f32 0.5, %v4740_v50  ;;  %v4192_v50 = vpack.c.bf16 %v1823_v29, %v1819_v25  ;;  %v1822_v58 = vld [vmem:[#allocation4 + $0xb0] sm:$0xff]  ;;  %v1853_v25 = vld [vmem:[#allocation4 + $0x1a8] sm:$0xff]  ;;  %v1851_v29 = vld [vmem:[#allocation4 + $0x198] sm:$0xff] }
 0x6fc   :  { %v1606_v5 = vmul.f32 0.5, %v4741_v61  ;;  %v1611_v15 = vmul.f32 0.5, %v4757_v11  ;;  %v1825_v61 = vld [vmem:[#allocation4 + $0xc8] sm:$0xff]  ;;  %v4162_v11 = vpack.c.bf16 %v1820_v42, %v1816_v38  ;;  %v4206_v38 = vpack.c.bf16 %v1846_v53, %v1842_v32  ;;  %v1848_v42 = vld [vmem:[#allocation4 + $0x180] sm:$0xff]  ;;  %v2165_v32 = vld [vmem:[#allocation7 + $0x298] sm:$0xff] }
 0x6fd   :  { %4926 = vtanh.f32 %v1602_v2  ;;  %v1829_v2 = vld [vmem:[#allocation4 + $0xe8] sm:$0xff] }
 0x6fe   :  { %4928 = vtanh.f32 %v1606_v5  ;;  %v1827_v5 = vld [vmem:[#allocation4 + $0xd8] sm:$0xff] }
 0x6ff   :  { %4930 = vtanh.f32 %v4756_v8  ;;  %v1831_v8 = vld [vmem:[#allocation4 + $0xf8] sm:$0xff] }
 0x700   :  { %4932 = vtanh.f32 %v1611_v15  ;;  %v4194_v15 = vpack.c.bf16 %v1822_v58, %v1818_v54  ;;  %v1850_v58 = vld [vmem:[#allocation4 + $0x190] sm:$0xff] }
 0x707   :  { %v4927_v19 = vpop.eup %4926 }
 0x708   :  { %v4929_v24 = vpop.eup %4928  ;;  %v1604_v28 = vmul.f32 0.5, %v4927_v19  ;;  %v1824_v19 = vld [vmem:[#allocation4 + $0xc0] sm:$0xff] }
 0x709   :  { %v1608_v33 = vmul.f32 0.5, %v4929_v24  ;;  %v4931_v43 = vpop.eup %4930  ;;  %v1828_v24 = vld [vmem:[#allocation4 + $0xe0] sm:$0xff] }
 0x70a   :  { %v1605_v39 = vadd.f32 0.5, %v1604_v28  ;;  %v4933_v1 = vpop.eup %4932  ;;  %v4164_v28 = vpack.c.bf16 %v1829_v2, %v1825_v61  ;;  %v1854_v61 = vld [vmem:[#allocation4 + $0x1b0] sm:$0xff]  ;;  %v1857_v2 = vld [vmem:[#allocation4 + $0x1c8] sm:$0xff] }
 0x70b   :  { %v1609_v46 = vadd.f32 0.5, %v1608_v33  ;;  %v1613_v4 = vmul.f32 0.5, %v4933_v1  ;;  %v4196_v33 = vpack.c.bf16 %v1831_v8, %v1827_v5  ;;  %v1839_v1 = vld [vmem:[#allocation4 + $0x138] sm:$0xff]  ;;  %v1861_v5 = vld [vmem:[#allocation4 + $0x1e8] sm:$0xff] }
 0x70c   :  { %v1616_v52 = vmul.f32 %v4931_v43, %v1605_v39  ;;  %v1826_v39 = vld [vmem:[#allocation4 + $0xd0] sm:$0xff]  ;;  %v1859_v8 = vld [vmem:[#allocation4 + $0x1d8] sm:$0xff] }
 0x70d   :  { %v1615_v56 = vmul.f32 %v1609_v46, %v5693_v51  ;;  %v1614_v49 = vadd.f32 0.5, %v1613_v4  ;;  %v4156_v51 = vpack.c.bf16 %v1813_v17, %v1809_v20  ;;  %v1830_v43 = vld [vmem:[#allocation4 + $0xf0] sm:$0xff]  ;;  %v1833_v46 = vld [vmem:[#allocation4 + $0x108] sm:$0xff]  ;;  %v4166_v4 = vpack.c.bf16 %v1828_v24, %v1824_v19  ;;  %v1856_v24 = vld [vmem:[#allocation4 + $0x1c0] sm:$0xff] }
 0x70e   :  { %v4198_v6 = vpack.c.bf16 %v1830_v43, %v1826_v39  ;;  %v1834_v17 = vld [vmem:[#allocation4 + $0x110] sm:$0xff]  ;;  %v4210_v19 = vpack.c.bf16 %v1854_v61, %v1850_v58  ;;  %v1860_v39 = vld [vmem:[#allocation4 + $0x1e0] sm:$0xff]  ;;  %v2173_v58 = vld [vmem:[#allocation7 + $0x2d8] sm:$0xff] }
 0x70f   :  { %v5737_v60 = vadd.f32 %v1616_v52, %v1615_v56  ;;  %v1837_v52 = vld [vmem:[#allocation4 + $0x128] sm:$0xff]  ;;  %v1835_v56 = vld [vmem:[#allocation4 + $0x118] sm:$0xff]  ;;  %v4202_v7 = vpack.c.bf16 %v1838_v3, %v1834_v17  ;;  %v1858_v43 = vld [vmem:[#allocation4 + $0x1d0] sm:$0xff] }
 0x710   :  { %v4168_v12 = vpack.c.bf16 %v1837_v52, %v1833_v46  ;;  %v4200_v20 = vpack.c.bf16 %v1839_v1, %v1835_v56  ;;  %v1862_v46 = vld [vmem:[#allocation4 + $0x1f0] sm:$0xff]  ;;  %v4182_v52 = vpack.c.bf16 %v1860_v39, %v1856_v24  ;;  %v2146_v1 = vld [vmem:[#allocation7 + $0x200] sm:$0xff]  ;;  %v2157_v17 = vld [vmem:[#allocation7 + $0x258] sm:$0xff] }
 0x711   :  { %4934 = vtanh.f32 %v5737_v60  ;;  %v4214_v56 = vpack.c.bf16 %v1862_v46, %v1858_v43  ;;  %v2176_v24 = vld [vmem:[#allocation7 + $0x2f0] sm:$0xff]  ;;  %v2183_v39 = vld [vmem:[#allocation7 + $0x328] sm:$0xff]  ;;  %v2181_v43 = vld [vmem:[#allocation7 + $0x318] sm:$0xff] }
 0x71b   :  { %v4935_v36 = vpop.eup %4934 }
 0x71c   :  { %v5740_v31 = vmul.f32 %v4935_v36, %v1614_v49  ;;  %v1845_v49 = vld [vmem:[#allocation4 + $0x168] sm:$0xff]  ;;  %v1843_v36 = vld [vmem:[#allocation4 + $0x158] sm:$0xff] }
 0x71e   :  { %1690 = vmatmul.mubr.f32.vlgmr.msra.gmra.mrb[14].mxu0 %v5740_v31  ;;  %1761 = vmatmul.mubr.f32.vlgmr.msra.gmra.mrb[14].mxu1 %v5740_v31 }
 0x71f   :  { %4155 = vmatpush1.bf16.msra.mxu0 %v4154_v27  ;;  %4187 = vmatpush1.bf16.msra.mxu1 %v4186_v41  ;;  %v1847_v27 = vld [vmem:[#allocation4 + $0x178] sm:$0xff]  ;;  %v4170_v41 = vpack.c.bf16 %v1836_v59, %v1832_v37  ;;  %v2148_v37 = vld [vmem:[#allocation7 + $0x210] sm:$0xff] }
 0x720   :  { %4157 = vmatprep.subr.bf16.mxu0 %v4156_v51  ;;  %4189 = vmatprep.subr.bf16.mxu1 %v4188_v63  ;;  %v1844_v51 = vld [vmem:[#allocation4 + $0x160] sm:$0xff]  ;;  %v4172_v63 = vpack.c.bf16 %v1845_v49, %v1841_v21  ;;  %v4204_v55 = vpack.c.bf16 %v1847_v27, %v1843_v36  ;;  %v2152_v59 = vld [vmem:[#allocation7 + $0x230] sm:$0xff]  ;;  %v2161_v21 = vld [vmem:[#allocation7 + $0x278] sm:$0xff] }
 0x721   :  { %1951 = vmatprep.mubr.f32.mxu0 %v5148_v0  ;;  %2064 = vmatprep.mubr.f32.mxu1 %v5148_v0  ;;  %v2154_v49 = vld [vmem:[#allocation7 + $0x240] sm:$0xff]  ;;  %v5788_v27 = vpack.c.bf16 %v2161_v21, %v2157_v17 }
 0x722   :  { %v2158_v36 = vld [vmem:[#allocation7 + $0x260] sm:$0xff] }
 0x723   :  { %4159 = vmatpush1.bf16.msra.mxu0 %v4158_v34  ;;  %4191 = vmatpush1.bf16.msra.mxu1 %v4190_v35  ;;  %v1855_v34 = vld [vmem:[#allocation4 + $0x1b8] sm:$0xff]  ;;  %v4174_v35 = vpack.c.bf16 %v1844_v51, %v1840_v40  ;;  %v2160_v40 = vld [vmem:[#allocation7 + $0x270] sm:$0xff] }
 0x724   :  { %4161 = vmatprep.subr.bf16.mxu0 %v4160_v47  ;;  %4193 = vmatprep.subr.bf16.mxu1 %v4192_v50  ;;  %v1852_v47 = vld [vmem:[#allocation4 + $0x1a0] sm:$0xff]  ;;  %v4176_v50 = vpack.c.bf16 %v1853_v25, %v1849_v22  ;;  %v4208_v54 = vpack.c.bf16 %v1855_v34, %v1851_v29  ;;  %v2169_v22 = vld [vmem:[#allocation7 + $0x2b8] sm:$0xff] }
 0x725   :  { %v2162_v25 = vld [vmem:[#allocation7 + $0x280] sm:$0xff]  ;;  %v5800_v34 = vpack.c.bf16 %v2169_v22, %v2165_v32  ;;  %v2199_v32 = vld [vmem:[#allocation7 + $0x3a8] sm:$0xff] }
 0x726   :  { %v2166_v29 = vld [vmem:[#allocation7 + $0x2a0] sm:$0xff] }
 0x727   :  { %4163 = vmatpush1.bf16.msra.mxu0 %v4162_v11  ;;  %4195 = vmatpush1.bf16.msra.mxu1 %v4194_v15  ;;  %v1863_v11 = vld [vmem:[#allocation4 + $0x1f8] sm:$0xff]  ;;  %v4178_v15 = vpack.c.bf16 %v1852_v47, %v1848_v42  ;;  %v2168_v42 = vld [vmem:[#allocation7 + $0x2b0] sm:$0xff] }
 0x728   :  { %4165 = vmatprep.subr.bf16.mxu0 %v4164_v28  ;;  %4197 = vmatprep.subr.bf16.mxu1 %v4196_v33  ;;  %v4180_v28 = vpack.c.bf16 %v1861_v5, %v1857_v2  ;;  %v4212_v33 = vpack.c.bf16 %v1863_v11, %v1859_v8  ;;  %v2177_v2 = vld [vmem:[#allocation7 + $0x2f8] sm:$0xff]  ;;  %v2170_v5 = vld [vmem:[#allocation7 + $0x2c0] sm:$0xff] }
 0x729   :  { %v2174_v8 = vld [vmem:[#allocation7 + $0x2e0] sm:$0xff]  ;;  %v5812_v11 = vpack.c.bf16 %v2177_v2, %v2173_v58  ;;  %v2196_v58 = vld [vmem:[#allocation7 + $0x390] sm:$0xff] }
 0x72a   :  { %v2200_v2 = vld [vmem:[#allocation7 + $0x3b0] sm:$0xff] }
 0x72b   :  { %4167 = vmatpush1.bf16.msra.mxu0 %v4166_v4  ;;  %4199 = vmatpush1.bf16.msra.mxu1 %v4198_v6 }
 0x72c   :  { %4169 = vmatprep.subr.bf16.mxu0 %v4168_v12  ;;  %4201 = vmatprep.subr.bf16.mxu1 %v4200_v20  ;;  %v2155_v12 = vld [vmem:[#allocation7 + $0x248] sm:$0xff] }
 0x72d   :  { %v2159_v20 = vld [vmem:[#allocation7 + $0x268] sm:$0xff] }
 0x72e   :  { %v5786_v3 = vpack.c.bf16 %v2159_v20, %v2155_v12  ;;  %v2189_v12 = vld [vmem:[#allocation7 + $0x358] sm:$0xff] }
 0x72f   :  { %4171 = vmatpush1.bf16.msra.mxu0 %v4170_v41  ;;  %4203 = vmatpush1.bf16.msra.mxu1 %v4202_v7  ;;  %v5790_v41 = vpack.c.bf16 %v2158_v36, %v2154_v49  ;;  %v2156_v7 = vld [vmem:[#allocation7 + $0x250] sm:$0xff]  ;;  %v2193_v20 = vld [vmem:[#allocation7 + $0x378] sm:$0xff]  ;;  %v2186_v49 = vld [vmem:[#allocation7 + $0x340] sm:$0xff] }
 0x730   :  { %4173 = vmatprep.subr.bf16.mxu0 %v4172_v63  ;;  %4205 = vmatprep.subr.bf16.mxu1 %v4204_v55  ;;  %v5793_v51 = vpack.c.bf16 %v2160_v40, %v2156_v7  ;;  %v2163_v63 = vld [vmem:[#allocation7 + $0x288] sm:$0xff]  ;;  %v5835_v21 = vpack.c.bf16 %v2193_v20, %v2189_v12  ;;  %v2190_v36 = vld [vmem:[#allocation7 + $0x360] sm:$0xff]  ;;  %v2188_v7 = vld [vmem:[#allocation7 + $0x350] sm:$0xff] }
 0x731   :  { %v2167_v55 = vld [vmem:[#allocation7 + $0x2a8] sm:$0xff]  ;;  %v5838_v40 = vpack.c.bf16 %v2190_v36, %v2186_v49 }
 0x732   :  { %v5798_v53 = vpack.c.bf16 %v2167_v55, %v2163_v63  ;;  %v2192_v63 = vld [vmem:[#allocation7 + $0x370] sm:$0xff]  ;;  %v2195_v55 = vld [vmem:[#allocation7 + $0x388] sm:$0xff] }
 0x733   :  { %4175 = vmatpush1.bf16.msra.mxu0 %v4174_v35  ;;  %4207 = vmatpush1.bf16.msra.mxu1 %v4206_v38  ;;  %v5802_v35 = vpack.c.bf16 %v2166_v29, %v2162_v25  ;;  %v2164_v38 = vld [vmem:[#allocation7 + $0x290] sm:$0xff]  ;;  %v5842_v22 = vpack.c.bf16 %v2192_v63, %v2188_v7  ;;  %v5844_v25 = vpack.c.bf16 %v2199_v32, %v2195_v55  ;;  %v2197_v29 = vld [vmem:[#allocation7 + $0x398] sm:$0xff] }
 0x734   :  { %4177 = vmatprep.subr.bf16.mxu0 %v4176_v50  ;;  %4209 = vmatprep.subr.bf16.mxu1 %v4208_v54  ;;  %v5805_v47 = vpack.c.bf16 %v2168_v42, %v2164_v38  ;;  %v2171_v50 = vld [vmem:[#allocation7 + $0x2c8] sm:$0xff]  ;;  %v2201_v38 = vld [vmem:[#allocation7 + $0x3b8] sm:$0xff]  ;;  %v2194_v42 = vld [vmem:[#allocation7 + $0x380] sm:$0xff] }
 0x735   :  { %v2175_v54 = vld [vmem:[#allocation7 + $0x2e8] sm:$0xff] }
 0x736   :  { %v5810_v61 = vpack.c.bf16 %v2175_v54, %v2171_v50  ;;  %v5846_v50 = vpack.c.bf16 %v2201_v38, %v2197_v29  ;;  %v2198_v54 = vld [vmem:[#allocation7 + $0x3a0] sm:$0xff] }
 0x737   :  { %4179 = vmatpush1.bf16.msra.mxu0 %v4178_v15  ;;  %4211 = vmatpush1.bf16.msra.mxu1 %v4210_v19  ;;  %v5814_v15 = vpack.c.bf16 %v2174_v8, %v2170_v5  ;;  %v2172_v19 = vld [vmem:[#allocation7 + $0x2d0] sm:$0xff]  ;;  %v5849_v5 = vpack.c.bf16 %v2198_v54, %v2194_v42  ;;  %v5853_v8 = vpack.c.bf16 %v2200_v2, %v2196_v58 }
 0x738   :  { %4181 = vmatprep.subr.bf16.mxu0 %v4180_v28  ;;  %4213 = vmatprep.subr.bf16.mxu1 %v4212_v33  ;;  %v5817_v28 = vpack.c.bf16 %v2176_v24, %v2172_v19  ;;  %v2179_v33 = vld [vmem:[#allocation7 + $0x308] sm:$0xff] }
 0x739   :  { %v5822_v46 = vpack.c.bf16 %v2183_v39, %v2179_v33  ;;  %v2203_v19 = vld [vmem:[#allocation7 + $0x3c8] sm:$0xff]  ;;  %v2205_v33 = vld [vmem:[#allocation7 + $0x3d8] sm:$0xff] }
 0x73a   :  { %v2207_v24 = vld [vmem:[#allocation7 + $0x3e8] sm:$0xff] }
 0x73b   :  { %4183 = vmatpush1.bf16.msra.mxu0 %v4182_v52  ;;  %4215 = vmatpush1.bf16.msra.mxu1 %v4214_v56  ;;  %v2185_v52 = vld [vmem:[#allocation7 + $0x338] sm:$0xff]  ;;  %v2178_v56 = vld [vmem:[#allocation7 + $0x300] sm:$0xff]  ;;  %v5858_v39 = vpack.c.bf16 %v2207_v24, %v2203_v19 }
 0x73e   :  { %1952 = vmatmul.mubr.f32.vlgmr.msra.gmra.mrb[16].mxu0 %v5466_v30  ;;  %2065 = vmatmul.mubr.f32.vlgmr.msra.gmra.mrb[16].mxu1 %v5466_v30  ;;  %v2147_v30 = vld [vmem:[#allocation7 + $0x208] sm:$0xff] }
 0x73f   :  { %1957 = vmatprep.mubr.f32.mxu0 %v5148_v0  ;;  %2070 = vmatprep.mubr.f32.mxu1 %v5148_v0 }
 0x742   :  { %1958 = vmatmul.mubr.f32.gmra.mrb[18].mxu0 %v5512_v45  ;;  %2071 = vmatmul.mubr.f32.gmra.mrb[18].mxu1 %v5512_v45  ;;  %v2151_v45 = vld [vmem:[#allocation7 + $0x228] sm:$0xff] }
 0x743   :  { %1963 = vmatprep.mubr.f32.mxu0 %v5148_v0  ;;  %2076 = vmatprep.mubr.f32.mxu1 %v5148_v0 }
 0x746   :  { %1964 = vmatmul.mubr.f32.gmra.mrb[20].mxu0 %v5558_v57  ;;  %2077 = vmatmul.mubr.f32.gmra.mrb[20].mxu1 %v5558_v57  ;;  %v2149_v57 = vld [vmem:[#allocation7 + $0x218] sm:$0xff] }
 0x747   :  { %1969 = vmatprep.mubr.f32.mxu0 %v5148_v0  ;;  %2082 = vmatprep.mubr.f32.mxu1 %v5148_v0 }
 0x74a   :  { %1970 = vmatmul.mubr.f32.gmra.mrb[22].mxu0 %v5604_v23  ;;  %2083 = vmatmul.mubr.f32.gmra.mrb[22].mxu1 %v5604_v23  ;;  %v5774_v23 = vpack.c.bf16 %v2151_v45, %v2147_v30  ;;  %v2182_v30 = vld [vmem:[#allocation7 + $0x320] sm:$0xff]  ;;  %v5824_v45 = vpack.c.bf16 %v2185_v52, %v2181_v43  ;;  %v2209_v43 = vld [vmem:[#allocation7 + $0x3f8] sm:$0xff] }
 0x74b   :  { %1975 = vmatprep.mubr.f32.mxu0 %v5148_v0  ;;  %2088 = vmatprep.mubr.f32.mxu1 %v5148_v0  ;;  %v2202_v52 = vld [vmem:[#allocation7 + $0x3c0] sm:$0xff] }
 0x74c   :  { %4217 = vmatprep.subr.bf16.mxu0 %v5774_v23 }
 0x74e   :  { %1976 = vmatmul.mubr.f32.gmra.mrb[24].mxu0 %v5650_v48  ;;  %2089 = vmatmul.mubr.f32.gmra.mrb[24].mxu1 %v5650_v48  ;;  %v2153_v48 = vld [vmem:[#allocation7 + $0x238] sm:$0xff] }
 0x74f   :  { %1981 = vmatprep.mubr.f32.mxu0 %v5148_v0  ;;  %2094 = vmatprep.mubr.f32.mxu1 %v5148_v0  ;;  %v5776_v4 = vpack.c.bf16 %v2153_v48, %v2149_v57  ;;  %v5826_v57 = vpack.c.bf16 %v2182_v30, %v2178_v56  ;;  %v2180_v48 = vld [vmem:[#allocation7 + $0x310] sm:$0xff]  ;;  %v2206_v56 = vld [vmem:[#allocation7 + $0x3e0] sm:$0xff]  ;;  %v5860_v30 = vpack.c.bf16 %v2209_v43, %v2205_v33 }
 0x751   :  { %4249 = vmatprep.subr.bf16.mxu1 %v5776_v4 }
 0x752   :  { %1982 = vmatmul.mubr.f32.gmra.mrb[26].mxu0 %v5696_v62  ;;  %2095 = vmatmul.mubr.f32.gmra.mrb[26].mxu1 %v5696_v62  ;;  %v2150_v62 = vld [vmem:[#allocation7 + $0x220] sm:$0xff] }
 0x753   :  { %1987 = vmatprep.mubr.f32.mxu0 %v5148_v0  ;;  %2100 = vmatprep.mubr.f32.mxu1 %v5148_v0  ;;  %v5778_v6 = vpack.c.bf16 %v2150_v62, %v2146_v1  ;;  %v2184_v1 = vld [vmem:[#allocation7 + $0x330] sm:$0xff]  ;;  %v2187_v62 = vld [vmem:[#allocation7 + $0x348] sm:$0xff] }
 0x755   :  { %4219 = vmatpush1.bf16.msra.mxu0 %v5778_v6 }
 0x756   :  { %1988 = vmatmul.mubr.f32.gmra.mrb[28].mxu0 %v5740_v31  ;;  %2101 = vmatmul.mubr.f32.gmra.mrb[28].mxu1 %v5740_v31  ;;  %v5781_v31 = vpack.c.bf16 %v2152_v59, %v2148_v37  ;;  %v5829_v37 = vpack.c.bf16 %v2184_v1, %v2180_v48  ;;  %v2191_v59 = vld [vmem:[#allocation7 + $0x368] sm:$0xff]  ;;  %v5862_v48 = vpack.c.bf16 %v2206_v56, %v2202_v52  ;;  %v2204_v1 = vld [vmem:[#allocation7 + $0x3d0] sm:$0xff] }
 0x757   :  { %1993 = vmatprep.mubr.f32.mxu0 %v5148_v0  ;;  %2106 = vmatprep.mubr.f32.mxu1 %v5148_v0  ;;  %v5833_v17 = vpack.c.bf16 %v2191_v59, %v2187_v62  ;;  %v2208_v62 = vld [vmem:[#allocation7 + $0x3f0] sm:$0xff] }
 0x758   :  { %4251 = vmatpush1.bf16.msra.mxu1 %v5781_v31  ;;  %4221 = vmatprep.subr.bf16.mxu0 %v5786_v3  ;;  %v5865_v59 = vpack.c.bf16 %v2208_v62, %v2204_v1 }
 0x759   :  { %4253 = vmatprep.subr.bf16.mxu1 %v5788_v27  ;;  %4223 = vmatpush1.bf16.msra.mxu0 %v5790_v41 }
 0x75a   :  { %4225 = vmatprep.subr.bf16.mxu0 %v5798_v53 }
 0x75c   :  { %4255 = vmatpush1.bf16.msra.mxu1 %v5793_v51 }
 0x75d   :  { %4257 = vmatprep.subr.bf16.mxu1 %v5800_v34  ;;  %4227 = vmatpush1.bf16.msra.mxu0 %v5802_v35 }
 0x75e   :  { %4229 = vmatprep.subr.bf16.mxu0 %v5810_v61 }
 0x760   :  { %4259 = vmatpush1.bf16.msra.mxu1 %v5805_v47 }
 0x761   :  { %4261 = vmatprep.subr.bf16.mxu1 %v5812_v11  ;;  %4231 = vmatpush1.bf16.msra.mxu0 %v5814_v15 }
 0x762   :  { %4233 = vmatprep.subr.bf16.mxu0 %v5822_v46 }
 0x764   :  { %4263 = vmatpush1.bf16.msra.mxu1 %v5817_v28 }
 0x765   :  { %4265 = vmatprep.subr.bf16.mxu1 %v5824_v45  ;;  %4235 = vmatpush1.bf16.msra.mxu0 %v5826_v57 }
 0x766   :  { %4237 = vmatprep.subr.bf16.mxu0 %v5833_v17 }
 0x768   :  { %4267 = vmatpush1.bf16.msra.mxu1 %v5829_v37 }
 0x769   :  { %4269 = vmatprep.subr.bf16.mxu1 %v5835_v21  ;;  %4239 = vmatpush1.bf16.msra.mxu0 %v5838_v40 }
 0x76a   :  { %4241 = vmatprep.subr.bf16.mxu0 %v5844_v25 }
 0x76c   :  { %4271 = vmatpush1.bf16.msra.mxu1 %v5842_v22 }
 0x76d   :  { %4273 = vmatprep.subr.bf16.mxu1 %v5846_v50  ;;  %4243 = vmatpush1.bf16.msra.mxu0 %v5849_v5 }
 0x76e   :  { %4245 = vmatprep.subr.bf16.mxu0 %v5858_v39 }
 0x770   :  { %4275 = vmatpush1.bf16.msra.mxu1 %v5853_v8 }
 0x771   :  { %4277 = vmatprep.subr.bf16.mxu1 %v5860_v30  ;;  %4247 = vmatpush1.bf16.msra.mxu0 %v5862_v48 }
 0x772   :  { %4281 = vmatprep.subr.bf16.mxu0 %v5774_v23 }
 0x774   :  { %4279 = vmatpush1.bf16.msra.mxu1 %v5865_v59 }
 0x775   :  { %4313 = vmatprep.subr.bf16.mxu1 %v5776_v4 }
 0x7f1   :  { %v1691_v12 = vpop.f32.mrb[14].mxu0  ;;  %v1762_v20 = vpop.f32.mrb[14].mxu1 }
 0x7f2   :  { %v4742_v49 = vadd.f32 %v1691_v12, %v5443_v14  ;;  %v1693_v36 = vpop.f32.mrb[15].mxu0  ;;  %v1764_v7 = vpop.f32.mrb[15].mxu1  ;;  %v4758_v29 = vadd.f32 %v1762_v20, %v5453_v26 }
 0x7f3   :  { %v4743_v63 = vadd.f32 %v1693_v36, %v5448_v18  ;;  %v4759_v38 = vadd.f32 %v1764_v7, %v5460_v44 }
 0x7f4   :  { %v1771_v55 = vmul.f32 0.5, %v4742_v49 }
 0x7f5   :  { %v1775_v32 = vmul.f32 0.5, %v4743_v63  ;;  %v1780_v42 = vmul.f32 0.5, %v4759_v38 }
 0x7f6   :  { %4936 = vtanh.f32 %v1771_v55 }
 0x7f7   :  { %4938 = vtanh.f32 %v1775_v32 }
 0x7f8   :  { %4940 = vtanh.f32 %v4758_v29 }
 0x7f9   :  { %4942 = vtanh.f32 %v1780_v42 }
 0x800   :  { %v4937_v54 = vpop.eup %4936 }
 0x801   :  { %v4939_v58 = vpop.eup %4938  ;;  %v1773_v2 = vmul.f32 0.5, %v4937_v54 }
 0x802   :  { %v1777_v19 = vmul.f32 0.5, %v4939_v58  ;;  %v4941_v24 = vpop.eup %4940 }
 0x803   :  { %v1774_v14 = vadd.f32 0.5, %v1773_v2  ;;  %v4943_v26 = vpop.eup %4942 }
 0x804   :  { %v1778_v33 = vadd.f32 0.5, %v1777_v19  ;;  %v1782_v56 = vmul.f32 0.5, %v4943_v26 }
 0x805   :  { %v1785_v43 = vmul.f32 %v4941_v24, %v1774_v14 }
 0x806   :  { %v1784_v18 = vmul.f32 %v1778_v33, %v5737_v60  ;;  %v1783_v1 = vadd.f32 0.5, %v1782_v56  ;;  %v3631_v60 = vld [vmem:[%s6255_s4 + $0x4] sm:$0xf]  ;;  %s5149_s4 = smov [#allocation10]  }
 0x807   :  { %v5920_v12 = vrot.slane %v3631_v60, %v73_v10  ;;  %v5924_v20 = vrot.slane %v3631_v60, %v77_v13  ;;  %v5929_v63 = vrot.slane %v3631_v60, %v81_v16  ;;  %v6260_v13 = vsub.s32 3, %v5434_v9  ;;  %s3583_s11 = sshll.u32 %s5149_s4, 4  ;;  %s3584_s11 = int_to_ptr.vmem [resolvable:$true] %s3583_s11 }
 0x808   :  { %v1786_v52 = vadd.f32 %v1785_v43, %v1784_v18  ;;  %s5070_s16 = scalar_lea.vmem %s3584_s11, 256  ;;  %p5075_p3 = scmp.lt.s32.totalorder %s3584_s11, %s3584_s11 }
 0x809   :  { %v5935_v54 = vrot.slane %v3631_v60, %v6260_v13  ;;  %p5071_p2 = scmp.ne.s32.totalorder %s3584_s11, %s5070_s16  ;;  %p5076_p4 = scmp.lt.s32.totalorder %s5070_s16, %s5070_s16 }
 0x80a   :  { %4944 = vtanh.f32 %v1786_v52  ;;  %1791 = vst [vmem:[#allocation12] sm:$0xff] %v1786_v52 }
 0x80b   :  { %p5077_p5 = por %p5076_p4, %p5075_p3 }
 0x80d   :  { %p5078_p6 = pnand %p5077_p5, %p5071_p2 }
 0x814   :  { %v4945_v62 = vpop.eup %4944 }
 0x815   :  { %v1788_v44 = vmul.f32 %v4945_v62, %v1783_v1 }
 0x817   :  { %1994 = vmatmul.mubr.f32.gmra.mrb[30].mxu0 %v1788_v44  ;;  %1790 = vst [vmem:[#allocation10] sm:$0xff] %v1788_v44  ;;  %2107 = vmatmul.mubr.f32.gmra.mrb[30].mxu1 %v1788_v44 }
 0x818   :  { %2278 = vmatprep.mubr.f32.mxu0 %v5148_v0  ;;  %2349 = vmatprep.mubr.f32.mxu1 %v5148_v0 }
 0x81b   :  { %2279 = vmatmul.mubr.f32.vlgmr.msra.gmra.mrb[16].mxu0 %v5148_v0  ;;  %2350 = vmatmul.mubr.f32.vlgmr.msra.gmra.mrb[16].mxu1 %v5148_v0 }
 0x81c   :  { %4283 = vmatpush1.bf16.msra.mxu0 %v5778_v6  ;;  %4315 = vmatpush1.bf16.msra.mxu1 %v5781_v31 }
 0x81d   :  { %4285 = vmatprep.subr.bf16.mxu0 %v5786_v3  ;;  %4317 = vmatprep.subr.bf16.mxu1 %v5788_v27 }
 0x81e   :  { %2447 = vmatprep.mubr.f32.mxu0 %v5148_v0  ;;  %2518 = vmatprep.mubr.f32.mxu1 %v5148_v0 }
 0x820   :  { %4287 = vmatpush1.bf16.msra.mxu0 %v5790_v41  ;;  %4319 = vmatpush1.bf16.msra.mxu1 %v5793_v51 }
 0x821   :  { %4289 = vmatprep.subr.bf16.mxu0 %v5798_v53  ;;  %4321 = vmatprep.subr.bf16.mxu1 %v5800_v34 }
 0x824   :  { %4291 = vmatpush1.bf16.msra.mxu0 %v5802_v35  ;;  %4323 = vmatpush1.bf16.msra.mxu1 %v5805_v47 }
 0x825   :  { %4293 = vmatprep.subr.bf16.mxu0 %v5810_v61  ;;  %4325 = vmatprep.subr.bf16.mxu1 %v5812_v11 }
 0x828   :  { %4295 = vmatpush1.bf16.msra.mxu0 %v5814_v15  ;;  %4327 = vmatpush1.bf16.msra.mxu1 %v5817_v28 }
 0x829   :  { %4297 = vmatprep.subr.bf16.mxu0 %v5822_v46  ;;  %4329 = vmatprep.subr.bf16.mxu1 %v5824_v45 }
 0x82c   :  { %4299 = vmatpush1.bf16.msra.mxu0 %v5826_v57  ;;  %4331 = vmatpush1.bf16.msra.mxu1 %v5829_v37 }
 0x82d   :  { %4301 = vmatprep.subr.bf16.mxu0 %v5833_v17  ;;  %4333 = vmatprep.subr.bf16.mxu1 %v5835_v21 }
 0x830   :  { %4303 = vmatpush1.bf16.msra.mxu0 %v5838_v40  ;;  %4335 = vmatpush1.bf16.msra.mxu1 %v5842_v22 }
 0x831   :  { %4305 = vmatprep.subr.bf16.mxu0 %v5844_v25  ;;  %4337 = vmatprep.subr.bf16.mxu1 %v5846_v50 }
 0x834   :  { %4307 = vmatpush1.bf16.msra.mxu0 %v5849_v5  ;;  %4339 = vmatpush1.bf16.msra.mxu1 %v5853_v8 }
 0x835   :  { %4309 = vmatprep.subr.bf16.mxu0 %v5858_v39  ;;  %4341 = vmatprep.subr.bf16.mxu1 %v5860_v30 }
 0x838   :  { %4311 = vmatpush1.bf16.msra.mxu0 %v5862_v48  ;;  %4343 = vmatpush1.bf16.msra.mxu1 %v5865_v59 }
 0x839   :  { %4345 = vmatprep.subr.bf16.mxu0 %v5774_v23  ;;  %4377 = vmatprep.subr.bf16.mxu1 %v5776_v4 }
 0x8ee   :  { %v2280_v49 = vpop.f32.mrb[16].mxu0  ;;  %v2351_v36 = vpop.f32.mrb[16].mxu1 }
 0x8ef   :  { %v4760_v7 = vadd.f32 %v2280_v49, %v5920_v12  ;;  %v2282_v55 = vpop.f32.mrb[17].mxu0  ;;  %v2353_v32 = vpop.f32.mrb[17].mxu1  ;;  %v4776_v10 = vadd.f32 %v2351_v36, %v5929_v63 }
 0x8f0   :  { %v4761_v29 = vadd.f32 %v2282_v55, %v5924_v20  ;;  %v4777_v58 = vadd.f32 %v2353_v32, %v5935_v54 }
 0x8f1   :  { %v2360_v38 = vmul.f32 0.5, %v4760_v7 }
 0x8f2   :  { %v2364_v42 = vmul.f32 0.5, %v4761_v29  ;;  %v2369_v2 = vmul.f32 0.5, %v4777_v58 }
 0x8f3   :  { %4946 = vtanh.f32 %v2360_v38 }
 0x8f4   :  { %4948 = vtanh.f32 %v2364_v42 }
 0x8f5   :  { %4950 = vtanh.f32 %v4776_v10 }
 0x8f6   :  { %4952 = vtanh.f32 %v2369_v2 }
 0x8fd   :  { %v4947_v16 = vpop.eup %4946 }
 0x8fe   :  { %v4949_v19 = vpop.eup %4948  ;;  %v2362_v14 = vmul.f32 0.5, %v4947_v16 }
 0x8ff   :  { %v2366_v24 = vmul.f32 0.5, %v4949_v19  ;;  %v4951_v43 = vpop.eup %4950 }
 0x900   :  { %v2363_v33 = vadd.f32 0.5, %v2362_v14  ;;  %v4953_v9 = vpop.eup %4952 }
 0x901   :  { %v2367_v18 = vadd.f32 0.5, %v2366_v24  ;;  %v2371_v1 = vmul.f32 0.5, %v4953_v9 }
 0x902   :  { %v2374_v52 = vmul.f32 %v4951_v43, %v2363_v33 }
 0x903   :  { %v2373_v26 = vmul.f32 0.0, %v2367_v18  ;;  %v2372_v62 = vadd.f32 0.5, %v2371_v1 }
 0x905   :  { %v5938_v56 = vadd.f32 %v2374_v52, %v2373_v26 }
 0x907   :  { %4954 = vtanh.f32 %v5938_v56 }
 0x911   :  { %v4955_v44 = vpop.eup %4954 }
 0x912   :  { %v2377_v60 = vmul.f32 %v4955_v44, %v2372_v62 }
 0x914   :  { %2378 = vst [vmem:[#allocation9] sm:$0xff] %v2377_v60  ;;  %2448 = vmatmul.mubr.f32.vlgmr.msra.gmra.mrb[18].mxu0 %v2377_v60  ;;  %2519 = vmatmul.mubr.f32.vlgmr.msra.gmra.mrb[18].mxu1 %v2377_v60 }
 0x915   :  { %4347 = vmatpush1.bf16.msra.mxu0 %v5778_v6  ;;  %4379 = vmatpush1.bf16.msra.mxu1 %v5781_v31 }
 0x916   :  { %4349 = vmatprep.subr.bf16.mxu0 %v5786_v3  ;;  %4381 = vmatprep.subr.bf16.mxu1 %v5788_v27 }
 0x917   :  { %2616 = vmatprep.mubr.f32.mxu0 %v5148_v0  ;;  %2687 = vmatprep.mubr.f32.mxu1 %v5148_v0 }
 0x919   :  { %4351 = vmatpush1.bf16.msra.mxu0 %v5790_v41  ;;  %4383 = vmatpush1.bf16.msra.mxu1 %v5793_v51 }
 0x91a   :  { %4353 = vmatprep.subr.bf16.mxu0 %v5798_v53  ;;  %4385 = vmatprep.subr.bf16.mxu1 %v5800_v34 }
 0x91d   :  { %4355 = vmatpush1.bf16.msra.mxu0 %v5802_v35  ;;  %4387 = vmatpush1.bf16.msra.mxu1 %v5805_v47 }
 0x91e   :  { %4357 = vmatprep.subr.bf16.mxu0 %v5810_v61  ;;  %4389 = vmatprep.subr.bf16.mxu1 %v5812_v11 }
 0x921   :  { %4359 = vmatpush1.bf16.msra.mxu0 %v5814_v15  ;;  %4391 = vmatpush1.bf16.msra.mxu1 %v5817_v28 }
 0x922   :  { %4361 = vmatprep.subr.bf16.mxu0 %v5822_v46  ;;  %4393 = vmatprep.subr.bf16.mxu1 %v5824_v45 }
 0x925   :  { %4363 = vmatpush1.bf16.msra.mxu0 %v5826_v57  ;;  %4395 = vmatpush1.bf16.msra.mxu1 %v5829_v37 }
 0x926   :  { %4365 = vmatprep.subr.bf16.mxu0 %v5833_v17  ;;  %4397 = vmatprep.subr.bf16.mxu1 %v5835_v21 }
 0x929   :  { %4367 = vmatpush1.bf16.msra.mxu0 %v5838_v40  ;;  %4399 = vmatpush1.bf16.msra.mxu1 %v5842_v22 }
 0x92a   :  { %4369 = vmatprep.subr.bf16.mxu0 %v5844_v25  ;;  %4401 = vmatprep.subr.bf16.mxu1 %v5846_v50 }
 0x92d   :  { %4371 = vmatpush1.bf16.msra.mxu0 %v5849_v5  ;;  %4403 = vmatpush1.bf16.msra.mxu1 %v5853_v8 }
 0x92e   :  { %4373 = vmatprep.subr.bf16.mxu0 %v5858_v39  ;;  %4405 = vmatprep.subr.bf16.mxu1 %v5860_v30 }
 0x931   :  { %4375 = vmatpush1.bf16.msra.mxu0 %v5862_v48  ;;  %4407 = vmatpush1.bf16.msra.mxu1 %v5865_v59 }
 0x932   :  { %4409 = vmatprep.subr.bf16.mxu0 %v5774_v23  ;;  %4441 = vmatprep.subr.bf16.mxu1 %v5776_v4 }
 0x9e7   :  { %v2449_v49 = vpop.f32.mrb[18].mxu0  ;;  %v2520_v36 = vpop.f32.mrb[18].mxu1 }
 0x9e8   :  { %v4762_v7 = vadd.f32 %v2449_v49, %v5920_v12  ;;  %v2451_v55 = vpop.f32.mrb[19].mxu0  ;;  %v2522_v32 = vpop.f32.mrb[19].mxu1  ;;  %v4778_v10 = vadd.f32 %v2520_v36, %v5929_v63 }
 0x9e9   :  { %v4763_v29 = vadd.f32 %v2451_v55, %v5924_v20  ;;  %v4779_v13 = vadd.f32 %v2522_v32, %v5935_v54 }
 0x9ea   :  { %v2529_v38 = vmul.f32 0.5, %v4762_v7 }
 0x9eb   :  { %v2533_v42 = vmul.f32 0.5, %v4763_v29  ;;  %v2538_v58 = vmul.f32 0.5, %v4779_v13 }
 0x9ec   :  { %4956 = vtanh.f32 %v2529_v38 }
 0x9ed   :  { %4958 = vtanh.f32 %v2533_v42 }
 0x9ee   :  { %4960 = vtanh.f32 %v4778_v10 }
 0x9ef   :  { %4962 = vtanh.f32 %v2538_v58 }
 0x9f6   :  { %v4957_v2 = vpop.eup %4956 }
 0x9f7   :  { %v4959_v16 = vpop.eup %4958  ;;  %v2531_v19 = vmul.f32 0.5, %v4957_v2 }
 0x9f8   :  { %v2535_v14 = vmul.f32 0.5, %v4959_v16  ;;  %v4961_v33 = vpop.eup %4960 }
 0x9f9   :  { %v2532_v24 = vadd.f32 0.5, %v2531_v19  ;;  %v4963_v9 = vpop.eup %4962 }
 0x9fa   :  { %v2536_v43 = vadd.f32 0.5, %v2535_v14  ;;  %v2540_v1 = vmul.f32 0.5, %v4963_v9 }
 0x9fb   :  { %v2543_v18 = vmul.f32 %v4961_v33, %v2532_v24 }
 0x9fc   :  { %v2542_v52 = vmul.f32 %v2536_v43, %v5938_v56  ;;  %v2541_v62 = vadd.f32 0.5, %v2540_v1 }
 0x9fe   :  { %v5980_v26 = vadd.f32 %v2543_v18, %v2542_v52 }
 0xa00   :  { %4964 = vtanh.f32 %v5980_v26 }
 0xa0a   :  { %v4965_v44 = vpop.eup %4964 }
 0xa0b   :  { %v2546_v60 = vmul.f32 %v4965_v44, %v2541_v62 }
 0xa0d   :  { %2547 = vst [vmem:[#allocation9 + $0x8] sm:$0xff] %v2546_v60  ;;  %2617 = vmatmul.mubr.f32.vlgmr.msra.gmra.mrb[20].mxu0 %v2546_v60  ;;  %2688 = vmatmul.mubr.f32.vlgmr.msra.gmra.mrb[20].mxu1 %v2546_v60 }
 0xa0e   :  { %4411 = vmatpush1.bf16.msra.mxu0 %v5778_v6  ;;  %4443 = vmatpush1.bf16.msra.mxu1 %v5781_v31 }
 0xa0f   :  { %4413 = vmatprep.subr.bf16.mxu0 %v5786_v3  ;;  %4445 = vmatprep.subr.bf16.mxu1 %v5788_v27 }
 0xa10   :  { %2785 = vmatprep.mubr.f32.mxu0 %v5148_v0  ;;  %2856 = vmatprep.mubr.f32.mxu1 %v5148_v0 }
 0xa12   :  { %4415 = vmatpush1.bf16.msra.mxu0 %v5790_v41  ;;  %4447 = vmatpush1.bf16.msra.mxu1 %v5793_v51 }
 0xa13   :  { %4417 = vmatprep.subr.bf16.mxu0 %v5798_v53  ;;  %4449 = vmatprep.subr.bf16.mxu1 %v5800_v34 }
 0xa16   :  { %4419 = vmatpush1.bf16.msra.mxu0 %v5802_v35  ;;  %4451 = vmatpush1.bf16.msra.mxu1 %v5805_v47 }
 0xa17   :  { %4421 = vmatprep.subr.bf16.mxu0 %v5810_v61  ;;  %4453 = vmatprep.subr.bf16.mxu1 %v5812_v11 }
 0xa1a   :  { %4423 = vmatpush1.bf16.msra.mxu0 %v5814_v15  ;;  %4455 = vmatpush1.bf16.msra.mxu1 %v5817_v28 }
 0xa1b   :  { %4425 = vmatprep.subr.bf16.mxu0 %v5822_v46  ;;  %4457 = vmatprep.subr.bf16.mxu1 %v5824_v45 }
 0xa1e   :  { %4427 = vmatpush1.bf16.msra.mxu0 %v5826_v57  ;;  %4459 = vmatpush1.bf16.msra.mxu1 %v5829_v37 }
 0xa1f   :  { %4429 = vmatprep.subr.bf16.mxu0 %v5833_v17  ;;  %4461 = vmatprep.subr.bf16.mxu1 %v5835_v21 }
 0xa22   :  { %4431 = vmatpush1.bf16.msra.mxu0 %v5838_v40  ;;  %4463 = vmatpush1.bf16.msra.mxu1 %v5842_v22 }
 0xa23   :  { %4433 = vmatprep.subr.bf16.mxu0 %v5844_v25  ;;  %4465 = vmatprep.subr.bf16.mxu1 %v5846_v50 }
 0xa26   :  { %4435 = vmatpush1.bf16.msra.mxu0 %v5849_v5  ;;  %4467 = vmatpush1.bf16.msra.mxu1 %v5853_v8 }
 0xa27   :  { %4437 = vmatprep.subr.bf16.mxu0 %v5858_v39  ;;  %4469 = vmatprep.subr.bf16.mxu1 %v5860_v30 }
 0xa2a   :  { %4439 = vmatpush1.bf16.msra.mxu0 %v5862_v48  ;;  %4471 = vmatpush1.bf16.msra.mxu1 %v5865_v59 }
 0xa2b   :  { %4473 = vmatprep.subr.bf16.mxu0 %v5774_v23  ;;  %4505 = vmatprep.subr.bf16.mxu1 %v5776_v4 }
 0xae0   :  { %v2618_v56 = vpop.f32.mrb[20].mxu0  ;;  %v2689_v49 = vpop.f32.mrb[20].mxu1 }
 0xae1   :  { %v4764_v36 = vadd.f32 %v2618_v56, %v5920_v12  ;;  %v2620_v7 = vpop.f32.mrb[21].mxu0  ;;  %v2691_v55 = vpop.f32.mrb[21].mxu1  ;;  %v4780_v42 = vadd.f32 %v2689_v49, %v5929_v63 }
 0xae2   :  { %v4765_v32 = vadd.f32 %v2620_v7, %v5924_v20  ;;  %v4781_v10 = vadd.f32 %v2691_v55, %v5935_v54 }
 0xae3   :  { %v2698_v29 = vmul.f32 0.5, %v4764_v36 }
 0xae4   :  { %v2702_v38 = vmul.f32 0.5, %v4765_v32  ;;  %v2707_v13 = vmul.f32 0.5, %v4781_v10 }
 0xae5   :  { %4966 = vtanh.f32 %v2698_v29 }
 0xae6   :  { %4968 = vtanh.f32 %v2702_v38 }
 0xae7   :  { %4970 = vtanh.f32 %v4780_v42 }
 0xae8   :  { %4972 = vtanh.f32 %v2707_v13 }
 0xaef   :  { %v4967_v58 = vpop.eup %4966 }
 0xaf0   :  { %v4969_v2 = vpop.eup %4968  ;;  %v2700_v16 = vmul.f32 0.5, %v4967_v58 }
 0xaf1   :  { %v2704_v19 = vmul.f32 0.5, %v4969_v2  ;;  %v4971_v24 = vpop.eup %4970 }
 0xaf2   :  { %v2701_v14 = vadd.f32 0.5, %v2700_v16  ;;  %v4973_v9 = vpop.eup %4972 }
 0xaf3   :  { %v2705_v33 = vadd.f32 0.5, %v2704_v19  ;;  %v2709_v1 = vmul.f32 0.5, %v4973_v9 }
 0xaf4   :  { %v2712_v43 = vmul.f32 %v4971_v24, %v2701_v14 }
 0xaf5   :  { %v2711_v18 = vmul.f32 %v2705_v33, %v5980_v26  ;;  %v2710_v62 = vadd.f32 0.5, %v2709_v1 }
 0xaf7   :  { %v6022_v52 = vadd.f32 %v2712_v43, %v2711_v18 }
 0xaf9   :  { %4974 = vtanh.f32 %v6022_v52 }
 0xb03   :  { %v4975_v44 = vpop.eup %4974 }
 0xb04   :  { %v2715_v60 = vmul.f32 %v4975_v44, %v2710_v62 }
 0xb06   :  { %2716 = vst [vmem:[#allocation9 + $0x10] sm:$0xff] %v2715_v60  ;;  %2786 = vmatmul.mubr.f32.vlgmr.msra.gmra.mrb[22].mxu0 %v2715_v60  ;;  %2857 = vmatmul.mubr.f32.vlgmr.msra.gmra.mrb[22].mxu1 %v2715_v60 }
 0xb07   :  { %4475 = vmatpush1.bf16.msra.mxu0 %v5778_v6  ;;  %4507 = vmatpush1.bf16.msra.mxu1 %v5781_v31 }
 0xb08   :  { %4477 = vmatprep.subr.bf16.mxu0 %v5786_v3  ;;  %4509 = vmatprep.subr.bf16.mxu1 %v5788_v27 }
 0xb09   :  { %2954 = vmatprep.mubr.f32.mxu0 %v5148_v0  ;;  %3025 = vmatprep.mubr.f32.mxu1 %v5148_v0 }
 0xb0b   :  { %4479 = vmatpush1.bf16.msra.mxu0 %v5790_v41  ;;  %4511 = vmatpush1.bf16.msra.mxu1 %v5793_v51 }
 0xb0c   :  { %4481 = vmatprep.subr.bf16.mxu0 %v5798_v53  ;;  %4513 = vmatprep.subr.bf16.mxu1 %v5800_v34 }
 0xb0f   :  { %4483 = vmatpush1.bf16.msra.mxu0 %v5802_v35  ;;  %4515 = vmatpush1.bf16.msra.mxu1 %v5805_v47 }
 0xb10   :  { %4485 = vmatprep.subr.bf16.mxu0 %v5810_v61  ;;  %4517 = vmatprep.subr.bf16.mxu1 %v5812_v11 }
 0xb13   :  { %4487 = vmatpush1.bf16.msra.mxu0 %v5814_v15  ;;  %4519 = vmatpush1.bf16.msra.mxu1 %v5817_v28 }
 0xb14   :  { %4489 = vmatprep.subr.bf16.mxu0 %v5822_v46  ;;  %4521 = vmatprep.subr.bf16.mxu1 %v5824_v45 }
 0xb17   :  { %4491 = vmatpush1.bf16.msra.mxu0 %v5826_v57  ;;  %4523 = vmatpush1.bf16.msra.mxu1 %v5829_v37 }
 0xb18   :  { %4493 = vmatprep.subr.bf16.mxu0 %v5833_v17  ;;  %4525 = vmatprep.subr.bf16.mxu1 %v5835_v21 }
 0xb1b   :  { %4495 = vmatpush1.bf16.msra.mxu0 %v5838_v40  ;;  %4527 = vmatpush1.bf16.msra.mxu1 %v5842_v22 }
 0xb1c   :  { %4497 = vmatprep.subr.bf16.mxu0 %v5844_v25  ;;  %4529 = vmatprep.subr.bf16.mxu1 %v5846_v50 }
 0xb1f   :  { %4499 = vmatpush1.bf16.msra.mxu0 %v5849_v5  ;;  %4531 = vmatpush1.bf16.msra.mxu1 %v5853_v8 }
 0xb20   :  { %4501 = vmatprep.subr.bf16.mxu0 %v5858_v39  ;;  %4533 = vmatprep.subr.bf16.mxu1 %v5860_v30 }
 0xb23   :  { %4503 = vmatpush1.bf16.msra.mxu0 %v5862_v48  ;;  %4535 = vmatpush1.bf16.msra.mxu1 %v5865_v59 }
 0xb24   :  { %4537 = vmatprep.subr.bf16.mxu0 %v5774_v23  ;;  %4569 = vmatprep.subr.bf16.mxu1 %v5776_v4 }
 0xbd9   :  { %v2787_v26 = vpop.f32.mrb[22].mxu0  ;;  %v2858_v56 = vpop.f32.mrb[22].mxu1 }
 0xbda   :  { %v4766_v49 = vadd.f32 %v2787_v26, %v5920_v12  ;;  %v2789_v36 = vpop.f32.mrb[23].mxu0  ;;  %v2860_v7 = vpop.f32.mrb[23].mxu1  ;;  %v4782_v38 = vadd.f32 %v2858_v56, %v5929_v63 }
 0xbdb   :  { %v4767_v55 = vadd.f32 %v2789_v36, %v5924_v20  ;;  %v4783_v42 = vadd.f32 %v2860_v7, %v5935_v54 }
 0xbdc   :  { %v2867_v32 = vmul.f32 0.5, %v4766_v49 }
 0xbdd   :  { %v2871_v29 = vmul.f32 0.5, %v4767_v55  ;;  %v2876_v10 = vmul.f32 0.5, %v4783_v42 }
 0xbde   :  { %4976 = vtanh.f32 %v2867_v32 }
 0xbdf   :  { %4978 = vtanh.f32 %v2871_v29 }
 0xbe0   :  { %4980 = vtanh.f32 %v4782_v38 }
 0xbe1   :  { %4982 = vtanh.f32 %v2876_v10 }
 0xbe8   :  { %v4977_v13 = vpop.eup %4976 }
 0xbe9   :  { %v4979_v58 = vpop.eup %4978  ;;  %v2869_v2 = vmul.f32 0.5, %v4977_v13 }
 0xbea   :  { %v2873_v16 = vmul.f32 0.5, %v4979_v58  ;;  %v4981_v14 = vpop.eup %4980 }
 0xbeb   :  { %v2870_v19 = vadd.f32 0.5, %v2869_v2  ;;  %v4983_v9 = vpop.eup %4982 }
 0xbec   :  { %v2874_v24 = vadd.f32 0.5, %v2873_v16  ;;  %v2878_v1 = vmul.f32 0.5, %v4983_v9 }
 0xbed   :  { %v2881_v33 = vmul.f32 %v4981_v14, %v2870_v19 }
 0xbee   :  { %v2880_v43 = vmul.f32 %v2874_v24, %v6022_v52  ;;  %v2879_v62 = vadd.f32 0.5, %v2878_v1 }
 0xbf0   :  { %v6064_v18 = vadd.f32 %v2881_v33, %v2880_v43 }
 0xbf2   :  { %4984 = vtanh.f32 %v6064_v18 }
 0xbfc   :  { %v4985_v44 = vpop.eup %4984 }
 0xbfd   :  { %v2884_v60 = vmul.f32 %v4985_v44, %v2879_v62 }
 0xbff   :  { %2885 = vst [vmem:[#allocation9 + $0x18] sm:$0xff] %v2884_v60  ;;  %2955 = vmatmul.mubr.f32.vlgmr.msra.gmra.mrb[24].mxu0 %v2884_v60  ;;  %3026 = vmatmul.mubr.f32.vlgmr.msra.gmra.mrb[24].mxu1 %v2884_v60 }
 0xc00   :  { %4539 = vmatpush1.bf16.msra.mxu0 %v5778_v6  ;;  %4571 = vmatpush1.bf16.msra.mxu1 %v5781_v31 }
 0xc01   :  { %4541 = vmatprep.subr.bf16.mxu0 %v5786_v3  ;;  %4573 = vmatprep.subr.bf16.mxu1 %v5788_v27 }
 0xc02   :  { %3123 = vmatprep.mubr.f32.mxu0 %v5148_v0  ;;  %3194 = vmatprep.mubr.f32.mxu1 %v5148_v0 }
 0xc04   :  { %4543 = vmatpush1.bf16.msra.mxu0 %v5790_v41  ;;  %4575 = vmatpush1.bf16.msra.mxu1 %v5793_v51 }
 0xc05   :  { %4545 = vmatprep.subr.bf16.mxu0 %v5798_v53  ;;  %4577 = vmatprep.subr.bf16.mxu1 %v5800_v34 }
 0xc08   :  { %4547 = vmatpush1.bf16.msra.mxu0 %v5802_v35  ;;  %4579 = vmatpush1.bf16.msra.mxu1 %v5805_v47 }
 0xc09   :  { %4549 = vmatprep.subr.bf16.mxu0 %v5810_v61  ;;  %4581 = vmatprep.subr.bf16.mxu1 %v5812_v11 }
 0xc0c   :  { %4551 = vmatpush1.bf16.msra.mxu0 %v5814_v15  ;;  %4583 = vmatpush1.bf16.msra.mxu1 %v5817_v28 }
 0xc0d   :  { %4553 = vmatprep.subr.bf16.mxu0 %v5822_v46  ;;  %4585 = vmatprep.subr.bf16.mxu1 %v5824_v45 }
 0xc10   :  { %4555 = vmatpush1.bf16.msra.mxu0 %v5826_v57  ;;  %4587 = vmatpush1.bf16.msra.mxu1 %v5829_v37 }
 0xc11   :  { %4557 = vmatprep.subr.bf16.mxu0 %v5833_v17  ;;  %4589 = vmatprep.subr.bf16.mxu1 %v5835_v21 }
 0xc14   :  { %4559 = vmatpush1.bf16.msra.mxu0 %v5838_v40  ;;  %4591 = vmatpush1.bf16.msra.mxu1 %v5842_v22 }
 0xc15   :  { %4561 = vmatprep.subr.bf16.mxu0 %v5844_v25  ;;  %4593 = vmatprep.subr.bf16.mxu1 %v5846_v50 }
 0xc18   :  { %4563 = vmatpush1.bf16.msra.mxu0 %v5849_v5  ;;  %4595 = vmatpush1.bf16.msra.mxu1 %v5853_v8 }
 0xc19   :  { %4565 = vmatprep.subr.bf16.mxu0 %v5858_v39  ;;  %4597 = vmatprep.subr.bf16.mxu1 %v5860_v30 }
 0xc1c   :  { %4567 = vmatpush1.bf16.msra.mxu0 %v5862_v48  ;;  %4599 = vmatpush1.bf16.msra.mxu1 %v5865_v59 }
 0xc1d   :  { %4601 = vmatprep.subr.bf16.mxu0 %v5774_v23  ;;  %4633 = vmatprep.subr.bf16.mxu1 %v5776_v4 }
 0xcd2   :  { %v2956_v52 = vpop.f32.mrb[24].mxu0  ;;  %v3027_v26 = vpop.f32.mrb[24].mxu1 }
 0xcd3   :  { %v4768_v56 = vadd.f32 %v2956_v52, %v5920_v12  ;;  %v2958_v49 = vpop.f32.mrb[25].mxu0  ;;  %v3029_v36 = vpop.f32.mrb[25].mxu1  ;;  %v4784_v29 = vadd.f32 %v3027_v26, %v5929_v63 }
 0xcd4   :  { %v4769_v7 = vadd.f32 %v2958_v49, %v5924_v20  ;;  %v4785_v38 = vadd.f32 %v3029_v36, %v5935_v54 }
 0xcd5   :  { %v3036_v55 = vmul.f32 0.5, %v4768_v56 }
 0xcd6   :  { %v3040_v32 = vmul.f32 0.5, %v4769_v7  ;;  %v3045_v42 = vmul.f32 0.5, %v4785_v38 }
 0xcd7   :  { %4986 = vtanh.f32 %v3036_v55 }
 0xcd8   :  { %4988 = vtanh.f32 %v3040_v32 }
 0xcd9   :  { %4990 = vtanh.f32 %v4784_v29 }
 0xcda   :  { %4992 = vtanh.f32 %v3045_v42 }
 0xce1   :  { %v4987_v10 = vpop.eup %4986 }
 0xce2   :  { %v4989_v13 = vpop.eup %4988  ;;  %v3038_v58 = vmul.f32 0.5, %v4987_v10 }
 0xce3   :  { %v3042_v2 = vmul.f32 0.5, %v4989_v13  ;;  %v4991_v19 = vpop.eup %4990 }
 0xce4   :  { %v3039_v16 = vadd.f32 0.5, %v3038_v58  ;;  %v4993_v9 = vpop.eup %4992 }
 0xce5   :  { %v3043_v14 = vadd.f32 0.5, %v3042_v2  ;;  %v3047_v1 = vmul.f32 0.5, %v4993_v9 }
 0xce6   :  { %v3050_v24 = vmul.f32 %v4991_v19, %v3039_v16 }
 0xce7   :  { %v3049_v33 = vmul.f32 %v3043_v14, %v6064_v18  ;;  %v3048_v62 = vadd.f32 0.5, %v3047_v1 }
 0xce9   :  { %v6106_v43 = vadd.f32 %v3050_v24, %v3049_v33 }
 0xceb   :  { %4994 = vtanh.f32 %v6106_v43 }
 0xcf5   :  { %v4995_v44 = vpop.eup %4994 }
 0xcf6   :  { %v3053_v60 = vmul.f32 %v4995_v44, %v3048_v62 }
 0xcf8   :  { %3054 = vst [vmem:[#allocation9 + $0x20] sm:$0xff] %v3053_v60  ;;  %3124 = vmatmul.mubr.f32.vlgmr.msra.gmra.mrb[26].mxu0 %v3053_v60  ;;  %3195 = vmatmul.mubr.f32.vlgmr.msra.gmra.mrb[26].mxu1 %v3053_v60 }
 0xcf9   :  { %4603 = vmatpush1.bf16.msra.mxu0 %v5778_v6  ;;  %4635 = vmatpush1.bf16.msra.mxu1 %v5781_v31 }
 0xcfa   :  { %4605 = vmatprep.subr.bf16.mxu0 %v5786_v3  ;;  %4637 = vmatprep.subr.bf16.mxu1 %v5788_v27 }
 0xcfb   :  { %3292 = vmatprep.mubr.f32.mxu0 %v5148_v0  ;;  %3363 = vmatprep.mubr.f32.mxu1 %v5148_v0 }
 0xcfd   :  { %4607 = vmatpush1.bf16.msra.mxu0 %v5790_v41  ;;  %4639 = vmatpush1.bf16.msra.mxu1 %v5793_v51 }
 0xcfe   :  { %4609 = vmatprep.subr.bf16.mxu0 %v5798_v53  ;;  %4641 = vmatprep.subr.bf16.mxu1 %v5800_v34 }
 0xd01   :  { %4611 = vmatpush1.bf16.msra.mxu0 %v5802_v35  ;;  %4643 = vmatpush1.bf16.msra.mxu1 %v5805_v47 }
 0xd02   :  { %4613 = vmatprep.subr.bf16.mxu0 %v5810_v61  ;;  %4645 = vmatprep.subr.bf16.mxu1 %v5812_v11 }
 0xd05   :  { %4615 = vmatpush1.bf16.msra.mxu0 %v5814_v15  ;;  %4647 = vmatpush1.bf16.msra.mxu1 %v5817_v28 }
 0xd06   :  { %4617 = vmatprep.subr.bf16.mxu0 %v5822_v46  ;;  %4649 = vmatprep.subr.bf16.mxu1 %v5824_v45 }
 0xd09   :  { %4619 = vmatpush1.bf16.msra.mxu0 %v5826_v57  ;;  %4651 = vmatpush1.bf16.msra.mxu1 %v5829_v37 }
 0xd0a   :  { %4621 = vmatprep.subr.bf16.mxu0 %v5833_v17  ;;  %4653 = vmatprep.subr.bf16.mxu1 %v5835_v21 }
 0xd0d   :  { %4623 = vmatpush1.bf16.msra.mxu0 %v5838_v40  ;;  %4655 = vmatpush1.bf16.msra.mxu1 %v5842_v22 }
 0xd0e   :  { %4625 = vmatprep.subr.bf16.mxu0 %v5844_v25  ;;  %4657 = vmatprep.subr.bf16.mxu1 %v5846_v50 }
 0xd11   :  { %4627 = vmatpush1.bf16.msra.mxu0 %v5849_v5  ;;  %4659 = vmatpush1.bf16.msra.mxu1 %v5853_v8 }
 0xd12   :  { %4629 = vmatprep.subr.bf16.mxu0 %v5858_v39  ;;  %4661 = vmatprep.subr.bf16.mxu1 %v5860_v30 }
 0xd15   :  { %4631 = vmatpush1.bf16.msra.mxu0 %v5862_v48  ;;  %4663 = vmatpush1.bf16.msra.mxu1 %v5865_v59 }
 0xd16   :  { %4665 = vmatprep.subr.bf16.mxu0 %v5774_v23  ;;  %4697 = vmatprep.subr.bf16.mxu1 %v5776_v4 }
 0xdcb   :  { %v3125_v18 = vpop.f32.mrb[26].mxu0  ;;  %v3196_v52 = vpop.f32.mrb[26].mxu1 }
 0xdcc   :  { %v4770_v26 = vadd.f32 %v3125_v18, %v5920_v12  ;;  %v3127_v56 = vpop.f32.mrb[27].mxu0  ;;  %v3198_v49 = vpop.f32.mrb[27].mxu1  ;;  %v4786_v32 = vadd.f32 %v3196_v52, %v5929_v63 }
 0xdcd   :  { %v4771_v36 = vadd.f32 %v3127_v56, %v5924_v20  ;;  %v4787_v29 = vadd.f32 %v3198_v49, %v5935_v54 }
 0xdce   :  { %v3205_v7 = vmul.f32 0.5, %v4770_v26 }
 0xdcf   :  { %v3209_v55 = vmul.f32 0.5, %v4771_v36  ;;  %v3214_v23 = vmul.f32 0.5, %v4787_v29 }
 0xdd0   :  { %4996 = vtanh.f32 %v3205_v7 }
 0xdd1   :  { %4998 = vtanh.f32 %v3209_v55 }
 0xdd2   :  { %5000 = vtanh.f32 %v4786_v32 }
 0xdd3   :  { %5002 = vtanh.f32 %v3214_v23 }
 0xdda   :  { %v4997_v38 = vpop.eup %4996 }
 0xddb   :  { %v4999_v4 = vpop.eup %4998  ;;  %v3207_v42 = vmul.f32 0.5, %v4997_v38 }
 0xddc   :  { %v3211_v10 = vmul.f32 0.5, %v4999_v4  ;;  %v5001_v58 = vpop.eup %5000 }
 0xddd   :  { %v3208_v13 = vadd.f32 0.5, %v3207_v42  ;;  %v5003_v24 = vpop.eup %5002 }
 0xdde   :  { %v3212_v2 = vadd.f32 0.5, %v3211_v10  ;;  %v3216_v33 = vmul.f32 0.5, %v5003_v24 }
 0xddf   :  { %v3219_v16 = vmul.f32 %v5001_v58, %v3208_v13 }
 0xde0   :  { %v3218_v19 = vmul.f32 %v3212_v2, %v6106_v43  ;;  %v3217_v9 = vadd.f32 0.5, %v3216_v33 }
 0xde2   :  { %v6148_v14 = vadd.f32 %v3219_v16, %v3218_v19 }
 0xde4   :  { %5004 = vtanh.f32 %v6148_v14 }
 0xdee   :  { %v5005_v1 = vpop.eup %5004 }
 0xdef   :  { %v3222_v62 = vmul.f32 %v5005_v1, %v3217_v9 }
 0xdf1   :  { %3223 = vst [vmem:[#allocation9 + $0x28] sm:$0xff] %v3222_v62  ;;  %3293 = vmatmul.mubr.f32.vlgmr.msra.gmra.mrb[28].mxu0 %v3222_v62  ;;  %3364 = vmatmul.mubr.f32.vlgmr.msra.gmra.mrb[28].mxu1 %v3222_v62 }
 0xdf2   :  { %4667 = vmatpush1.bf16.msra.mxu0 %v5778_v6  ;;  %4699 = vmatpush1.bf16.msra.mxu1 %v5781_v31 }
 0xdf3   :  { %4669 = vmatprep.subr.bf16.mxu0 %v5786_v3  ;;  %4701 = vmatprep.subr.bf16.mxu1 %v5788_v27 }
 0xdf4   :  { %3461 = vmatprep.mubr.f32.mxu0 %v5148_v0  ;;  %3532 = vmatprep.mubr.f32.mxu1 %v5148_v0 }
 0xdf6   :  { %4671 = vmatpush1.bf16.msra.mxu0 %v5790_v41  ;;  %4703 = vmatpush1.bf16.msra.mxu1 %v5793_v51 }
 0xdf7   :  { %4673 = vmatprep.subr.bf16.mxu0 %v5798_v53  ;;  %4705 = vmatprep.subr.bf16.mxu1 %v5800_v34 }
 0xdfa   :  { %4675 = vmatpush1.bf16.msra.mxu0 %v5802_v35  ;;  %4707 = vmatpush1.bf16.msra.mxu1 %v5805_v47 }
 0xdfb   :  { %4677 = vmatprep.subr.bf16.mxu0 %v5810_v61  ;;  %4709 = vmatprep.subr.bf16.mxu1 %v5812_v11 }
 0xdfe   :  { %4679 = vmatpush1.bf16.msra.mxu0 %v5814_v15  ;;  %4711 = vmatpush1.bf16.msra.mxu1 %v5817_v28 }
 0xdff   :  { %4681 = vmatprep.subr.bf16.mxu0 %v5822_v46  ;;  %4713 = vmatprep.subr.bf16.mxu1 %v5824_v45 }
 0xe02   :  { %4683 = vmatpush1.bf16.msra.mxu0 %v5826_v57  ;;  %4715 = vmatpush1.bf16.msra.mxu1 %v5829_v37 }
 0xe03   :  { %4685 = vmatprep.subr.bf16.mxu0 %v5833_v17  ;;  %4717 = vmatprep.subr.bf16.mxu1 %v5835_v21 }
 0xe06   :  { %4687 = vmatpush1.bf16.msra.mxu0 %v5838_v40  ;;  %4719 = vmatpush1.bf16.msra.mxu1 %v5842_v22 }
 0xe07   :  { %4689 = vmatprep.subr.bf16.mxu0 %v5844_v25  ;;  %4721 = vmatprep.subr.bf16.mxu1 %v5846_v50 }
 0xe0a   :  { %4691 = vmatpush1.bf16.msra.mxu0 %v5849_v5  ;;  %4723 = vmatpush1.bf16.msra.mxu1 %v5853_v8 }
 0xe0b   :  { %4693 = vmatprep.subr.bf16.mxu0 %v5858_v39  ;;  %4725 = vmatprep.subr.bf16.mxu1 %v5860_v30 }
 0xe0e   :  { %4695 = vmatpush1.bf16.msra.mxu0 %v5862_v48  ;;  %4727 = vmatpush1.bf16.msra.mxu1 %v5865_v59 }
 0xec4   :  { %v3294_v0 = vpop.f32.mrb[28].mxu0  ;;  %v3365_v6 = vpop.f32.mrb[28].mxu1 }
 0xec5   :  { %v4772_v31 = vadd.f32 %v3294_v0, %v5920_v12  ;;  %v3296_v3 = vpop.f32.mrb[29].mxu0  ;;  %v3367_v27 = vpop.f32.mrb[29].mxu1  ;;  %v4788_v34 = vadd.f32 %v3365_v6, %v5929_v63 }
 0xec6   :  { %v4773_v41 = vadd.f32 %v3296_v3, %v5924_v20  ;;  %v4789_v35 = vadd.f32 %v3367_v27, %v5935_v54 }
 0xec7   :  { %v3374_v51 = vmul.f32 0.5, %v4772_v31 }
 0xec8   :  { %v3378_v53 = vmul.f32 0.5, %v4773_v41  ;;  %v3383_v47 = vmul.f32 0.5, %v4789_v35 }
 0xec9   :  { %5006 = vtanh.f32 %v3374_v51 }
 0xeca   :  { %5008 = vtanh.f32 %v3378_v53 }
 0xecb   :  { %5010 = vtanh.f32 %v4788_v34 }
 0xecc   :  { %5012 = vtanh.f32 %v3383_v47 }
 0xed3   :  { %v5007_v61 = vpop.eup %5006 }
 0xed4   :  { %v5009_v11 = vpop.eup %5008  ;;  %v3376_v15 = vmul.f32 0.5, %v5007_v61 }
 0xed5   :  { %v3380_v28 = vmul.f32 0.5, %v5009_v11  ;;  %v5011_v45 = vpop.eup %5010 }
 0xed6   :  { %v3377_v46 = vadd.f32 0.5, %v3376_v15  ;;  %v5013_v40 = vpop.eup %5012 }
 0xed7   :  { %v3381_v57 = vadd.f32 0.5, %v3380_v28  ;;  %v3385_v22 = vmul.f32 0.5, %v5013_v40 }
 0xed8   :  { %v3388_v37 = vmul.f32 %v5011_v45, %v3377_v46 }
 0xed9   :  { %v3387_v17 = vmul.f32 %v3381_v57, %v6148_v14  ;;  %v3386_v25 = vadd.f32 0.5, %v3385_v22 }
 0xedb   :  { %v3389_v21 = vadd.f32 %v3388_v37, %v3387_v17 }
 0xedd   :  { %5014 = vtanh.f32 %v3389_v21 }
 0xee7   :  { %v5015_v50 = vpop.eup %5014 }
 0xee8   :  { %v3391_v5 = vmul.f32 %v5015_v50, %v3386_v25 }
 0xeea   :  { %3392 = vst [vmem:[#allocation9 + $0x30] sm:$0xff] %v3391_v5  ;;  %3462 = vmatmul.mubr.f32.vlgmr.msra.gmra.mrb[30].mxu0 %v3391_v5  ;;  %3533 = vmatmul.mubr.f32.vlgmr.msra.gmra.mrb[30].mxu1 %v3391_v5 }
 0xfbd   :  { %v3463_v8 = vpop.f32.mrb[30].mxu0  ;;  %v3534_v39 = vpop.f32.mrb[30].mxu1 }
 0xfbe   :  { %v4774_v30 = vadd.f32 %v3463_v8, %v5920_v12  ;;  %v3465_v48 = vpop.f32.mrb[31].mxu0  ;;  %v3536_v59 = vpop.f32.mrb[31].mxu1  ;;  %v4790_v18 = vadd.f32 %v3534_v39, %v5929_v63 }
 0xfbf   :  { %v4775_v43 = vadd.f32 %v3465_v48, %v5924_v20  ;;  %v4791_v52 = vadd.f32 %v3536_v59, %v5935_v54 }
 0xfc0   :  { %v3543_v44 = vmul.f32 0.5, %v4774_v30 }
 0xfc1   :  { %v3547_v60 = vmul.f32 0.5, %v4775_v43  ;;  %v3552_v26 = vmul.f32 0.5, %v4791_v52 }
 0xfc2   :  { %5016 = vtanh.f32 %v3543_v44 }
 0xfc3   :  { %5018 = vtanh.f32 %v3547_v60 }
 0xfc4   :  { %5020 = vtanh.f32 %v4790_v18 }
 0xfc5   :  { %5022 = vtanh.f32 %v3552_v26 }
 0xfcc   :  { %v5017_v56 = vpop.eup %5016 }
 0xfcd   :  { %v5019_v49 = vpop.eup %5018  ;;  %v3545_v36 = vmul.f32 0.5, %v5017_v56 }
 0xfce   :  { %v3549_v7 = vmul.f32 0.5, %v5019_v49  ;;  %v5021_v55 = vpop.eup %5020 }
 0xfcf   :  { %v3546_v12 = vadd.f32 0.5, %v3545_v36  ;;  %v5023_v38 = vpop.eup %5022 }
 0xfd0   :  { %v3550_v32 = vadd.f32 0.5, %v3549_v7  ;;  %v3554_v63 = vmul.f32 0.5, %v5023_v38 }
 0xfd1   :  { %v3557_v29 = vmul.f32 %v5021_v55, %v3546_v12 }
 0xfd2   :  { %v3556_v20 = vmul.f32 %v3550_v32, %v3389_v21  ;;  %v3555_v4 = vadd.f32 0.5, %v3554_v63 }
 0xfd4   :  { %v3558_v23 = vadd.f32 %v3557_v29, %v3556_v20 }
 0xfd6   :  { %5024 = vtanh.f32 %v3558_v23  ;;  %3565 = vst [vmem:[#allocation12 + $0x8] sm:$0xff] %v3558_v23 }
 0xfe0   :  { %v5025_v54 = vpop.eup %5024 }
 0xfe1   :  { %v3560_v42 = vmul.f32 %v5025_v54, %v3555_v4 }
 0xfe3   :  { %3561 = vst [vmem:[#allocation9 + $0x38] sm:$0xff] %v3560_v42  ;;  %3563 = vst [vmem:[#allocation10 + $0x8] sm:$0xff] %v3560_v42 }
 0xfe4   :  { %5081 = shalt.err (!%p5078_p6)
}
 0xfe5   :  { %s5082_s19 = scalar_lea.hbm %s6257_s6, 256 }
 0xfe6   :  { %p5083_p7 = scmp.ne.s32.totalorder %s6257_s6, %s5082_s19  ;;  %p5086_p8 = scmp.lt.u32.totalorder %s5082_s19, %s6257_s6 }
 0xfe8   :  { %p5088_p9 = pnand %p5086_p8, %p5083_p7 }
 0xfea   :  { %5091 = shalt.err (!%p5088_p9)
}
 0xfeb   :  { %s5152_s23 = smov 128   ;;  %s5153_s24 = smov 8  }
 0xfec   :  { %3589 = dma.vmem_to_hbm [thread:$0]  %s3584_s11, 256, %s6257_s6, [#allocation11], %s5152_s23, %s5152_s23, %s5153_s24  }
 0xfed   :  { %s5092_s26 = scalar_lea.vmem %s6192_s13, 1024  ;;  %p5097_p11 = scmp.lt.s32.totalorder %s6192_s13, %s6192_s13 }
 0xfee   :  { %p5093_p10 = scmp.ne.s32.totalorder %s6192_s13, %s5092_s26  ;;  %p5098_p12 = scmp.lt.s32.totalorder %s5092_s26, %s5092_s26 }
 0xff0   :  { %p5099_p13 = por %p5098_p12, %p5097_p11 }
 0xff2   :  { %p5100_p0 = pnand %p5099_p13, %p5093_p10 }
 0xff4   :  { %5103 = shalt.err (!%p5100_p0)
}
 0xff5   :  { %s5104_s29 = scalar_lea.hbm %s6256_s5, 1024 }
 0xff6   :  { %p5105_p1 = scmp.ne.s32.totalorder %s6256_s5, %s5104_s29  ;;  %p5108_p2 = scmp.lt.u32.totalorder %s5104_s29, %s6256_s5 }
 0xff8   :  { %p5110_p3 = pnand %p5108_p2, %p5105_p1 }
 0xffa   :  { %5113 = shalt.err (!%p5110_p3)
}
 0xffb   :  { %3577 = dma.vmem_to_hbm [thread:$0]  %s6192_s13, 1024, %s6256_s5, [#allocation6], %s5152_s23, %s5152_s23, %s5153_s24  }
 0xffc   :  { %s5114_s10 = scalar_lea.vmem %s6194_s15, 256  ;;  %p5119_p5 = scmp.lt.s32.totalorder %s6194_s15, %s6194_s15 }
 0xffd   :  { %p5115_p4 = scmp.ne.s32.totalorder %s6194_s15, %s5114_s10  ;;  %p5120_p6 = scmp.lt.s32.totalorder %s5114_s10, %s5114_s10 }
 0xfff   :  { %p5121_p7 = por %p5120_p6, %p5119_p5 }
0x1001   :  { %p5122_p8 = pnand %p5121_p7, %p5115_p4 }
0x1003   :  { %5125 = shalt.err (!%p5122_p8)
}
0x1004   :  { %s5126_s12 = scalar_lea.hbm %s6258_s7, 256 }
0x1005   :  { %p5127_p9 = scmp.ne.s32.totalorder %s6258_s7, %s5126_s12  ;;  %p5130_p10 = scmp.lt.u32.totalorder %s5126_s12, %s6258_s7 }
0x1007   :  { %p5132_p11 = pnand %p5130_p10, %p5127_p9 }
0x1009   :  { %5135 = shalt.err (!%p5132_p11)
}
0x100a   :  { %3601 = dma.vmem_to_hbm [thread:$0]  %s6194_s15, 256, %s6258_s7, [#allocation11], %s5152_s23, %s5152_s23, %s5153_s24  }
0x100b   :  { %5140 = dma.done.wait [#allocation6], 1024  }
0x100c   :  { %5141 = vsyncadd [#allocation6], 4294966272 }
0x100d   :  { %5142 = dma.done.wait [#allocation11], 512  }
0x100e   :  { %5143 = vsyncadd [#allocation11], 4294966784 }
0x100f   :  { %3611 = vsyncpa [#allocation5], 1 }
0x1010   :  { %3612 = vsyncpa [#allocation8], 1 }
0x1011   :  { %3613 = vsyncpa [#allocation6], 1 }
0x1012   :  { %3614 = vsyncpa [#allocation11], 1 }

</bundles_post_ra>
